<compile_context>
chip_gen: v6e
topology: v6e:2x2x1
jax: 0.10.0
libtpu: 0.0.40
codegen_flags: <defaults>
</compile_context>

<pallas_src>
import functools

import jax
import jax.numpy as jnp
from jax import lax
from jax.experimental import pallas as pl
from jax.experimental.pallas import tpu as pltpu


# ----------------------------- small helpers -------------------------------- #

def _pairwise_sum(vals):
    """Tree-sum a list of arrays (keeps ILP across independent accumulators)."""
    while len(vals) > 1:
        nxt = [vals[i] + vals[i + 1] for i in range(0, len(vals) - 1, 2)]
        if len(vals) % 2:
            nxt.append(vals[-1])
        vals = nxt
    return vals[0]


def _tap_sum(load_tap, w_ref, n_taps, n_acc):
    """sum_t load_tap(t) @ w_ref[t], accumulated over `n_acc` independent chains
    (breaks the serial MXU->VALU dependency across the per-tap matmuls)."""
    accs = [None] * max(1, min(n_acc, n_taps))
    for t in range(n_taps):
        part = jnp.dot(load_tap(t), w_ref[t], preferred_element_type=jnp.float32)
        i = t % len(accs)
        accs[i] = part if accs[i] is None else accs[i] + part
    return _pairwise_sum([a for a in accs if a is not None])


# ------------------------------- Pallas kernel ------------------------------ #

def _fused_dqn_kernel(xb_ref, w1_ref, b1_ref, w2_ref, b2_ref, w3_ref, b3_ref,
                      fw1_ref, fb1_ref, fw2_ref, fb2_ref, o_ref,
                      y1_scr, y2_scr, *,
                      bp, oh1, ow1, k2, st2, oh2, ow2, k3, st3, oh3, ow3):
    f32 = jnp.float32
    cin1 = xb_ref.shape[-1]                      # 4*4*C (one 4x4 input block)

    # ---- conv1: 8x8/stride-4 conv expressed as a 2x2 stride-1 conv over the
    # non-overlapping 4x4 input blocks -> 4 tap matmuls with K = 16*C.
    rows1 = oh1 * ow1 * bp

    def load1(t):
        dh, dw = divmod(t, 2)
        xt = xb_ref[pl.ds(dh, oh1), pl.ds(dw, ow1), :, :]      # (oh1, ow1, bp, 16C) bf16
        return xt.astype(f32).reshape(rows1, cin1)

    y1 = _tap_sum(load1, w1_ref, 4, n_acc=2)
    y1 = jnp.maximum(y1 + b1_ref[...], 0.0)                    # rows ordered (h, w, b)
    y1_scr[...] = y1.reshape(oh1, ow1, bp, y1.shape[-1])

    # ---- conv2 (4x4 stride 2): one strided scratch slice per tap, no concat.
    rows2 = oh2 * ow2 * bp
    c1 = y1.shape[-1]

    def load2(t):
        kh, kw = divmod(t, k2)
        xt = y1_scr[pl.ds(kh, oh2, stride=st2), pl.ds(kw, ow2, stride=st2), :, :]
        return xt.reshape(rows2, c1)                           # (oh2*ow2*bp, 32)

    y2 = _tap_sum(load2, w2_ref, k2 * k2, n_acc=4)
    y2 = jnp.maximum(y2 + b2_ref[...], 0.0)
    y2_scr[...] = y2.reshape(oh2, ow2, bp, y2.shape[-1])

    # ---- conv3 (3x3 stride 1): same structure.
    rows3 = oh3 * ow3 * bp
    c2 = y2.shape[-1]

    def load3(t):
        kh, kw = divmod(t, k3)
        xt = y2_scr[pl.ds(kh, oh3, stride=st3), pl.ds(kw, ow3, stride=st3), :, :]
        return xt.reshape(rows3, c2)                           # (oh3*ow3*bp, 64)

    y3 = _tap_sum(load3, w3_ref, k3 * k3, n_acc=3)
    y3 = jnp.maximum(y3 + b3_ref[...], 0.0)                    # rows ordered (h, w, b)

    # ---- noisy fc1: effective weights precomputed outside; PyTorch's NCHW
    # flatten order is folded into fw1's (spatial, channel, hidden) layout.
    sp3 = oh3 * ow3

    def load_fc1(pos):
        return y3[pos * bp:(pos + 1) * bp, :]                  # (bp, 64)

    h = _tap_sum(load_fc1, fw1_ref, sp3, n_acc=2)
    h = jnp.maximum(h + fb1_ref[...], 0.0)                     # (bp, 512)

    # ---- noisy fc2: lane-padded to 128 -> dense (bp, 128) store.
    o_ref[...] = jnp.dot(h, fw2_ref[...], preferred_element_type=f32) + fb2_ref[...]


def _spec(shape):
    # Whole-array block, single grid step (everything here fits VMEM easily).
    return pl.BlockSpec(shape, lambda i: (0,) * len(shape))


# ------------------------------ wrapper (XLA prep) --------------------------- #

def network_forward_pallas(x_nchw, p, *, n_actions):
    """Equivalent of Network.forward: fx = x.float()/256; conv tower; NCHW flatten;
    NoisyLinear(conv_out, 512) + ReLU; NoisyLinear(512, n_actions)."""
    B, C, H, W = x_nchw.shape
    LANE = 128
    bp = max(8, ((B + 7) // 8) * 8)             # pad batch to full sublane groups

    # conv geometry.  Crop H/W to multiples of 4 (the cropped rows/cols are never
    # read by any VALID conv1 window, so this is exact).
    Hc, Wc = (H // 4) * 4, (W // 4) * 4
    assert Hc >= 8 and Wc >= 8, "input too small for the conv stack"
    nbh, nbw = Hc // 4, Wc // 4
    oh1, ow1 = nbh - 1, nbw - 1                 # == (H-8)//4 + 1
    oh2, ow2 = (oh1 - 4) // 2 + 1, (ow1 - 4) // 2 + 1
    oh3, ow3 = oh2 - 2, ow2 - 2
    assert oh2 >= 1 and ow2 >= 1 and oh3 >= 1 and ow3 >= 1, "conv stack invalid"
    sp3, c3 = oh3 * ow3, 64
    hid = p["n1_w"].shape[0]
    assert p["n1_w"].shape[1] == c3 * sp3, "conv_out_size mismatch"

    # ---- input: NCHW -> NHWC, pad batch, reorder into non-overlapping 4x4
    # blocks (nbh, nbw, bp, 16*C).  Ships ~raw input bytes (bf16 is exact for
    # byte frames) instead of a materialized im2col patch matrix.
    x = jnp.transpose(x_nchw, (0, 2, 3, 1))[:, :Hc, :Wc, :]
    if B < bp:
        x = jnp.pad(x, ((0, bp - B), (0, 0), (0, 0), (0, 0)))
    xb = x.reshape(bp, nbh, 4, nbw, 4, C).transpose(1, 3, 0, 2, 4, 5)
    xb = xb.reshape(nbh, nbw, bp, 16 * C).astype(jnp.bfloat16)

    # ---- conv1 weight: (OC,IC,8,8) -> 2x2 block-tap stack (4, 16*IC, 32) with
    # the 1/256 input scale folded in (exact, power of two).
    oc1, ic1 = p["c1_w"].shape[0], p["c1_w"].shape[1]
    w1 = jnp.transpose(p["c1_w"], (2, 3, 1, 0))                        # (8, 8, IC, OC)
    w1 = w1.reshape(2, 4, 2, 4, ic1, oc1).transpose(0, 2, 1, 3, 4, 5)  # (dh,dw,r,s,c,oc)
    w1 = w1.reshape(4, 16 * ic1, oc1) * (1.0 / 256.0)
    b1 = p["c1_b"].reshape(1, -1)

    # ---- conv2 / conv3 weights as per-tap stacks (KH*KW, IC, OC).
    w2 = jnp.transpose(p["c2_w"], (2, 3, 1, 0)).reshape(4 * 4, 32, 64)
    b2 = p["c2_b"].reshape(1, -1)
    w3 = jnp.transpose(p["c3_w"], (2, 3, 1, 0)).reshape(3 * 3, 64, 64)
    b3 = p["c3_b"].reshape(1, -1)

    # ---- effective noisy weights/biases (computed once per epsilon sample,
    # OUTSIDE the kernel -> 3x less FC weight traffic, no per-forward combine).
    fw1 = (p["n1_w"] + p["n1_sw"] * p["n1_ew"]).T                      # (conv_out, 512)
    fb1 = (p["n1_b"] + p["n1_sb"] * p["n1_eb"]).reshape(1, hid)
    fw1 = fw1.reshape(c3, sp3, hid).transpose(1, 0, 2)                 # NCHW-flatten fold
    fw2 = (p["n2_w"] + p["n2_sw"] * p["n2_ew"]).T                      # (512, n_actions)
    fb2 = (p["n2_b"] + p["n2_sb"] * p["n2_eb"]).reshape(1, n_actions)
    n_pad = LANE * ((n_actions + LANE - 1) // LANE)                    # lane-dense output
    fw2 = jnp.pad(fw2, ((0, 0), (0, n_pad - n_actions)))
    fb2 = jnp.pad(fb2, ((0, 0), (0, n_pad - n_actions)))

    kernel = functools.partial(_fused_dqn_kernel, bp=bp, oh1=oh1, ow1=ow1,
                               k2=4, st2=2, oh2=oh2, ow2=ow2,
                               k3=3, st3=1, oh3=oh3, ow3=ow3)

    flops = 2 * (4 * (oh1 * ow1 * bp) * (16 * ic1) * 32
                 + 16 * (oh2 * ow2 * bp) * 32 * 64
                 + 9 * (oh3 * ow3 * bp) * 64 * 64
                 + bp * (c3 * sp3) * hid
                 + bp * hid * n_pad)
    operands = (xb, w1, b1, w2, b2, w3, b3, fw1, fb1, fw2, fb2)
    bytes_accessed = (sum(int(a.size) * a.dtype.itemsize for a in operands)
                      + bp * n_pad * 4)

    out = pl.pallas_call(
        kernel,
        grid=(1,),
        in_specs=[_spec(a.shape) for a in operands],
        out_specs=_spec((bp, n_pad)),
        out_shape=jax.ShapeDtypeStruct((bp, n_pad), jnp.float32),
        scratch_shapes=[pltpu.VMEM((oh1, ow1, bp, 32), jnp.float32),
                        pltpu.VMEM((oh2, ow2, bp, 64), jnp.float32)],
        compiler_params=pltpu.CompilerParams(dimension_semantics=("arbitrary",)),
        cost_estimate=pl.CostEstimate(flops=int(flops), transcendentals=0,
                                      bytes_accessed=int(bytes_accessed)),
    )(*operands)

    return out[:B, :n_actions]


# ------------------------------ pure-JAX reference --------------------------- #

def network_forward_ref(x_nchw, p):
    fx = x_nchw.astype(jnp.float32) / 256.0
    x = jnp.transpose(fx, (0, 2, 3, 1))

    def conv(x, w, b, s):
        y = lax.conv_general_dilated(
            x, jnp.transpose(w, (2, 3, 1, 0)), (s, s), "VALID",
            dimension_numbers=("NHWC", "HWIO", "NHWC"))
        return jax.nn.relu(y + b)

    x = conv(x, p["c1_w"], p["c1_b"], 4)
    x = conv(x, p["c2_w"], p["c2_b"], 2)
    x = conv(x, p["c3_w"], p["c3_b"], 1)
    flat = jnp.transpose(x, (0, 3, 1, 2)).reshape(x.shape[0], -1)   # NCHW flatten
    w1 = p["n1_w"] + p["n1_sw"] * p["n1_ew"]
    b1 = p["n1_b"] + p["n1_sb"] * p["n1_eb"]
    h = jax.nn.relu(flat @ w1.T + b1)
    w2 = p["n2_w"] + p["n2_sw"] * p["n2_ew"]
    b2 = p["n2_b"] + p["n2_sb"] * p["n2_eb"]
    return h @ w2.T + b2


# ------------------------------- parameter init ------------------------------ #

def init_params(key, in_channels, n_actions, conv_out_size, hidden=512):
    ks = iter(jax.random.split(key, 32))

    def uni(shape, fan_in):
        bound = 1.0 / jnp.sqrt(jnp.float32(fan_in))
        return jax.random.uniform(next(ks), shape, jnp.float32, -bound, bound)

    p = {}
    # conv tower: Conv2d(C,32,8,4) / Conv2d(32,64,4,2) / Conv2d(64,64,3,1)
    p["c1_w"] = uni((32, in_channels, 8, 8), in_channels * 8 * 8)
    p["c1_b"] = uni((32,), in_channels * 8 * 8)
    p["c2_w"] = uni((64, 32, 4, 4), 32 * 4 * 4)
    p["c2_b"] = uni((64,), 32 * 4 * 4)
    p["c3_w"] = uni((64, 64, 3, 3), 64 * 3 * 3)
    p["c3_b"] = uni((64,), 64 * 3 * 3)

    # NoisyLinear(conv_out, 512) and NoisyLinear(512, n_actions)
    sigma_init = 0.017
    for name, (fin, fout) in (("n1", (conv_out_size, hidden)),
                              ("n2", (hidden, n_actions))):
        p[f"{name}_w"] = uni((fout, fin), fin)
        p[f"{name}_b"] = uni((fout,), fin)
        p[f"{name}_sw"] = jnp.full((fout, fin), sigma_init, jnp.float32)
        p[f"{name}_sb"] = jnp.full((fout,), sigma_init, jnp.float32)
        # epsilon buffers: sampled once, deterministic (stand-in for .normal_())
        p[f"{name}_ew"] = jax.random.normal(next(ks), (fout, fin), jnp.float32)
        p[f"{name}_eb"] = jax.random.normal(next(ks), (fout,), jnp.float32)
    return p


# ------------------------------------ main ------------------------------------ #

if __name__ == "__main__":
    # Smallest spatial size the conv stack supports is 36x36:
    # (36-8)/4+1=8 -> (8-4)/2+1=3 -> 3-3+1=1, so conv_out_size = 64*1*1 = 64.
    B, C, H, W = 2, 4, 36, 36
    n_actions = 6
    conv_out_size = 64

    key = jax.random.PRNGKey(0)
    k_x, k_p = jax.random.split(key)
    x = jax.random.randint(k_x, (B, C, H, W), 0, 256, jnp.int32).astype(jnp.uint8)
    params = init_params(k_p, C, n_actions, conv_out_size)

    fwd = jax.jit(functools.partial(network_forward_pallas, n_actions=n_actions))
    q_pallas = jax.block_until_ready(fwd(x, params))

    q_ref = network_forward_ref(x, params)
    assert q_pallas.shape == (B, n_actions)
    assert q_pallas.dtype == jnp.float32
    assert jnp.allclose(q_pallas, q_ref, rtol=2e-4, atol=2e-4), (
        "Pallas output mismatch vs pure-JAX reference")

    print("KERNEL_OK")
</pallas_src>

<mosaic_0001>
module attributes {stable_mosaic.version = 11 : i64} {
  func.func @_fused_dqn_kernel(%arg0: i32, %arg1: memref<9x9x8x64xbf16, #tpu.memory_space<vmem>>, %arg2: memref<4x64x32xf32, #tpu.memory_space<vmem>>, %arg3: memref<1x32xf32, #tpu.memory_space<vmem>>, %arg4: memref<16x32x64xf32, #tpu.memory_space<vmem>>, %arg5: memref<1x64xf32, #tpu.memory_space<vmem>>, %arg6: memref<9x64x64xf32, #tpu.memory_space<vmem>>, %arg7: memref<1x64xf32, #tpu.memory_space<vmem>>, %arg8: memref<1x64x512xf32, #tpu.memory_space<vmem>>, %arg9: memref<1x512xf32, #tpu.memory_space<vmem>>, %arg10: memref<512x128xf32, #tpu.memory_space<vmem>>, %arg11: memref<1x128xf32, #tpu.memory_space<vmem>>, %arg12: memref<8x128xf32, #tpu.memory_space<vmem>>, %arg13: memref<8x8x8x32xf32, #tpu.memory_space<vmem>>, %arg14: memref<3x3x8x64xf32, #tpu.memory_space<vmem>>) attributes {dimension_semantics = [#tpu.dimension_semantics<arbitrary>], iteration_bounds = array<i64: 1>, scalar_prefetch = 0 : i64, scratch_operands = 2 : i64, tpu.core_type = #tpu.core_type<tc>, window_params = [{pipeline_mode = #tpu.pipeline_mode<synchronous>, transform_indices = @transform_0, window_bounds = array<i64: 9, 9, 8, 64>}, {pipeline_mode = #tpu.pipeline_mode<synchronous>, transform_indices = @transform_1, window_bounds = array<i64: 4, 64, 32>}, {pipeline_mode = #tpu.pipeline_mode<synchronous>, transform_indices = @transform_2, window_bounds = array<i64: 1, 32>}, {pipeline_mode = #tpu.pipeline_mode<synchronous>, transform_indices = @transform_3, window_bounds = array<i64: 16, 32, 64>}, {pipeline_mode = #tpu.pipeline_mode<synchronous>, transform_indices = @transform_4, window_bounds = array<i64: 1, 64>}, {pipeline_mode = #tpu.pipeline_mode<synchronous>, transform_indices = @transform_5, window_bounds = array<i64: 9, 64, 64>}, {pipeline_mode = #tpu.pipeline_mode<synchronous>, transform_indices = @transform_6, window_bounds = array<i64: 1, 64>}, {pipeline_mode = #tpu.pipeline_mode<synchronous>, transform_indices = @transform_7, window_bounds = array<i64: 1, 64, 512>}, {pipeline_mode = #tpu.pipeline_mode<synchronous>, transform_indices = @transform_8, window_bounds = array<i64: 1, 512>}, {pipeline_mode = #tpu.pipeline_mode<synchronous>, transform_indices = @transform_9, window_bounds = array<i64: 512, 128>}, {pipeline_mode = #tpu.pipeline_mode<synchronous>, transform_indices = @transform_10, window_bounds = array<i64: 1, 128>}, {pipeline_mode = #tpu.pipeline_mode<synchronous>, transform_indices = @transform_11, window_bounds = array<i64: 8, 128>}]} {
    %c0 = arith.constant 0 : index
    %c0_0 = arith.constant 0 : index
    %c0_1 = arith.constant 0 : index
    %c0_2 = arith.constant 0 : index
    %0 = vector.load %arg1[%c0, %c0_0, %c0_1, %c0_2] : memref<9x9x8x64xbf16, #tpu.memory_space<vmem>>, vector<8x8x8x64xbf16>
    %1 = arith.extf %0 : vector<8x8x8x64xbf16> to vector<8x8x8x64xf32>
    %2 = vector.shape_cast %1 : vector<8x8x8x64xf32> to vector<512x64xf32>
    %c0_3 = arith.constant 0 : index
    %c0_4 = arith.constant 0 : index
    %c0_5 = arith.constant 0 : index
    %3 = vector.load %arg2[%c0_3, %c0_4, %c0_5] : memref<4x64x32xf32, #tpu.memory_space<vmem>>, vector<1x64x32xf32>
    %4 = vector.shape_cast %3 : vector<1x64x32xf32> to vector<64x32xf32>
    %cst = arith.constant dense<0.000000e+00> : vector<512x32xf32>
    %5 = tpu.matmul %2, %4, %cst {dimension_numbers = #tpu.dot_dimension_numbers<[1], [0], [0], [1], [0, 0, 1, 1], [], []>} : vector<512x64xf32>, vector<64x32xf32>, vector<512x32xf32> -> vector<512x32xf32>
    %c0_6 = arith.constant 0 : index
    %c1 = arith.constant 1 : index
    %c0_7 = arith.constant 0 : index
    %c0_8 = arith.constant 0 : index
    %6 = vector.load %arg1[%c0_6, %c1, %c0_7, %c0_8] : memref<9x9x8x64xbf16, #tpu.memory_space<vmem>>, vector<8x8x8x64xbf16>
    %7 = arith.extf %6 : vector<8x8x8x64xbf16> to vector<8x8x8x64xf32>
    %8 = vector.shape_cast %7 : vector<8x8x8x64xf32> to vector<512x64xf32>
    %c1_9 = arith.constant 1 : index
    %c0_10 = arith.constant 0 : index
    %c0_11 = arith.constant 0 : index
    %9 = vector.load %arg2[%c1_9, %c0_10, %c0_11] : memref<4x64x32xf32, #tpu.memory_space<vmem>>, vector<1x64x32xf32>
    %10 = vector.shape_cast %9 : vector<1x64x32xf32> to vector<64x32xf32>
    %cst_12 = arith.constant dense<0.000000e+00> : vector<512x32xf32>
    %11 = tpu.matmul %8, %10, %cst_12 {dimension_numbers = #tpu.dot_dimension_numbers<[1], [0], [0], [1], [0, 0, 1, 1], [], []>} : vector<512x64xf32>, vector<64x32xf32>, vector<512x32xf32> -> vector<512x32xf32>
    %c1_13 = arith.constant 1 : index
    %c0_14 = arith.constant 0 : index
    %c0_15 = arith.constant 0 : index
    %c0_16 = arith.constant 0 : index
    %12 = vector.load %arg1[%c1_13, %c0_14, %c0_15, %c0_16] : memref<9x9x8x64xbf16, #tpu.memory_space<vmem>>, vector<8x8x8x64xbf16>
    %13 = arith.extf %12 : vector<8x8x8x64xbf16> to vector<8x8x8x64xf32>
    %14 = vector.shape_cast %13 : vector<8x8x8x64xf32> to vector<512x64xf32>
    %c2 = arith.constant 2 : index
    %c0_17 = arith.constant 0 : index
    %c0_18 = arith.constant 0 : index
    %15 = vector.load %arg2[%c2, %c0_17, %c0_18] : memref<4x64x32xf32, #tpu.memory_space<vmem>>, vector<1x64x32xf32>
    %16 = vector.shape_cast %15 : vector<1x64x32xf32> to vector<64x32xf32>
    %cst_19 = arith.constant dense<0.000000e+00> : vector<512x32xf32>
    %17 = tpu.matmul %14, %16, %cst_19 {dimension_numbers = #tpu.dot_dimension_numbers<[1], [0], [0], [1], [0, 0, 1, 1], [], []>} : vector<512x64xf32>, vector<64x32xf32>, vector<512x32xf32> -> vector<512x32xf32>
    %18 = arith.addf %5, %17 : vector<512x32xf32>
    %c1_20 = arith.constant 1 : index
    %c1_21 = arith.constant 1 : index
    %c0_22 = arith.constant 0 : index
    %c0_23 = arith.constant 0 : index
    %19 = vector.load %arg1[%c1_20, %c1_21, %c0_22, %c0_23] : memref<9x9x8x64xbf16, #tpu.memory_space<vmem>>, vector<8x8x8x64xbf16>
    %20 = arith.extf %19 : vector<8x8x8x64xbf16> to vector<8x8x8x64xf32>
    %21 = vector.shape_cast %20 : vector<8x8x8x64xf32> to vector<512x64xf32>
    %c3 = arith.constant 3 : index
    %c0_24 = arith.constant 0 : index
    %c0_25 = arith.constant 0 : index
    %22 = vector.load %arg2[%c3, %c0_24, %c0_25] : memref<4x64x32xf32, #tpu.memory_space<vmem>>, vector<1x64x32xf32>
    %23 = vector.shape_cast %22 : vector<1x64x32xf32> to vector<64x32xf32>
    %cst_26 = arith.constant dense<0.000000e+00> : vector<512x32xf32>
    %24 = tpu.matmul %21, %23, %cst_26 {dimension_numbers = #tpu.dot_dimension_numbers<[1], [0], [0], [1], [0, 0, 1, 1], [], []>} : vector<512x64xf32>, vector<64x32xf32>, vector<512x32xf32> -> vector<512x32xf32>
    %25 = arith.addf %11, %24 : vector<512x32xf32>
    %26 = arith.addf %18, %25 : vector<512x32xf32>
    %c0_27 = arith.constant 0 : index
    %c0_28 = arith.constant 0 : index
    %27 = vector.load %arg3[%c0_27, %c0_28] : memref<1x32xf32, #tpu.memory_space<vmem>>, vector<1x32xf32>
    %28 = vector.broadcast %27 : vector<1x32xf32> to vector<512x32xf32>
    %29 = arith.addf %26, %28 : vector<512x32xf32>
    %cst_29 = arith.constant 0.000000e+00 : f32
    %30 = vector.broadcast %cst_29 : f32 to vector<512x32xf32>
    %31 = arith.maximumf %29, %30 : vector<512x32xf32>
    %32 = vector.shape_cast %31 : vector<512x32xf32> to vector<8x8x8x32xf32>
    %c0_30 = arith.constant 0 : index
    %c0_31 = arith.constant 0 : index
    %c0_32 = arith.constant 0 : index
    %c0_33 = arith.constant 0 : index
    %33 = vector.load %arg13[%c0_30, %c0_31, %c0_32, %c0_33] : memref<8x8x8x32xf32, #tpu.memory_space<vmem>>, vector<8x8x8x32xf32>
    tpu.vector_store %arg13[%c0_30, %c0_31, %c0_32, %c0_33], %32 {strides = array<i32>} : memref<8x8x8x32xf32, #tpu.memory_space<vmem>>, vector<8x8x8x32xf32>,
    %c0_34 = arith.constant 0 : index
    %c0_35 = arith.constant 0 : index
    %c0_36 = arith.constant 0 : index
    %c0_37 = arith.constant 0 : index
    %34 = tpu.strided_load %arg13[%c0_34, %c0_35, %c0_36, %c0_37] {strides = array<i32: 2, 2, 1, 1>} : memref<8x8x8x32xf32, #tpu.memory_space<vmem>>, vector<3x3x8x32xf32>
    %35 = vector.shape_cast %34 : vector<3x3x8x32xf32> to vector<72x32xf32>
    %c0_38 = arith.constant 0 : index
    %c0_39 = arith.constant 0 : index
    %c0_40 = arith.constant 0 : index
    %36 = vector.load %arg4[%c0_38, %c0_39, %c0_40] : memref<16x32x64xf32, #tpu.memory_space<vmem>>, vector<1x32x64xf32>
    %37 = vector.shape_cast %36 : vector<1x32x64xf32> to vector<32x64xf32>
    %cst_41 = arith.constant dense<0.000000e+00> : vector<72x64xf32>
    %38 = tpu.matmul %35, %37, %cst_41 {dimension_numbers = #tpu.dot_dimension_numbers<[1], [0], [0], [1], [0, 0, 1, 1], [], []>} : vector<72x32xf32>, vector<32x64xf32>, vector<72x64xf32> -> vector<72x64xf32>
    %c0_42 = arith.constant 0 : index
    %c1_43 = arith.constant 1 : index
    %c0_44 = arith.constant 0 : index
    %c0_45 = arith.constant 0 : index
    %39 = tpu.strided_load %arg13[%c0_42, %c1_43, %c0_44, %c0_45] {strides = array<i32: 2, 2, 1, 1>} : memref<8x8x8x32xf32, #tpu.memory_space<vmem>>, vector<3x3x8x32xf32>
    %40 = vector.shape_cast %39 : vector<3x3x8x32xf32> to vector<72x32xf32>
    %c1_46 = arith.constant 1 : index
    %c0_47 = arith.constant 0 : index
    %c0_48 = arith.constant 0 : index
    %41 = vector.load %arg4[%c1_46, %c0_47, %c0_48] : memref<16x32x64xf32, #tpu.memory_space<vmem>>, vector<1x32x64xf32>
    %42 = vector.shape_cast %41 : vector<1x32x64xf32> to vector<32x64xf32>
    %cst_49 = arith.constant dense<0.000000e+00> : vector<72x64xf32>
    %43 = tpu.matmul %40, %42, %cst_49 {dimension_numbers = #tpu.dot_dimension_numbers<[1], [0], [0], [1], [0, 0, 1, 1], [], []>} : vector<72x32xf32>, vector<32x64xf32>, vector<72x64xf32> -> vector<72x64xf32>
    %c0_50 = arith.constant 0 : index
    %c2_51 = arith.constant 2 : index
    %c0_52 = arith.constant 0 : index
    %c0_53 = arith.constant 0 : index
    %44 = tpu.strided_load %arg13[%c0_50, %c2_51, %c0_52, %c0_53] {strides = array<i32: 2, 2, 1, 1>} : memref<8x8x8x32xf32, #tpu.memory_space<vmem>>, vector<3x3x8x32xf32>
    %45 = vector.shape_cast %44 : vector<3x3x8x32xf32> to vector<72x32xf32>
    %c2_54 = arith.constant 2 : index
    %c0_55 = arith.constant 0 : index
    %c0_56 = arith.constant 0 : index
    %46 = vector.load %arg4[%c2_54, %c0_55, %c0_56] : memref<16x32x64xf32, #tpu.memory_space<vmem>>, vector<1x32x64xf32>
    %47 = vector.shape_cast %46 : vector<1x32x64xf32> to vector<32x64xf32>
    %cst_57 = arith.constant dense<0.000000e+00> : vector<72x64xf32>
    %48 = tpu.matmul %45, %47, %cst_57 {dimension_numbers = #tpu.dot_dimension_numbers<[1], [0], [0], [1], [0, 0, 1, 1], [], []>} : vector<72x32xf32>, vector<32x64xf32>, vector<72x64xf32> -> vector<72x64xf32>
    %c0_58 = arith.constant 0 : index
    %c3_59 = arith.constant 3 : index
    %c0_60 = arith.constant 0 : index
    %c0_61 = arith.constant 0 : index
    %49 = tpu.strided_load %arg13[%c0_58, %c3_59, %c0_60, %c0_61] {strides = array<i32: 2, 2, 1, 1>} : memref<8x8x8x32xf32, #tpu.memory_space<vmem>>, vector<3x3x8x32xf32>
    %50 = vector.shape_cast %49 : vector<3x3x8x32xf32> to vector<72x32xf32>
    %c3_62 = arith.constant 3 : index
    %c0_63 = arith.constant 0 : index
    %c0_64 = arith.constant 0 : index
    %51 = vector.load %arg4[%c3_62, %c0_63, %c0_64] : memref<16x32x64xf32, #tpu.memory_space<vmem>>, vector<1x32x64xf32>
    %52 = vector.shape_cast %51 : vector<1x32x64xf32> to vector<32x64xf32>
    %cst_65 = arith.constant dense<0.000000e+00> : vector<72x64xf32>
    %53 = tpu.matmul %50, %52, %cst_65 {dimension_numbers = #tpu.dot_dimension_numbers<[1], [0], [0], [1], [0, 0, 1, 1], [], []>} : vector<72x32xf32>, vector<32x64xf32>, vector<72x64xf32> -> vector<72x64xf32>
    %c1_66 = arith.constant 1 : index
    %c0_67 = arith.constant 0 : index
    %c0_68 = arith.constant 0 : index
    %c0_69 = arith.constant 0 : index
    %54 = tpu.strided_load %arg13[%c1_66, %c0_67, %c0_68, %c0_69] {strides = array<i32: 2, 2, 1, 1>} : memref<8x8x8x32xf32, #tpu.memory_space<vmem>>, vector<3x3x8x32xf32>
    %55 = vector.shape_cast %54 : vector<3x3x8x32xf32> to vector<72x32xf32>
    %c4 = arith.constant 4 : index
    %c0_70 = arith.constant 0 : index
    %c0_71 = arith.constant 0 : index
    %56 = vector.load %arg4[%c4, %c0_70, %c0_71] : memref<16x32x64xf32, #tpu.memory_space<vmem>>, vector<1x32x64xf32>
    %57 = vector.shape_cast %56 : vector<1x32x64xf32> to vector<32x64xf32>
    %cst_72 = arith.constant dense<0.000000e+00> : vector<72x64xf32>
    %58 = tpu.matmul %55, %57, %cst_72 {dimension_numbers = #tpu.dot_dimension_numbers<[1], [0], [0], [1], [0, 0, 1, 1], [], []>} : vector<72x32xf32>, vector<32x64xf32>, vector<72x64xf32> -> vector<72x64xf32>
    %59 = arith.addf %38, %58 : vector<72x64xf32>
    %c1_73 = arith.constant 1 : index
    %c1_74 = arith.constant 1 : index
    %c0_75 = arith.constant 0 : index
    %c0_76 = arith.constant 0 : index
    %60 = tpu.strided_load %arg13[%c1_73, %c1_74, %c0_75, %c0_76] {strides = array<i32: 2, 2, 1, 1>} : memref<8x8x8x32xf32, #tpu.memory_space<vmem>>, vector<3x3x8x32xf32>
    %61 = vector.shape_cast %60 : vector<3x3x8x32xf32> to vector<72x32xf32>
    %c5 = arith.constant 5 : index
    %c0_77 = arith.constant 0 : index
    %c0_78 = arith.constant 0 : index
    %62 = vector.load %arg4[%c5, %c0_77, %c0_78] : memref<16x32x64xf32, #tpu.memory_space<vmem>>, vector<1x32x64xf32>
    %63 = vector.shape_cast %62 : vector<1x32x64xf32> to vector<32x64xf32>
    %cst_79 = arith.constant dense<0.000000e+00> : vector<72x64xf32>
    %64 = tpu.matmul %61, %63, %cst_79 {dimension_numbers = #tpu.dot_dimension_numbers<[1], [0], [0], [1], [0, 0, 1, 1], [], []>} : vector<72x32xf32>, vector<32x64xf32>, vector<72x64xf32> -> vector<72x64xf32>
    %65 = arith.addf %43, %64 : vector<72x64xf32>
    %c1_80 = arith.constant 1 : index
    %c2_81 = arith.constant 2 : index
    %c0_82 = arith.constant 0 : index
    %c0_83 = arith.constant 0 : index
    %66 = tpu.strided_load %arg13[%c1_80, %c2_81, %c0_82, %c0_83] {strides = array<i32: 2, 2, 1, 1>} : memref<8x8x8x32xf32, #tpu.memory_space<vmem>>, vector<3x3x8x32xf32>
    %67 = vector.shape_cast %66 : vector<3x3x8x32xf32> to vector<72x32xf32>
    %c6 = arith.constant 6 : index
    %c0_84 = arith.constant 0 : index
    %c0_85 = arith.constant 0 : index
    %68 = vector.load %arg4[%c6, %c0_84, %c0_85] : memref<16x32x64xf32, #tpu.memory_space<vmem>>, vector<1x32x64xf32>
    %69 = vector.shape_cast %68 : vector<1x32x64xf32> to vector<32x64xf32>
    %cst_86 = arith.constant dense<0.000000e+00> : vector<72x64xf32>
    %70 = tpu.matmul %67, %69, %cst_86 {dimension_numbers = #tpu.dot_dimension_numbers<[1], [0], [0], [1], [0, 0, 1, 1], [], []>} : vector<72x32xf32>, vector<32x64xf32>, vector<72x64xf32> -> vector<72x64xf32>
    %71 = arith.addf %48, %70 : vector<72x64xf32>
    %c1_87 = arith.constant 1 : index
    %c3_88 = arith.constant 3 : index
    %c0_89 = arith.constant 0 : index
    %c0_90 = arith.constant 0 : index
    %72 = tpu.strided_load %arg13[%c1_87, %c3_88, %c0_89, %c0_90] {strides = array<i32: 2, 2, 1, 1>} : memref<8x8x8x32xf32, #tpu.memory_space<vmem>>, vector<3x3x8x32xf32>
    %73 = vector.shape_cast %72 : vector<3x3x8x32xf32> to vector<72x32xf32>
    %c7 = arith.constant 7 : index
    %c0_91 = arith.constant 0 : index
    %c0_92 = arith.constant 0 : index
    %74 = vector.load %arg4[%c7, %c0_91, %c0_92] : memref<16x32x64xf32, #tpu.memory_space<vmem>>, vector<1x32x64xf32>
    %75 = vector.shape_cast %74 : vector<1x32x64xf32> to vector<32x64xf32>
    %cst_93 = arith.constant dense<0.000000e+00> : vector<72x64xf32>
    %76 = tpu.matmul %73, %75, %cst_93 {dimension_numbers = #tpu.dot_dimension_numbers<[1], [0], [0], [1], [0, 0, 1, 1], [], []>} : vector<72x32xf32>, vector<32x64xf32>, vector<72x64xf32> -> vector<72x64xf32>
    %77 = arith.addf %53, %76 : vector<72x64xf32>
    %c2_94 = arith.constant 2 : index
    %c0_95 = arith.constant 0 : index
    %c0_96 = arith.constant 0 : index
    %c0_97 = arith.constant 0 : index
    %78 = tpu.strided_load %arg13[%c2_94, %c0_95, %c0_96, %c0_97] {strides = array<i32: 2, 2, 1, 1>} : memref<8x8x8x32xf32, #tpu.memory_space<vmem>>, vector<3x3x8x32xf32>
    %79 = vector.shape_cast %78 : vector<3x3x8x32xf32> to vector<72x32xf32>
    %c8 = arith.constant 8 : index
    %c0_98 = arith.constant 0 : index
    %c0_99 = arith.constant 0 : index
    %80 = vector.load %arg4[%c8, %c0_98, %c0_99] : memref<16x32x64xf32, #tpu.memory_space<vmem>>, vector<1x32x64xf32>
    %81 = vector.shape_cast %80 : vector<1x32x64xf32> to vector<32x64xf32>
    %cst_100 = arith.constant dense<0.000000e+00> : vector<72x64xf32>
    %82 = tpu.matmul %79, %81, %cst_100 {dimension_numbers = #tpu.dot_dimension_numbers<[1], [0], [0], [1], [0, 0, 1, 1], [], []>} : vector<72x32xf32>, vector<32x64xf32>, vector<72x64xf32> -> vector<72x64xf32>
    %83 = arith.addf %59, %82 : vector<72x64xf32>
    %c2_101 = arith.constant 2 : index
    %c1_102 = arith.constant 1 : index
    %c0_103 = arith.constant 0 : index
    %c0_104 = arith.constant 0 : index
    %84 = tpu.strided_load %arg13[%c2_101, %c1_102, %c0_103, %c0_104] {strides = array<i32: 2, 2, 1, 1>} : memref<8x8x8x32xf32, #tpu.memory_space<vmem>>, vector<3x3x8x32xf32>
    %85 = vector.shape_cast %84 : vector<3x3x8x32xf32> to vector<72x32xf32>
    %c9 = arith.constant 9 : index
    %c0_105 = arith.constant 0 : index
    %c0_106 = arith.constant 0 : index
    %86 = vector.load %arg4[%c9, %c0_105, %c0_106] : memref<16x32x64xf32, #tpu.memory_space<vmem>>, vector<1x32x64xf32>
    %87 = vector.shape_cast %86 : vector<1x32x64xf32> to vector<32x64xf32>
    %cst_107 = arith.constant dense<0.000000e+00> : vector<72x64xf32>
    %88 = tpu.matmul %85, %87, %cst_107 {dimension_numbers = #tpu.dot_dimension_numbers<[1], [0], [0], [1], [0, 0, 1, 1], [], []>} : vector<72x32xf32>, vector<32x64xf32>, vector<72x64xf32> -> vector<72x64xf32>
    %89 = arith.addf %65, %88 : vector<72x64xf32>
    %c2_108 = arith.constant 2 : index
    %c2_109 = arith.constant 2 : index
    %c0_110 = arith.constant 0 : index
    %c0_111 = arith.constant 0 : index
    %90 = tpu.strided_load %arg13[%c2_108, %c2_109, %c0_110, %c0_111] {strides = array<i32: 2, 2, 1, 1>} : memref<8x8x8x32xf32, #tpu.memory_space<vmem>>, vector<3x3x8x32xf32>
    %91 = vector.shape_cast %90 : vector<3x3x8x32xf32> to vector<72x32xf32>
    %c10 = arith.constant 10 : index
    %c0_112 = arith.constant 0 : index
    %c0_113 = arith.constant 0 : index
    %92 = vector.load %arg4[%c10, %c0_112, %c0_113] : memref<16x32x64xf32, #tpu.memory_space<vmem>>, vector<1x32x64xf32>
    %93 = vector.shape_cast %92 : vector<1x32x64xf32> to vector<32x64xf32>
    %cst_114 = arith.constant dense<0.000000e+00> : vector<72x64xf32>
    %94 = tpu.matmul %91, %93, %cst_114 {dimension_numbers = #tpu.dot_dimension_numbers<[1], [0], [0], [1], [0, 0, 1, 1], [], []>} : vector<72x32xf32>, vector<32x64xf32>, vector<72x64xf32> -> vector<72x64xf32>
    %95 = arith.addf %71, %94 : vector<72x64xf32>
    %c2_115 = arith.constant 2 : index
    %c3_116 = arith.constant 3 : index
    %c0_117 = arith.constant 0 : index
    %c0_118 = arith.constant 0 : index
    %96 = tpu.strided_load %arg13[%c2_115, %c3_116, %c0_117, %c0_118] {strides = array<i32: 2, 2, 1, 1>} : memref<8x8x8x32xf32, #tpu.memory_space<vmem>>, vector<3x3x8x32xf32>
    %97 = vector.shape_cast %96 : vector<3x3x8x32xf32> to vector<72x32xf32>
    %c11 = arith.constant 11 : index
    %c0_119 = arith.constant 0 : index
    %c0_120 = arith.constant 0 : index
    %98 = vector.load %arg4[%c11, %c0_119, %c0_120] : memref<16x32x64xf32, #tpu.memory_space<vmem>>, vector<1x32x64xf32>
    %99 = vector.shape_cast %98 : vector<1x32x64xf32> to vector<32x64xf32>
    %cst_121 = arith.constant dense<0.000000e+00> : vector<72x64xf32>
    %100 = tpu.matmul %97, %99, %cst_121 {dimension_numbers = #tpu.dot_dimension_numbers<[1], [0], [0], [1], [0, 0, 1, 1], [], []>} : vector<72x32xf32>, vector<32x64xf32>, vector<72x64xf32> -> vector<72x64xf32>
    %101 = arith.addf %77, %100 : vector<72x64xf32>
    %c3_122 = arith.constant 3 : index
    %c0_123 = arith.constant 0 : index
    %c0_124 = arith.constant 0 : index
    %c0_125 = arith.constant 0 : index
    %102 = tpu.strided_load %arg13[%c3_122, %c0_123, %c0_124, %c0_125] {strides = array<i32: 2, 2, 1, 1>} : memref<8x8x8x32xf32, #tpu.memory_space<vmem>>, vector<3x3x8x32xf32>
    %103 = vector.shape_cast %102 : vector<3x3x8x32xf32> to vector<72x32xf32>
    %c12 = arith.constant 12 : index
    %c0_126 = arith.constant 0 : index
    %c0_127 = arith.constant 0 : index
    %104 = vector.load %arg4[%c12, %c0_126, %c0_127] : memref<16x32x64xf32, #tpu.memory_space<vmem>>, vector<1x32x64xf32>
    %105 = vector.shape_cast %104 : vector<1x32x64xf32> to vector<32x64xf32>
    %cst_128 = arith.constant dense<0.000000e+00> : vector<72x64xf32>
    %106 = tpu.matmul %103, %105, %cst_128 {dimension_numbers = #tpu.dot_dimension_numbers<[1], [0], [0], [1], [0, 0, 1, 1], [], []>} : vector<72x32xf32>, vector<32x64xf32>, vector<72x64xf32> -> vector<72x64xf32>
    %107 = arith.addf %83, %106 : vector<72x64xf32>
    %c3_129 = arith.constant 3 : index
    %c1_130 = arith.constant 1 : index
    %c0_131 = arith.constant 0 : index
    %c0_132 = arith.constant 0 : index
    %108 = tpu.strided_load %arg13[%c3_129, %c1_130, %c0_131, %c0_132] {strides = array<i32: 2, 2, 1, 1>} : memref<8x8x8x32xf32, #tpu.memory_space<vmem>>, vector<3x3x8x32xf32>
    %109 = vector.shape_cast %108 : vector<3x3x8x32xf32> to vector<72x32xf32>
    %c13 = arith.constant 13 : index
    %c0_133 = arith.constant 0 : index
    %c0_134 = arith.constant 0 : index
    %110 = vector.load %arg4[%c13, %c0_133, %c0_134] : memref<16x32x64xf32, #tpu.memory_space<vmem>>, vector<1x32x64xf32>
    %111 = vector.shape_cast %110 : vector<1x32x64xf32> to vector<32x64xf32>
    %cst_135 = arith.constant dense<0.000000e+00> : vector<72x64xf32>
    %112 = tpu.matmul %109, %111, %cst_135 {dimension_numbers = #tpu.dot_dimension_numbers<[1], [0], [0], [1], [0, 0, 1, 1], [], []>} : vector<72x32xf32>, vector<32x64xf32>, vector<72x64xf32> -> vector<72x64xf32>
    %113 = arith.addf %89, %112 : vector<72x64xf32>
    %c3_136 = arith.constant 3 : index
    %c2_137 = arith.constant 2 : index
    %c0_138 = arith.constant 0 : index
    %c0_139 = arith.constant 0 : index
    %114 = tpu.strided_load %arg13[%c3_136, %c2_137, %c0_138, %c0_139] {strides = array<i32: 2, 2, 1, 1>} : memref<8x8x8x32xf32, #tpu.memory_space<vmem>>, vector<3x3x8x32xf32>
    %115 = vector.shape_cast %114 : vector<3x3x8x32xf32> to vector<72x32xf32>
    %c14 = arith.constant 14 : index
    %c0_140 = arith.constant 0 : index
    %c0_141 = arith.constant 0 : index
    %116 = vector.load %arg4[%c14, %c0_140, %c0_141] : memref<16x32x64xf32, #tpu.memory_space<vmem>>, vector<1x32x64xf32>
    %117 = vector.shape_cast %116 : vector<1x32x64xf32> to vector<32x64xf32>
    %cst_142 = arith.constant dense<0.000000e+00> : vector<72x64xf32>
    %118 = tpu.matmul %115, %117, %cst_142 {dimension_numbers = #tpu.dot_dimension_numbers<[1], [0], [0], [1], [0, 0, 1, 1], [], []>} : vector<72x32xf32>, vector<32x64xf32>, vector<72x64xf32> -> vector<72x64xf32>
    %119 = arith.addf %95, %118 : vector<72x64xf32>
    %c3_143 = arith.constant 3 : index
    %c3_144 = arith.constant 3 : index
    %c0_145 = arith.constant 0 : index
    %c0_146 = arith.constant 0 : index
    %120 = tpu.strided_load %arg13[%c3_143, %c3_144, %c0_145, %c0_146] {strides = array<i32: 2, 2, 1, 1>} : memref<8x8x8x32xf32, #tpu.memory_space<vmem>>, vector<3x3x8x32xf32>
    %121 = vector.shape_cast %120 : vector<3x3x8x32xf32> to vector<72x32xf32>
    %c15 = arith.constant 15 : index
    %c0_147 = arith.constant 0 : index
    %c0_148 = arith.constant 0 : index
    %122 = vector.load %arg4[%c15, %c0_147, %c0_148] : memref<16x32x64xf32, #tpu.memory_space<vmem>>, vector<1x32x64xf32>
    %123 = vector.shape_cast %122 : vector<1x32x64xf32> to vector<32x64xf32>
    %cst_149 = arith.constant dense<0.000000e+00> : vector<72x64xf32>
    %124 = tpu.matmul %121, %123, %cst_149 {dimension_numbers = #tpu.dot_dimension_numbers<[1], [0], [0], [1], [0, 0, 1, 1], [], []>} : vector<72x32xf32>, vector<32x64xf32>, vector<72x64xf32> -> vector<72x64xf32>
    %125 = arith.addf %101, %124 : vector<72x64xf32>
    %126 = arith.addf %107, %113 : vector<72x64xf32>
    %127 = arith.addf %119, %125 : vector<72x64xf32>
    %128 = arith.addf %126, %127 : vector<72x64xf32>
    %c0_150 = arith.constant 0 : index
    %c0_151 = arith.constant 0 : index
    %129 = vector.load %arg5[%c0_150, %c0_151] : memref<1x64xf32, #tpu.memory_space<vmem>>, vector<1x64xf32>
    %130 = vector.broadcast %129 : vector<1x64xf32> to vector<72x64xf32>
    %131 = arith.addf %128, %130 : vector<72x64xf32>
    %cst_152 = arith.constant 0.000000e+00 : f32
    %132 = vector.broadcast %cst_152 : f32 to vector<72x64xf32>
    %133 = arith.maximumf %131, %132 : vector<72x64xf32>
    %134 = vector.shape_cast %133 : vector<72x64xf32> to vector<3x3x8x64xf32>
    %c0_153 = arith.constant 0 : index
    %c0_154 = arith.constant 0 : index
    %c0_155 = arith.constant 0 : index
    %c0_156 = arith.constant 0 : index
    %135 = vector.load %arg14[%c0_153, %c0_154, %c0_155, %c0_156] : memref<3x3x8x64xf32, #tpu.memory_space<vmem>>, vector<3x3x8x64xf32>
    tpu.vector_store %arg14[%c0_153, %c0_154, %c0_155, %c0_156], %134 {strides = array<i32>} : memref<3x3x8x64xf32, #tpu.memory_space<vmem>>, vector<3x3x8x64xf32>,
    %c0_157 = arith.constant 0 : index
    %c0_158 = arith.constant 0 : index
    %c0_159 = arith.constant 0 : index
    %c0_160 = arith.constant 0 : index
    %136 = vector.load %arg14[%c0_157, %c0_158, %c0_159, %c0_160] : memref<3x3x8x64xf32, #tpu.memory_space<vmem>>, vector<1x1x8x64xf32>
    %137 = vector.shape_cast %136 : vector<1x1x8x64xf32> to vector<8x64xf32>
    %c0_161 = arith.constant 0 : index
    %c0_162 = arith.constant 0 : index
    %c0_163 = arith.constant 0 : index
    %138 = vector.load %arg6[%c0_161, %c0_162, %c0_163] : memref<9x64x64xf32, #tpu.memory_space<vmem>>, vector<1x64x64xf32>
    %139 = vector.shape_cast %138 : vector<1x64x64xf32> to vector<64x64xf32>
    %cst_164 = arith.constant dense<0.000000e+00> : vector<8x64xf32>
    %140 = tpu.matmul %137, %139, %cst_164 {dimension_numbers = #tpu.dot_dimension_numbers<[1], [0], [0], [1], [0, 0, 1, 1], [], []>} : vector<8x64xf32>, vector<64x64xf32>, vector<8x64xf32> -> vector<8x64xf32>
    %c0_165 = arith.constant 0 : index
    %c1_166 = arith.constant 1 : index
    %c0_167 = arith.constant 0 : index
    %c0_168 = arith.constant 0 : index
    %141 = vector.load %arg14[%c0_165, %c1_166, %c0_167, %c0_168] : memref<3x3x8x64xf32, #tpu.memory_space<vmem>>, vector<1x1x8x64xf32>
    %142 = vector.shape_cast %141 : vector<1x1x8x64xf32> to vector<8x64xf32>
    %c1_169 = arith.constant 1 : index
    %c0_170 = arith.constant 0 : index
    %c0_171 = arith.constant 0 : index
    %143 = vector.load %arg6[%c1_169, %c0_170, %c0_171] : memref<9x64x64xf32, #tpu.memory_space<vmem>>, vector<1x64x64xf32>
    %144 = vector.shape_cast %143 : vector<1x64x64xf32> to vector<64x64xf32>
    %cst_172 = arith.constant dense<0.000000e+00> : vector<8x64xf32>
    %145 = tpu.matmul %142, %144, %cst_172 {dimension_numbers = #tpu.dot_dimension_numbers<[1], [0], [0], [1], [0, 0, 1, 1], [], []>} : vector<8x64xf32>, vector<64x64xf32>, vector<8x64xf32> -> vector<8x64xf32>
    %c0_173 = arith.constant 0 : index
    %c2_174 = arith.constant 2 : index
    %c0_175 = arith.constant 0 : index
    %c0_176 = arith.constant 0 : index
    %146 = vector.load %arg14[%c0_173, %c2_174, %c0_175, %c0_176] : memref<3x3x8x64xf32, #tpu.memory_space<vmem>>, vector<1x1x8x64xf32>
    %147 = vector.shape_cast %146 : vector<1x1x8x64xf32> to vector<8x64xf32>
    %c2_177 = arith.constant 2 : index
    %c0_178 = arith.constant 0 : index
    %c0_179 = arith.constant 0 : index
    %148 = vector.load %arg6[%c2_177, %c0_178, %c0_179] : memref<9x64x64xf32, #tpu.memory_space<vmem>>, vector<1x64x64xf32>
    %149 = vector.shape_cast %148 : vector<1x64x64xf32> to vector<64x64xf32>
    %cst_180 = arith.constant dense<0.000000e+00> : vector<8x64xf32>
    %150 = tpu.matmul %147, %149, %cst_180 {dimension_numbers = #tpu.dot_dimension_numbers<[1], [0], [0], [1], [0, 0, 1, 1], [], []>} : vector<8x64xf32>, vector<64x64xf32>, vector<8x64xf32> -> vector<8x64xf32>
    %c1_181 = arith.constant 1 : index
    %c0_182 = arith.constant 0 : index
    %c0_183 = arith.constant 0 : index
    %c0_184 = arith.constant 0 : index
    %151 = vector.load %arg14[%c1_181, %c0_182, %c0_183, %c0_184] : memref<3x3x8x64xf32, #tpu.memory_space<vmem>>, vector<1x1x8x64xf32>
    %152 = vector.shape_cast %151 : vector<1x1x8x64xf32> to vector<8x64xf32>
    %c3_185 = arith.constant 3 : index
    %c0_186 = arith.constant 0 : index
    %c0_187 = arith.constant 0 : index
    %153 = vector.load %arg6[%c3_185, %c0_186, %c0_187] : memref<9x64x64xf32, #tpu.memory_space<vmem>>, vector<1x64x64xf32>
    %154 = vector.shape_cast %153 : vector<1x64x64xf32> to vector<64x64xf32>
    %cst_188 = arith.constant dense<0.000000e+00> : vector<8x64xf32>
    %155 = tpu.matmul %152, %154, %cst_188 {dimension_numbers = #tpu.dot_dimension_numbers<[1], [0], [0], [1], [0, 0, 1, 1], [], []>} : vector<8x64xf32>, vector<64x64xf32>, vector<8x64xf32> -> vector<8x64xf32>
    %156 = arith.addf %140, %155 : vector<8x64xf32>
    %c1_189 = arith.constant 1 : index
    %c1_190 = arith.constant 1 : index
    %c0_191 = arith.constant 0 : index
    %c0_192 = arith.constant 0 : index
    %157 = vector.load %arg14[%c1_189, %c1_190, %c0_191, %c0_192] : memref<3x3x8x64xf32, #tpu.memory_space<vmem>>, vector<1x1x8x64xf32>
    %158 = vector.shape_cast %157 : vector<1x1x8x64xf32> to vector<8x64xf32>
    %c4_193 = arith.constant 4 : index
    %c0_194 = arith.constant 0 : index
    %c0_195 = arith.constant 0 : index
    %159 = vector.load %arg6[%c4_193, %c0_194, %c0_195] : memref<9x64x64xf32, #tpu.memory_space<vmem>>, vector<1x64x64xf32>
    %160 = vector.shape_cast %159 : vector<1x64x64xf32> to vector<64x64xf32>
    %cst_196 = arith.constant dense<0.000000e+00> : vector<8x64xf32>
    %161 = tpu.matmul %158, %160, %cst_196 {dimension_numbers = #tpu.dot_dimension_numbers<[1], [0], [0], [1], [0, 0, 1, 1], [], []>} : vector<8x64xf32>, vector<64x64xf32>, vector<8x64xf32> -> vector<8x64xf32>
    %162 = arith.addf %145, %161 : vector<8x64xf32>
    %c1_197 = arith.constant 1 : index
    %c2_198 = arith.constant 2 : index
    %c0_199 = arith.constant 0 : index
    %c0_200 = arith.constant 0 : index
    %163 = vector.load %arg14[%c1_197, %c2_198, %c0_199, %c0_200] : memref<3x3x8x64xf32, #tpu.memory_space<vmem>>, vector<1x1x8x64xf32>
    %164 = vector.shape_cast %163 : vector<1x1x8x64xf32> to vector<8x64xf32>
    %c5_201 = arith.constant 5 : index
    %c0_202 = arith.constant 0 : index
    %c0_203 = arith.constant 0 : index
    %165 = vector.load %arg6[%c5_201, %c0_202, %c0_203] : memref<9x64x64xf32, #tpu.memory_space<vmem>>, vector<1x64x64xf32>
    %166 = vector.shape_cast %165 : vector<1x64x64xf32> to vector<64x64xf32>
    %cst_204 = arith.constant dense<0.000000e+00> : vector<8x64xf32>
    %167 = tpu.matmul %164, %166, %cst_204 {dimension_numbers = #tpu.dot_dimension_numbers<[1], [0], [0], [1], [0, 0, 1, 1], [], []>} : vector<8x64xf32>, vector<64x64xf32>, vector<8x64xf32> -> vector<8x64xf32>
    %168 = arith.addf %150, %167 : vector<8x64xf32>
    %c2_205 = arith.constant 2 : index
    %c0_206 = arith.constant 0 : index
    %c0_207 = arith.constant 0 : index
    %c0_208 = arith.constant 0 : index
    %169 = vector.load %arg14[%c2_205, %c0_206, %c0_207, %c0_208] : memref<3x3x8x64xf32, #tpu.memory_space<vmem>>, vector<1x1x8x64xf32>
    %170 = vector.shape_cast %169 : vector<1x1x8x64xf32> to vector<8x64xf32>
    %c6_209 = arith.constant 6 : index
    %c0_210 = arith.constant 0 : index
    %c0_211 = arith.constant 0 : index
    %171 = vector.load %arg6[%c6_209, %c0_210, %c0_211] : memref<9x64x64xf32, #tpu.memory_space<vmem>>, vector<1x64x64xf32>
    %172 = vector.shape_cast %171 : vector<1x64x64xf32> to vector<64x64xf32>
    %cst_212 = arith.constant dense<0.000000e+00> : vector<8x64xf32>
    %173 = tpu.matmul %170, %172, %cst_212 {dimension_numbers = #tpu.dot_dimension_numbers<[1], [0], [0], [1], [0, 0, 1, 1], [], []>} : vector<8x64xf32>, vector<64x64xf32>, vector<8x64xf32> -> vector<8x64xf32>
    %174 = arith.addf %156, %173 : vector<8x64xf32>
    %c2_213 = arith.constant 2 : index
    %c1_214 = arith.constant 1 : index
    %c0_215 = arith.constant 0 : index
    %c0_216 = arith.constant 0 : index
    %175 = vector.load %arg14[%c2_213, %c1_214, %c0_215, %c0_216] : memref<3x3x8x64xf32, #tpu.memory_space<vmem>>, vector<1x1x8x64xf32>
    %176 = vector.shape_cast %175 : vector<1x1x8x64xf32> to vector<8x64xf32>
    %c7_217 = arith.constant 7 : index
    %c0_218 = arith.constant 0 : index
    %c0_219 = arith.constant 0 : index
    %177 = vector.load %arg6[%c7_217, %c0_218, %c0_219] : memref<9x64x64xf32, #tpu.memory_space<vmem>>, vector<1x64x64xf32>
    %178 = vector.shape_cast %177 : vector<1x64x64xf32> to vector<64x64xf32>
    %cst_220 = arith.constant dense<0.000000e+00> : vector<8x64xf32>
    %179 = tpu.matmul %176, %178, %cst_220 {dimension_numbers = #tpu.dot_dimension_numbers<[1], [0], [0], [1], [0, 0, 1, 1], [], []>} : vector<8x64xf32>, vector<64x64xf32>, vector<8x64xf32> -> vector<8x64xf32>
    %180 = arith.addf %162, %179 : vector<8x64xf32>
    %c2_221 = arith.constant 2 : index
    %c2_222 = arith.constant 2 : index
    %c0_223 = arith.constant 0 : index
    %c0_224 = arith.constant 0 : index
    %181 = vector.load %arg14[%c2_221, %c2_222, %c0_223, %c0_224] : memref<3x3x8x64xf32, #tpu.memory_space<vmem>>, vector<1x1x8x64xf32>
    %182 = vector.shape_cast %181 : vector<1x1x8x64xf32> to vector<8x64xf32>
    %c8_225 = arith.constant 8 : index
    %c0_226 = arith.constant 0 : index
    %c0_227 = arith.constant 0 : index
    %183 = vector.load %arg6[%c8_225, %c0_226, %c0_227] : memref<9x64x64xf32, #tpu.memory_space<vmem>>, vector<1x64x64xf32>
    %184 = vector.shape_cast %183 : vector<1x64x64xf32> to vector<64x64xf32>
    %cst_228 = arith.constant dense<0.000000e+00> : vector<8x64xf32>
    %185 = tpu.matmul %182, %184, %cst_228 {dimension_numbers = #tpu.dot_dimension_numbers<[1], [0], [0], [1], [0, 0, 1, 1], [], []>} : vector<8x64xf32>, vector<64x64xf32>, vector<8x64xf32> -> vector<8x64xf32>
    %186 = arith.addf %168, %185 : vector<8x64xf32>
    %187 = arith.addf %174, %180 : vector<8x64xf32>
    %188 = arith.addf %187, %186 : vector<8x64xf32>
    %c0_229 = arith.constant 0 : index
    %c0_230 = arith.constant 0 : index
    %189 = vector.load %arg7[%c0_229, %c0_230] : memref<1x64xf32, #tpu.memory_space<vmem>>, vector<1x64xf32>
    %190 = vector.broadcast %189 : vector<1x64xf32> to vector<8x64xf32>
    %191 = arith.addf %188, %190 : vector<8x64xf32>
    %cst_231 = arith.constant 0.000000e+00 : f32
    %192 = vector.broadcast %cst_231 : f32 to vector<8x64xf32>
    %193 = arith.maximumf %191, %192 : vector<8x64xf32>
    %c0_232 = arith.constant 0 : index
    %c0_233 = arith.constant 0 : index
    %c0_234 = arith.constant 0 : index
    %194 = vector.load %arg8[%c0_232, %c0_233, %c0_234] : memref<1x64x512xf32, #tpu.memory_space<vmem>>, vector<1x64x512xf32>
    %195 = vector.shape_cast %194 : vector<1x64x512xf32> to vector<64x512xf32>
    %cst_235 = arith.constant dense<0.000000e+00> : vector<8x512xf32>
    %196 = tpu.matmul %193, %195, %cst_235 {dimension_numbers = #tpu.dot_dimension_numbers<[1], [0], [0], [1], [0, 0, 1, 1], [], []>} : vector<8x64xf32>, vector<64x512xf32>, vector<8x512xf32> -> vector<8x512xf32>
    %c0_236 = arith.constant 0 : index
    %c0_237 = arith.constant 0 : index
    %197 = vector.load %arg9[%c0_236, %c0_237] : memref<1x512xf32, #tpu.memory_space<vmem>>, vector<1x512xf32>
    %198 = vector.broadcast %197 : vector<1x512xf32> to vector<8x512xf32>
    %199 = arith.addf %196, %198 : vector<8x512xf32>
    %cst_238 = arith.constant 0.000000e+00 : f32
    %200 = vector.broadcast %cst_238 : f32 to vector<8x512xf32>
    %201 = arith.maximumf %199, %200 : vector<8x512xf32>
    %c0_239 = arith.constant 0 : index
    %c0_240 = arith.constant 0 : index
    %202 = vector.load %arg10[%c0_239, %c0_240] : memref<512x128xf32, #tpu.memory_space<vmem>>, vector<512x128xf32>
    %cst_241 = arith.constant dense<0.000000e+00> : vector<8x128xf32>
    %203 = tpu.matmul %201, %202, %cst_241 {dimension_numbers = #tpu.dot_dimension_numbers<[1], [0], [0], [1], [0, 0, 1, 1], [], []>} : vector<8x512xf32>, vector<512x128xf32>, vector<8x128xf32> -> vector<8x128xf32>
    %c0_242 = arith.constant 0 : index
    %c0_243 = arith.constant 0 : index
    %204 = vector.load %arg11[%c0_242, %c0_243] : memref<1x128xf32, #tpu.memory_space<vmem>>, vector<1x128xf32>
    %205 = vector.broadcast %204 : vector<1x128xf32> to vector<8x128xf32>
    %206 = arith.addf %203, %205 : vector<8x128xf32>
    %c0_244 = arith.constant 0 : index
    %c0_245 = arith.constant 0 : index
    %207 = vector.load %arg12[%c0_244, %c0_245] : memref<8x128xf32, #tpu.memory_space<vmem>>, vector<8x128xf32>
    tpu.vector_store %arg12[%c0_244, %c0_245], %206 {strides = array<i32>} : memref<8x128xf32, #tpu.memory_space<vmem>>, vector<8x128xf32>,
    return
  }
  func.func @transform_0(%arg0: i32) -> (i32, i32, i32, i32) {
    %c0_i32 = arith.constant 0 : i32
    %c0_i32_0 = arith.constant 0 : i32
    %c0_i32_1 = arith.constant 0 : i32
    %c0_i32_2 = arith.constant 0 : i32
    %c0_i32_3 = arith.constant 0 : i32
    return %c0_i32, %c0_i32_0, %c0_i32_1, %c0_i32_2 : i32, i32, i32, i32
  }
  func.func @transform_1(%arg0: i32) -> (i32, i32, i32) {
    %c0_i32 = arith.constant 0 : i32
    %c0_i32_0 = arith.constant 0 : i32
    %c0_i32_1 = arith.constant 0 : i32
    %c0_i32_2 = arith.constant 0 : i32
    return %c0_i32, %c0_i32_0, %c0_i32_1 : i32, i32, i32
  }
  func.func @transform_2(%arg0: i32) -> (i32, i32) {
    %c0_i32 = arith.constant 0 : i32
    %c0_i32_0 = arith.constant 0 : i32
    %c0_i32_1 = arith.constant 0 : i32
    return %c0_i32, %c0_i32_0 : i32, i32
  }
  func.func @transform_3(%arg0: i32) -> (i32, i32, i32) {
    %c0_i32 = arith.constant 0 : i32
    %c0_i32_0 = arith.constant 0 : i32
    %c0_i32_1 = arith.constant 0 : i32
    %c0_i32_2 = arith.constant 0 : i32
    return %c0_i32, %c0_i32_0, %c0_i32_1 : i32, i32, i32
  }
  func.func @transform_4(%arg0: i32) -> (i32, i32) {
    %c0_i32 = arith.constant 0 : i32
    %c0_i32_0 = arith.constant 0 : i32
    %c0_i32_1 = arith.constant 0 : i32
    return %c0_i32, %c0_i32_0 : i32, i32
  }
  func.func @transform_5(%arg0: i32) -> (i32, i32, i32) {
    %c0_i32 = arith.constant 0 : i32
    %c0_i32_0 = arith.constant 0 : i32
    %c0_i32_1 = arith.constant 0 : i32
    %c0_i32_2 = arith.constant 0 : i32
    return %c0_i32, %c0_i32_0, %c0_i32_1 : i32, i32, i32
  }
  func.func @transform_6(%arg0: i32) -> (i32, i32) {
    %c0_i32 = arith.constant 0 : i32
    %c0_i32_0 = arith.constant 0 : i32
    %c0_i32_1 = arith.constant 0 : i32
    return %c0_i32, %c0_i32_0 : i32, i32
  }
  func.func @transform_7(%arg0: i32) -> (i32, i32, i32) {
    %c0_i32 = arith.constant 0 : i32
    %c0_i32_0 = arith.constant 0 : i32
    %c0_i32_1 = arith.constant 0 : i32
    %c0_i32_2 = arith.constant 0 : i32
    return %c0_i32, %c0_i32_0, %c0_i32_1 : i32, i32, i32
  }
  func.func @transform_8(%arg0: i32) -> (i32, i32) {
    %c0_i32 = arith.constant 0 : i32
    %c0_i32_0 = arith.constant 0 : i32
    %c0_i32_1 = arith.constant 0 : i32
    return %c0_i32, %c0_i32_0 : i32, i32
  }
  func.func @transform_9(%arg0: i32) -> (i32, i32) {
    %c0_i32 = arith.constant 0 : i32
    %c0_i32_0 = arith.constant 0 : i32
    %c0_i32_1 = arith.constant 0 : i32
    return %c0_i32, %c0_i32_0 : i32, i32
  }
  func.func @transform_10(%arg0: i32) -> (i32, i32) {
    %c0_i32 = arith.constant 0 : i32
    %c0_i32_0 = arith.constant 0 : i32
    %c0_i32_1 = arith.constant 0 : i32
    return %c0_i32, %c0_i32_0 : i32, i32
  }
  func.func @transform_11(%arg0: i32) -> (i32, i32) {
    %c0_i32 = arith.constant 0 : i32
    %c0_i32_0 = arith.constant 0 : i32
    %c0_i32_1 = arith.constant 0 : i32
    return %c0_i32, %c0_i32_0 : i32, i32
  }
}

</mosaic_0001>

<bundles_post_ra>
// kernel: mul.10
= control target key start
LH: loop header
LB: loop body
LE: loop exit
PB: predicated region body
PF: predicated region fallthrough
CT: control target
= control target key end

     0   :  { %s100_s0 = inlined_call_operand.vmem [shape: f32[6,512], index: 0, kind: input, shape index: {}]   ;;  %s101_s1 = inlined_call_operand.vmem [shape: f32[6,512], index: 1, kind: input, shape index: {}]   ;;  %s102_s2 = inlined_call_operand.vmem [shape: f32[6,512], index: 2, kind: output, shape index: {}]  }
   0x1   :  { %v3_v0 = vld [vmem:[%s100_s0] sm:$0x3f]  ;;  %v40_v2 = vld [vmem:[%s100_s0 + $0x8] sm:$0x3f]  ;;  %v43_v5 = vld [vmem:[%s100_s0 + $0x10] sm:$0x3f] }
   0x2   :  { %v4_v1 = vld [vmem:[%s101_s1] sm:$0x3f]  ;;  %v41_v4 = vld [vmem:[%s101_s1 + $0x8] sm:$0x3f]  ;;  %v44_v6 = vld [vmem:[%s101_s1 + $0x10] sm:$0x3f] }
   0x3   :  { %v7_v3 = vmul.f32 %v4_v1, %v3_v0  ;;  %v16_v7 = vmul.f32 %v41_v4, %v40_v2  ;;  %v26_v8 = vmul.f32 %v44_v6, %v43_v5  ;;  %v46_v9 = vld [vmem:[%s100_s0 + $0x18] sm:$0x3f] }
   0x4   :  { %v47_v10 = vld [vmem:[%s101_s1 + $0x18] sm:$0x3f] }
   0x5   :  { %9 = vst [vmem:[%s102_s2] sm:$0xff] %v7_v3  ;;  %v36_v11 = vmul.f32 %v47_v10, %v46_v9  ;;  %42 = vst [vmem:[%s102_s2 + $0x8] sm:$0xff] %v16_v7 }
   0x6   :  { %45 = vst [vmem:[%s102_s2 + $0x10] sm:$0xff] %v26_v8 }
   0x7   :  { %48 = vst [vmem:[%s102_s2 + $0x18] sm:$0xff] %v36_v11 }

// kernel: network_forward_pallas.1
= control target key start
LH: loop header
LB: loop body
LE: loop exit
PB: predicated region body
PF: predicated region fallthrough
CT: control target
= control target key end

     0   :  { %vm450_vm0 = vcmask 523264   ;;  %vm10063_vm1 = vmmov 0   ;;  %vm3096_vm2 = vcmask 261120   ;;  %s13351_s1 = inlined_call_operand.vmem [shape: f32[4,64,32], index: 1, kind: input, shape index: {}]   ;;  %s13352_s0 = inlined_call_operand.vmem [shape: bf16[9,9,8,64], index: 0, kind: input, shape index: {}]   ;;  %s13353_s3 = inlined_call_operand.vmem [shape: f32[16,32,64], index: 3, kind: input, shape index: {}]   ;;  %s13354_s2 = inlined_call_operand.vmem [shape: f32[1,32], index: 2, kind: input, shape index: {}]   ;;  %s13355_s5 = inlined_call_operand.vmem [shape: f32[9,64,64], index: 5, kind: input, shape index: {}]   ;;  %s13356_s4 = inlined_call_operand.vmem [shape: f32[1,64], index: 4, kind: input, shape index: {}]   ;;  %s13357_s7 = inlined_call_operand.vmem [shape: f32[1,64,512], index: 7, kind: input, shape index: {}]   ;;  %s13358_s9 = inlined_call_operand.vmem [shape: f32[512,128], index: 9, kind: input, shape index: {}]   ;;  %s13359_s6 = inlined_call_operand.vmem [shape: f32[1,64], index: 6, kind: input, shape index: {}]   ;;  %s13360_s8 = inlined_call_operand.vmem [shape: f32[1,512], index: 8, kind: input, shape index: {}]   ;;  %s13361_s10 = inlined_call_operand.vmem [shape: f32[1,128], index: 10, kind: input, shape index: {}]   ;;  %s13362_s11 = inlined_call_operand.vmem [shape: f32[8,128], index: 11, kind: output, shape index: {}]  }
   0x1   :  { %v7054_v0 = vld [vmem:[%s13351_s1 + $0xb8] sm:$0xff]  ;;  %v7053_v2 = vld [vmem:[%s13351_s1 + $0xb0] sm:$0xff]  ;;  %v7052_v4 = vld [vmem:[%s13351_s1 + $0xa8] sm:$0xff] }
   0x2   :  { %v173_v1 = vld [vmem:[%s13351_s1 + $0x38] sm:$0xff]  ;;  %8872 = vmatprep.subr.mxu0 %v7054_v0  ;;  %v172_v3 = vld [vmem:[%s13351_s1 + $0x30] sm:$0xff]  ;;  %v171_v5 = vld [vmem:[%s13351_s1 + $0x28] sm:$0xff] }
   0x3   :  { %8984 = vmatprep.subr.mxu1 %v173_v1  ;;  %8873 = vmatpush3.msra.mxu0 %v7054_v0  ;;  %v7051_v6 = vld [vmem:[%s13351_s1 + $0xa0] sm:$0xff]  ;;  %v7050_v8 = vld [vmem:[%s13351_s1 + $0x98] sm:$0xff]  ;;  %v7049_v10 = vld [vmem:[%s13351_s1 + $0x90] sm:$0xff] }
   0x4   :  { %8985 = vmatpush3.msra.mxu1 %v173_v1  ;;  %8874 = vmatprep.subr.mxu0 %v7053_v2  ;;  %v170_v7 = vld [vmem:[%s13351_s1 + $0x20] sm:$0xff]  ;;  %v169_v9 = vld [vmem:[%s13351_s1 + $0x18] sm:$0xff]  ;;  %v168_v11 = vld [vmem:[%s13351_s1 + $0x10] sm:$0xff] }
   0x5   :  { %8986 = vmatprep.subr.mxu1 %v172_v3  ;;  %8875 = vmatpush3.msra.mxu0 %v7053_v2  ;;  %v10163_v12 = vld [vmem:[%s13352_s0 + $0x24] ss:$28 sps:$4 sm:$0xff]   ;;  %v7048_v13 = vld [vmem:[%s13351_s1 + $0x88] sm:$0xff]  ;;  %v8170_v24 = vld [vmem:[%s13352_s0 + $0x30] sm:$0xff]  }
   0x6   :  { %8987 = vmatpush3.msra.mxu1 %v172_v3  ;;  %8876 = vmatprep.subr.mxu0 %v7052_v4  ;;  %v167_v14 = vld [vmem:[%s13351_s1 + $0x8] sm:$0xff]  ;;  %v7667_v15 = vld [vmem:[%s13352_s0] sm:$0xff]   ;;  %v377_v19 = vunpack.c.l.bf16 %v10163_v12  ;;  %v7254_v25 = vld [vmem:[%s13351_s1 + $0xf8] sm:$0xff]  ;;  %v10213_v30 = vunpack.c.l.bf16 %v8170_v24  ;;  %v10216_v32 = vunpack.c.h.bf16 %v8170_v24  ;;  %v384_v46 = vunpack.c.h.bf16 %v10163_v12 }
   0x7   :  { %8988 = vmatprep.subr.mxu1 %v171_v5  ;;  %8877 = vmatpush3.msra.mxu0 %v7052_v4  ;;  %v8169_v16 = vld [vmem:[%s13352_s0 + $0x28] sm:$0xff]   ;;  %v7047_v17 = vld [vmem:[%s13351_s1 + $0x80] sm:$0xff]  ;;  %v7668_v20 = vunpack.c.l.bf16 %v7667_v15  ;;  %v7669_v21 = vunpack.c.h.bf16 %v7667_v15  ;;  %v6982_v26 = vld [vmem:[%s13351_s1 + $0x78] sm:$0xff] }
   0x8   :  { %8989 = vmatpush3.msra.mxu1 %v171_v5  ;;  %8878 = vmatprep.subr.mxu0 %v7051_v6  ;;  %v166_v18 = vld [vmem:[%s13351_s1] sm:$0xff]  ;;  %v10184_v22 = vunpack.c.l.bf16 %v8169_v16  ;;  %v10189_v23 = vld [vmem:[%s13352_s0 + $0x8] sm:$0xff]   ;;  %v10204_v27 = vld [vmem:[%s13352_s0 + $0x10] sm:$0xff]   ;;  %v10207_v28 = vunpack.c.h.bf16 %v8169_v16 }
   0x9   :  { %8990 = vmatprep.subr.mxu1 %v170_v7  ;;  %8879 = vmatpush3.msra.mxu0 %v7051_v6  ;;  %v7672_v29 = vunpack.c.l.bf16 %v10189_v23  ;;  %v7673_v31 = vunpack.c.h.bf16 %v10189_v23  ;;  %v7676_v33 = vunpack.c.l.bf16 %v10204_v27  ;;  %v8171_v34 = vld [vmem:[%s13352_s0 + $0x38] sm:$0xff]   ;;  %v7253_v36 = vld [vmem:[%s13351_s1 + $0xf0] sm:$0xff]  ;;  %v7677_v39 = vunpack.c.h.bf16 %v10204_v27  ;;  %v10257_v42 = vld [vmem:[%s13352_s0 + $0x48] sm:$0xff]  }
   0xa   :  { %8991 = vmatpush3.msra.mxu1 %v170_v7  ;;  %8880 = vmatprep.subr.mxu0 %v7050_v8  ;;  %v10225_v35 = vld [vmem:[%s13352_s0 + $0x18] sm:$0xff]   ;;  %v6981_v37 = vld [vmem:[%s13351_s1 + $0x70] sm:$0xff]  ;;  %v10243_v38 = vunpack.c.l.bf16 %v8171_v34  ;;  %v10251_v40 = vunpack.c.h.bf16 %v8171_v34  ;;  %v10262_v43 = vld [vmem:[%s13352_s0 + $0x24] ss:$28 sps:$4 sm:$0xff]   ;;  %v7904_v48 = vunpack.c.l.bf16 %v10257_v42  ;;  %v7905_v53 = vunpack.c.h.bf16 %v10257_v42 }
   0xb   :  { %8992 = vmatprep.subr.mxu1 %v169_v9  ;;  %8881 = vmatpush3.msra.mxu0 %v7050_v8  ;;  %v7680_v41 = vunpack.c.l.bf16 %v10225_v35  ;;  %v7252_v44 = vld [vmem:[%s13351_s1 + $0xe8] sm:$0xff]  ;;  %v13365_v47 = vunpack.c.h.bf16 %v10225_v35  ;;  %v110_v49 = vunpack.c.l.bf16 %v10262_v43  ;;  %v8173_v50 = vld [vmem:[%s13352_s0 + $0x50] sm:$0xff]   ;;  %v7251_v51 = vld [vmem:[%s13351_s1 + $0xe0] sm:$0xff]  ;;  %v117_v5 = vunpack.c.h.bf16 %v10262_v43 }
   0xc   :  { %8993 = vmatpush3.msra.mxu1 %v169_v9  ;;  %8882 = vmatprep.subr.mxu0 %v7049_v10  ;;  %v6980_v45 = vld [vmem:[%s13351_s1 + $0x68] sm:$0xff]  ;;  %v6979_v52 = vld [vmem:[%s13351_s1 + $0x60] sm:$0xff]  ;;  %v10302_v54 = vunpack.c.l.bf16 %v8173_v50  ;;  %v8174_v55 = vld [vmem:[%s13352_s0 + $0x58] sm:$0xff]   ;;  %v10318_v58 = vunpack.c.h.bf16 %v8173_v50  ;;  %v13369_v27 = vunpack.c.h.bf16 %v10225_v35 }
   0xd   :  { %8994 = vmatprep.subr.mxu1 %v168_v11  ;;  %8883 = vmatpush3.msra.mxu0 %v7049_v10  ;;  %v7250_v56 = vld [vmem:[%s13351_s1 + $0xd8] sm:$0xff]  ;;  %v10324_v59 = vunpack.c.l.bf16 %v8174_v55  ;;  %v8175_v60 = vld [vmem:[%s13352_s0 + $0x60] sm:$0xff]   ;;  %v7249_v61 = vld [vmem:[%s13351_s1 + $0xd0] sm:$0xff]  ;;  %v10339_v63 = vunpack.c.h.bf16 %v8174_v55 }
   0xe   :  { %8995 = vmatpush3.msra.mxu1 %v168_v11  ;;  %8884 = vmatprep.subr.mxu0 %v7048_v13  ;;  %v6978_v57 = vld [vmem:[%s13351_s1 + $0x58] sm:$0xff]  ;;  %v6977_v62 = vld [vmem:[%s13351_s1 + $0x50] sm:$0xff]  ;;  %v10345_v0 = vunpack.c.l.bf16 %v8175_v60  ;;  %v6999_v1 = vld [vmem:[%s13352_s0 + $0x6c] ss:$28 sps:$4 sm:$0xff]   ;;  %v10360_v4 = vunpack.c.h.bf16 %v8175_v60 }
   0xf   :  { %8996 = vmatprep.subr.mxu1 %v167_v14  ;;  %8885 = vmatpush3.msra.mxu0 %v7048_v13  ;;  %v7248_v2 = vld [vmem:[%s13351_s1 + $0xc8] sm:$0xff]  ;;  %v393_v6 = vunpack.c.l.bf16 %v6999_v1  ;;  %v8176_v7 = vld [vmem:[%s13352_s0 + $0x70] sm:$0xff]   ;;  %v7247_v8 = vld [vmem:[%s13351_s1 + $0xc0] sm:$0xff] }
  0x10   :  { %8997 = vmatpush3.msra.mxu1 %v167_v14  ;;  %8886 = vmatprep.subr.mxu0 %v7047_v17  ;;  %v6976_v3 = vld [vmem:[%s13351_s1 + $0x48] sm:$0xff]  ;;  %v6975_v9 = vld [vmem:[%s13351_s1 + $0x40] sm:$0xff]  ;;  %v10379_v10 = vunpack.c.l.bf16 %v8176_v7  ;;  %v10385_v11 = vunpack.c.h.bf16 %v8176_v7  ;;  %v8177_v12 = vld [vmem:[%s13352_s0 + $0x78] sm:$0xff]  }
  0x11   :  { %8998 = vmatprep.subr.mxu1 %v166_v18  ;;  %8887 = vmatpush3.msra.mxu0 %v7047_v17  ;;  %v10395_v13 = vunpack.c.l.bf16 %v8177_v12  ;;  %v10401_v14 = vunpack.c.h.bf16 %v8177_v12  ;;  %v8178_v15 = vld [vmem:[%s13352_s0 + $0x80] sm:$0xff]   ;;  %v8182_v43 = vld [vmem:[%s13352_s0 + $0xa8] sm:$0xff]  }
  0x12   :  { %8888 = vmatprep.mubr.msk.f32.mxu0 %vm450_vm0, %v377_v19  ;;  %8999 = vmatpush3.msra.mxu1 %v166_v18  ;;  %v10410_v16 = vunpack.c.l.bf16 %v8178_v15  ;;  %v10416_v17 = vunpack.c.h.bf16 %v8178_v15  ;;  %v8179_v18 = vld [vmem:[%s13352_s0 + $0x90] sm:$0xff]   ;;  %v10424_v19 = vld [vmem:[%s13352_s0 + $0x68] sm:$0xff]  }
  0x13   :  { %9000 = vmatprep.mubr.msk.f32.mxu1 %vm450_vm0, %v7668_v20  ;;  %8889 = vmatmul.mubr.msk.f32.vlgmr.msra.gmra.mxu0 %vm450_vm0, %v10184_v22  ;;  %v400_v20 = vunpack.c.h.bf16 %v6999_v1  ;;  %v126_v24 = vunpack.c.h.bf16 %v10424_v19  ;;  %v8188_v15 = vld [vmem:[%s13352_s0 + $0xe8] sm:$0xff]  }
  0x14   :  { %9001 = vmatmul.mubr.msk.f32.vlgmr.msra.gmra.mxu1 %vm450_vm0, %v7669_v21  ;;  %9096 = vmatprep.subr.mxu0 %v7254_v25  ;;  %v7932_v21 = vunpack.c.l.bf16 %v8179_v18 }
  0x15   :  { %9208 = vmatprep.subr.mxu1 %v6982_v26  ;;  %9097 = vmatpush3.msra.mxu0 %v7254_v25  ;;  %v8180_v25 = vld [vmem:[%s13352_s0 + $0x98] sm:$0xff]  }
  0x16   :  { %9209 = vmatpush3.msra.mxu1 %v6982_v26  ;;  %8891 = vmatprep.mubr.msk.f32.mxu0 %vm450_vm0, %v10207_v28  ;;  %v7933_v26 = vunpack.c.h.bf16 %v8179_v18  ;;  %v10443_v34 = vunpack.c.l.bf16 %v8180_v25 }
  0x17   :  { %9003 = vmatprep.mubr.msk.f32.mxu1 %vm450_vm0, %v7672_v29  ;;  %8892 = vmatmul.mubr.msk.f32.gmra.mxu0 %vm450_vm0, %v10213_v30 }
  0x18   :  { %9004 = vmatmul.mubr.msk.f32.gmra.mxu1 %vm450_vm0, %v7673_v31  ;;  %8894 = vmatprep.mubr.msk.f32.mxu0 %vm450_vm0, %v10216_v32 }
  0x19   :  { %9006 = vmatprep.mubr.msk.f32.mxu1 %vm450_vm0, %v7676_v33  ;;  %9098 = vmatprep.subr.mxu0 %v7253_v36 }
  0x1a   :  { %9210 = vmatprep.subr.mxu1 %v6981_v37  ;;  %9099 = vmatpush3.msra.mxu0 %v7253_v36  ;;  %v8181_v36 = vld [vmem:[%s13352_s0 + $0xa0] sm:$0xff]  }
  0x1b   :  { %9211 = vmatpush3.msra.mxu1 %v6981_v37  ;;  %8895 = vmatmul.mubr.msk.f32.gmra.mxu0 %vm450_vm0, %v10243_v38  ;;  %v10451_v37 = vunpack.c.h.bf16 %v8180_v25  ;;  %v10457_v42 = vunpack.c.l.bf16 %v8181_v36 }
  0x1c   :  { %9007 = vmatmul.mubr.msk.f32.gmra.mxu1 %vm450_vm0, %v7677_v39  ;;  %8897 = vmatprep.mubr.msk.f32.mxu0 %vm450_vm0, %v10251_v40 }
  0x1d   :  { %9009 = vmatprep.mubr.msk.f32.mxu1 %vm450_vm0, %v7680_v41  ;;  %9100 = vmatprep.subr.mxu0 %v7252_v44 }
  0x1e   :  { %9212 = vmatprep.subr.mxu1 %v6980_v45  ;;  %9101 = vmatpush3.msra.mxu0 %v7252_v44  ;;  %v10466_v44 = vunpack.c.h.bf16 %v8181_v36  ;;  %v10596_v36 = vld [vmem:[%s13352_s0 + $0xf8] sm:$0xff]  }
  0x1f   :  { %9213 = vmatpush3.msra.mxu1 %v6980_v45  ;;  %8898 = vmatmul.mubr.msk.f32.gmra.mxu0 %vm450_vm0, %v384_v46  ;;  %v10472_v45 = vunpack.c.l.bf16 %v8182_v43  ;;  %v69_v46 = vld [vmem:[%s13352_s0 + $0x88] ss:$72 sps:$4 sm:$0xff]  }
  0x20   :  { %9010 = vmatmul.mubr.msk.f32.gmra.mxu1 %vm450_vm0, %v13365_v47  ;;  %8900 = vmatprep.mubr.msk.f32.mxu0 %vm450_vm0, %v7904_v48  ;;  %v133_v50 = vunpack.c.l.bf16 %v69_v46 }
  0x21   :  { %9012 = vmatprep.mubr.msk.f32.mxu1 %vm450_vm0, %v110_v49  ;;  %9102 = vmatprep.subr.mxu0 %v7251_v51  ;;  %v10486_v49 = vunpack.c.h.bf16 %v8182_v43 }
  0x22   :  { %9214 = vmatprep.subr.mxu1 %v6979_v52  ;;  %9103 = vmatpush3.msra.mxu0 %v7251_v51 }
  0x23   :  { %9215 = vmatpush3.msra.mxu1 %v6979_v52  ;;  %8901 = vmatmul.mubr.msk.f32.gmra.mxu0 %vm450_vm0, %v7905_v53  ;;  %v8183_v52 = vld [vmem:[%s13352_s0 + $0xb8] sm:$0xff]  }
  0x24   :  { %9013 = vmatmul.mubr.msk.f32.gmra.mxu1 %vm450_vm0, %v10184_v22  ;;  %8903 = vmatprep.mubr.msk.f32.mxu0 %vm450_vm0, %v10302_v54  ;;  %v10503_v55 = vunpack.c.h.bf16 %v8183_v52 }
  0x25   :  { %9015 = vmatprep.mubr.msk.f32.mxu1 %vm450_vm0, %v10207_v28  ;;  %9104 = vmatprep.subr.mxu0 %v7250_v56 }
  0x26   :  { %9216 = vmatprep.subr.mxu1 %v6978_v57  ;;  %9105 = vmatpush3.msra.mxu0 %v7250_v56  ;;  %v8184_v56 = vld [vmem:[%s13352_s0 + $0xc0] sm:$0xff]  }
  0x27   :  { %9217 = vmatpush3.msra.mxu1 %v6978_v57  ;;  %8904 = vmatmul.mubr.msk.f32.gmra.mxu0 %vm450_vm0, %v10318_v58  ;;  %v10511_v57 = vunpack.c.l.bf16 %v8184_v56  ;;  %v10517_v60 = vunpack.c.h.bf16 %v8184_v56 }
  0x28   :  { %9016 = vmatmul.mubr.msk.f32.gmra.mxu1 %vm450_vm0, %v10213_v30  ;;  %8906 = vmatprep.mubr.msk.f32.mxu0 %vm450_vm0, %v10324_v59 }
  0x29   :  { %9018 = vmatprep.mubr.msk.f32.mxu1 %vm450_vm0, %v10216_v32  ;;  %9106 = vmatprep.subr.mxu0 %v7249_v61 }
  0x2a   :  { %9218 = vmatprep.subr.mxu1 %v6977_v62  ;;  %9107 = vmatpush3.msra.mxu0 %v7249_v61  ;;  %v8185_v61 = vld [vmem:[%s13352_s0 + $0xc8] sm:$0xff]  }
  0x2b   :  { %9219 = vmatpush3.msra.mxu1 %v6977_v62  ;;  %8907 = vmatmul.mubr.msk.f32.gmra.mxu0 %vm450_vm0, %v10339_v63  ;;  %v10526_v62 = vunpack.c.l.bf16 %v8185_v61  ;;  %v10532_v1 = vunpack.c.h.bf16 %v8185_v61  ;;  %v8191_v61 = vld [vmem:[%s13352_s0 + $0x108] sm:$0xff]  }
  0x2c   :  { %9019 = vmatmul.mubr.msk.f32.gmra.mxu1 %vm450_vm0, %v10243_v38  ;;  %8909 = vmatprep.mubr.msk.f32.mxu0 %vm450_vm0, %v10345_v0 }
  0x2d   :  { %9021 = vmatprep.mubr.msk.f32.mxu1 %vm450_vm0, %v10251_v40  ;;  %9108 = vmatprep.subr.mxu0 %v7248_v2 }
  0x2e   :  { %9220 = vmatprep.subr.mxu1 %v6976_v3  ;;  %9109 = vmatpush3.msra.mxu0 %v7248_v2  ;;  %v8186_v2 = vld [vmem:[%s13352_s0 + $0xd8] sm:$0xff]  }
  0x2f   :  { %9221 = vmatpush3.msra.mxu1 %v6976_v3  ;;  %8910 = vmatmul.mubr.msk.f32.gmra.mxu0 %vm450_vm0, %v10360_v4  ;;  %v10540_v3 = vld [vmem:[%s13352_s0 + $0xb0] sm:$0xff]  }
  0x30   :  { %9022 = vmatmul.mubr.msk.f32.gmra.mxu1 %vm450_vm0, %v117_v5  ;;  %8912 = vmatprep.mubr.msk.f32.mxu0 %vm450_vm0, %v393_v6  ;;  %v416_v5 = vunpack.c.h.bf16 %v69_v46  ;;  %v7960_v6 = vunpack.c.l.bf16 %v8186_v2  ;;  %v142_v7 = vunpack.c.h.bf16 %v10540_v3 }
  0x31   :  { %9024 = vmatprep.mubr.msk.f32.mxu1 %vm450_vm0, %v7904_v48  ;;  %9110 = vmatprep.subr.mxu0 %v7247_v8  ;;  %v10480_v48 = vld [vmem:[%s13352_s0 + $0xb0] sm:$0xff]  }
  0x32   :  { %9222 = vmatprep.subr.mxu1 %v6975_v9  ;;  %9111 = vmatpush3.msra.mxu0 %v7247_v8  ;;  %v409_v51 = vunpack.c.h.bf16 %v10480_v48  ;;  %v8187_v8 = vld [vmem:[%s13352_s0 + $0xe0] sm:$0xff]  }
  0x33   :  { %9223 = vmatpush3.msra.mxu1 %v6975_v9  ;;  %8913 = vmatmul.mubr.msk.f32.gmra.mxu0 %vm450_vm0, %v10379_v10  ;;  %v7961_v9 = vunpack.c.h.bf16 %v8186_v2  ;;  %v10559_v12 = vunpack.c.l.bf16 %v8187_v8  ;;  %v10567_v18 = vunpack.c.h.bf16 %v8187_v8  ;;  %v10627_v2 = vunpack.c.l.bf16 %v8191_v61 }
  0x34   :  { %9025 = vmatmul.mubr.msk.f32.gmra.mxu1 %vm450_vm0, %v7905_v53  ;;  %8915 = vmatprep.mubr.msk.f32.mxu0 %vm450_vm0, %v10385_v11  ;;  %v10499_v53 = vunpack.c.l.bf16 %v8183_v52 }
  0x35   :  { %9027 = vmatprep.mubr.msk.f32.mxu1 %vm450_vm0, %v10302_v54 }
  0x37   :  { %8916 = vmatmul.mubr.msk.f32.gmra.mxu0 %vm450_vm0, %v10395_v13 }
  0x38   :  { %9028 = vmatmul.mubr.msk.f32.gmra.mxu1 %vm450_vm0, %v10318_v58  ;;  %8918 = vmatprep.mubr.msk.f32.mxu0 %vm450_vm0, %v10401_v14 }
  0x39   :  { %9030 = vmatprep.mubr.msk.f32.mxu1 %vm450_vm0, %v10324_v59 }
  0x3b   :  { %8919 = vmatmul.mubr.msk.f32.gmra.mxu0 %vm450_vm0, %v10410_v16 }
  0x3c   :  { %9031 = vmatmul.mubr.msk.f32.gmra.mxu1 %vm450_vm0, %v10339_v63  ;;  %8921 = vmatprep.mubr.msk.f32.mxu0 %vm450_vm0, %v10416_v17 }
  0x3d   :  { %9033 = vmatprep.mubr.msk.f32.mxu1 %vm450_vm0, %v10345_v0 }
  0x3f   :  { %8922 = vmatmul.mubr.msk.f32.gmra.mxu0 %vm450_vm0, %v400_v20  ;;  %v10573_v20 = vunpack.c.l.bf16 %v8188_v15 }
  0x40   :  { %9034 = vmatmul.mubr.msk.f32.gmra.mxu1 %vm450_vm0, %v10360_v4  ;;  %8924 = vmatprep.mubr.msk.f32.mxu0 %vm450_vm0, %v7932_v21 }
  0x41   :  { %9036 = vmatprep.mubr.msk.f32.mxu1 %vm450_vm0, %v126_v24  ;;  %v10582_v24 = vunpack.c.h.bf16 %v8188_v15  ;;  %v10656_v15 = vld [vmem:[%s13352_s0 + $0xf8] sm:$0xff]  }
  0x43   :  { %8925 = vmatmul.mubr.msk.f32.gmra.mxu0 %vm450_vm0, %v7933_v26 }
  0x44   :  { %9037 = vmatmul.mubr.msk.f32.gmra.mxu1 %vm450_vm0, %v10379_v10  ;;  %8927 = vmatprep.mubr.msk.f32.mxu0 %vm450_vm0, %v10443_v34 }
  0x45   :  { %9039 = vmatprep.mubr.msk.f32.mxu1 %vm450_vm0, %v10385_v11 }
  0x47   :  { %8928 = vmatmul.mubr.msk.f32.gmra.mxu0 %vm450_vm0, %v10451_v37 }
  0x48   :  { %9040 = vmatmul.mubr.msk.f32.gmra.mxu1 %vm450_vm0, %v10395_v13  ;;  %8930 = vmatprep.mubr.msk.f32.mxu0 %vm450_vm0, %v10457_v42 }
  0x49   :  { %9042 = vmatprep.mubr.msk.f32.mxu1 %vm450_vm0, %v10401_v14 }
  0x4b   :  { %8931 = vmatmul.mubr.msk.f32.gmra.mxu0 %vm450_vm0, %v10466_v44 }
  0x4c   :  { %9043 = vmatmul.mubr.msk.f32.gmra.mxu1 %vm450_vm0, %v10410_v16  ;;  %8933 = vmatprep.mubr.msk.f32.mxu0 %vm450_vm0, %v10472_v45 }
  0x4d   :  { %9045 = vmatprep.mubr.msk.f32.mxu1 %vm450_vm0, %v10416_v17 }
  0x4f   :  { %8934 = vmatmul.mubr.msk.f32.gmra.mxu0 %vm450_vm0, %v10486_v49 }
  0x50   :  { %9046 = vmatmul.mubr.msk.f32.gmra.mxu1 %vm450_vm0, %v133_v50  ;;  %8936 = vmatprep.mubr.msk.f32.mxu0 %vm450_vm0, %v409_v51  ;;  %v425_v50 = vunpack.c.h.bf16 %v10596_v36  ;;  %v8190_v51 = vld [vmem:[%s13352_s0 + $0x100] sm:$0xff]  }
  0x51   :  { %9048 = vmatprep.mubr.msk.f32.mxu1 %vm450_vm0, %v7932_v21  ;;  %v8189_v21 = vld [vmem:[%s13352_s0 + $0xf0] sm:$0xff]   ;;  %v10615_v52 = vunpack.c.l.bf16 %v8190_v51  ;;  %v10619_v56 = vunpack.c.h.bf16 %v8190_v51  ;;  %v10670_v51 = vld [vmem:[%s13352_s0 + $0x128] sm:$0xff]  }
  0x52   :  { %v10588_v25 = vunpack.c.l.bf16 %v8189_v21  ;;  %v10602_v43 = vunpack.c.h.bf16 %v8189_v21 }
  0x53   :  { %8937 = vmatmul.mubr.msk.f32.gmra.mxu0 %vm450_vm0, %v10499_v53 }
  0x54   :  { %9049 = vmatmul.mubr.msk.f32.gmra.mxu1 %vm450_vm0, %v7933_v26  ;;  %8939 = vmatprep.mubr.msk.f32.mxu0 %vm450_vm0, %v10503_v55  ;;  %v85_v26 = vld [vmem:[%s13352_s0 + $0xd0] ss:$72 sps:$4 sm:$0xff]  }
  0x55   :  { %9051 = vmatprep.mubr.msk.f32.mxu1 %vm450_vm0, %v10443_v34  ;;  %v149_v46 = vunpack.c.l.bf16 %v85_v26  ;;  %v432_v21 = vunpack.c.h.bf16 %v85_v26 }
  0x57   :  { %8940 = vmatmul.mubr.msk.f32.gmra.mxu0 %vm450_vm0, %v10511_v57 }
  0x58   :  { %9052 = vmatmul.mubr.msk.f32.gmra.mxu1 %vm450_vm0, %v10451_v37  ;;  %8942 = vmatprep.mubr.msk.f32.mxu0 %vm450_vm0, %v10517_v60 }
  0x59   :  { %9054 = vmatprep.mubr.msk.f32.mxu1 %vm450_vm0, %v10457_v42 }
  0x5b   :  { %8943 = vmatmul.mubr.msk.f32.gmra.mxu0 %vm450_vm0, %v10526_v62 }
  0x5c   :  { %9055 = vmatmul.mubr.msk.f32.gmra.mxu1 %vm450_vm0, %v10466_v44  ;;  %8945 = vmatprep.mubr.msk.f32.mxu0 %vm450_vm0, %v10532_v1 }
  0x5d   :  { %9057 = vmatprep.mubr.msk.f32.mxu1 %vm450_vm0, %v10472_v45 }
  0x5f   :  { %8946 = vmatmul.mubr.msk.f32.gmra.mxu0 %vm450_vm0, %v416_v5  ;;  %v10633_v5 = vunpack.c.h.bf16 %v8191_v61  ;;  %v13363_v61 = vunpack.c.l.bf16 %v10670_v51 }
  0x60   :  { %9058 = vmatmul.mubr.msk.f32.gmra.mxu1 %vm450_vm0, %v10486_v49  ;;  %8948 = vmatprep.mubr.msk.f32.mxu0 %vm450_vm0, %v7960_v6 }
  0x61   :  { %9060 = vmatprep.mubr.msk.f32.mxu1 %vm450_vm0, %v142_v7 }
  0x63   :  { %8949 = vmatmul.mubr.msk.f32.gmra.mxu0 %vm450_vm0, %v7961_v9 }
  0x64   :  { %9061 = vmatmul.mubr.msk.f32.gmra.mxu1 %vm450_vm0, %v10499_v53  ;;  %8951 = vmatprep.mubr.msk.f32.mxu0 %vm450_vm0, %v10559_v12 }
  0x65   :  { %9063 = vmatprep.mubr.msk.f32.mxu1 %vm450_vm0, %v10503_v55 }
  0x67   :  { %8952 = vmatmul.mubr.msk.f32.gmra.mxu0 %vm450_vm0, %v10567_v18 }
  0x68   :  { %9064 = vmatmul.mubr.msk.f32.gmra.mxu1 %vm450_vm0, %v10511_v57  ;;  %8954 = vmatprep.mubr.msk.f32.mxu0 %vm450_vm0, %v10573_v20 }
  0x69   :  { %9066 = vmatprep.mubr.msk.f32.mxu1 %vm450_vm0, %v10517_v60 }
  0x6b   :  { %8955 = vmatmul.mubr.msk.f32.gmra.mxu0 %vm450_vm0, %v10582_v24 }
  0x6c   :  { %9067 = vmatmul.mubr.msk.f32.gmra.mxu1 %vm450_vm0, %v10526_v62  ;;  %8957 = vmatprep.mubr.msk.f32.mxu0 %vm450_vm0, %v10588_v25 }
  0x6d   :  { %9069 = vmatprep.mubr.msk.f32.mxu1 %vm450_vm0, %v10532_v1 }
  0x6f   :  { %8958 = vmatmul.mubr.msk.f32.gmra.mxu0 %vm450_vm0, %v10602_v43 }
  0x70   :  { %9070 = vmatmul.mubr.msk.f32.gmra.mxu1 %vm450_vm0, %v149_v46  ;;  %8960 = vmatprep.mubr.msk.f32.mxu0 %vm450_vm0, %v425_v50  ;;  %v158_v50 = vunpack.c.h.bf16 %v10656_v15 }
  0x71   :  { %9072 = vmatprep.mubr.msk.f32.mxu1 %vm450_vm0, %v7960_v6  ;;  %v8192_v6 = vld [vmem:[%s13352_s0 + $0x110] sm:$0xff]  }
  0x72   :  { %v10642_v7 = vunpack.c.l.bf16 %v8192_v6  ;;  %v10648_v8 = vunpack.c.h.bf16 %v8192_v6  ;;  %v10681_v6 = vld [vmem:[%s13352_s0 + $0x130] sm:$0xff]  }
  0x73   :  { %8961 = vmatmul.mubr.msk.f32.gmra.mxu0 %vm450_vm0, %v10615_v52 }
  0x74   :  { %9073 = vmatmul.mubr.msk.f32.gmra.mxu1 %vm450_vm0, %v7961_v9  ;;  %8963 = vmatprep.mubr.msk.f32.mxu0 %vm450_vm0, %v10619_v56  ;;  %v8193_v9 = vld [vmem:[%s13352_s0 + $0x120] sm:$0xff]  }
  0x75   :  { %9075 = vmatprep.mubr.msk.f32.mxu1 %vm450_vm0, %v10559_v12  ;;  %v7988_v46 = vunpack.c.l.bf16 %v8193_v9  ;;  %v7989_v26 = vunpack.c.h.bf16 %v8193_v9  ;;  %v13366_v9 = vunpack.c.l.bf16 %v10681_v6 }
  0x77   :  { %8964 = vmatmul.mubr.msk.f32.gmra.mxu0 %vm450_vm0, %v10627_v2 }
  0x78   :  { %9076 = vmatmul.mubr.msk.f32.gmra.mxu1 %vm450_vm0, %v10567_v18  ;;  %8966 = vmatprep.mubr.msk.f32.mxu0 %vm450_vm0, %v10633_v5 }
  0x79   :  { %9078 = vmatprep.mubr.msk.f32.mxu1 %vm450_vm0, %v10573_v20 }
  0x7b   :  { %8967 = vmatmul.mubr.msk.f32.gmra.mxu0 %vm450_vm0, %v10642_v7 }
  0x7c   :  { %9079 = vmatmul.mubr.msk.f32.gmra.mxu1 %vm450_vm0, %v10582_v24  ;;  %8969 = vmatprep.mubr.msk.f32.mxu0 %vm450_vm0, %v10648_v8 }
  0x7d   :  { %9081 = vmatprep.mubr.msk.f32.mxu1 %vm450_vm0, %v10588_v25 }
  0x7f   :  { %8970 = vmatmul.mubr.msk.f32.gmra.mxu0 %vm450_vm0, %v432_v21  ;;  %v13364_v21 = vunpack.c.h.bf16 %v10670_v51 }
  0x80   :  { %9082 = vmatmul.mubr.msk.f32.gmra.mxu1 %vm450_vm0, %v10602_v43  ;;  %8972 = vmatprep.mubr.msk.f32.mxu0 %vm450_vm0, %v7988_v46  ;;  %v10696_v46 = vld [vmem:[%s13352_s0 + $0x138] sm:$0xff]  }
  0x81   :  { %9084 = vmatprep.mubr.msk.f32.mxu1 %vm450_vm0, %v158_v50  ;;  %v7997_v50 = vunpack.c.h.bf16 %v10681_v6 }
  0x83   :  { %8973 = vmatmul.mubr.msk.f32.gmra.mxu0 %vm450_vm0, %v7989_v26  ;;  %v8000_v26 = vunpack.c.l.bf16 %v10696_v46 }
  0x84   :  { %9085 = vmatmul.mubr.msk.f32.gmra.mxu1 %vm450_vm0, %v10615_v52  ;;  %8975 = vmatprep.mubr.msk.f32.mxu0 %vm450_vm0, %v13363_v61  ;;  %v101_v61 = vld [vmem:[%s13352_s0 + $0x4] ss:$276 sps:$4 sm:$0xff]  }
  0x85   :  { %9087 = vmatprep.mubr.msk.f32.mxu1 %vm450_vm0, %v10619_v56  ;;  %v165_v47 = vunpack.c.h.bf16 %v101_v61 }
  0x87   :  { %8976 = vmatmul.mubr.msk.f32.gmra.mxu0 %vm450_vm0, %v13364_v21  ;;  %v8001_v21 = vunpack.c.h.bf16 %v10696_v46 }
  0x88   :  { %9088 = vmatmul.mubr.msk.f32.gmra.mxu1 %vm450_vm0, %v10627_v2  ;;  %8978 = vmatprep.mubr.msk.f32.mxu0 %vm450_vm0, %v13366_v9  ;;  %v239_v9 = vunpack.c.l.bf16 %v101_v61 }
  0x89   :  { %9090 = vmatprep.mubr.msk.f32.mxu1 %vm450_vm0, %v10633_v5 }
  0x8b   :  { %8979 = vmatmul.mubr.msk.f32.gmra.mxu0 %vm450_vm0, %v7997_v50 }
  0x8c   :  { %9091 = vmatmul.mubr.msk.f32.gmra.mxu1 %vm450_vm0, %v10642_v7  ;;  %8981 = vmatprep.mubr.msk.f32.mxu0 %vm450_vm0, %v8000_v26 }
  0x8d   :  { %9093 = vmatprep.mubr.msk.f32.mxu1 %vm450_vm0, %v10648_v8 }
  0x8f   :  { %8982 = vmatmul.mubr.msk.f32.gmra.mxu0 %vm450_vm0, %v8001_v21 }
  0x90   :  { %9094 = vmatmul.mubr.msk.f32.gmra.mxu1 %vm450_vm0, %v165_v47  ;;  %9112 = vmatprep.mubr.msk.f32.mxu0 %vm450_vm0, %v10184_v22  ;;  %v8200_v47 = vld [vmem:[%s13352_s0 + $0x40] sm:$0xff]  }
  0x91   :  { %9224 = vmatprep.mubr.msk.f32.mxu1 %vm450_vm0, %v239_v9  ;;  %v8016_v23 = vunpack.c.l.bf16 %v8200_v47 }
  0x93   :  { %9113 = vmatmul.mubr.msk.f32.vlgmr.msra.gmra.mxu0 %vm450_vm0, %v10207_v28 }
  0x94   :  { %9225 = vmatmul.mubr.msk.f32.vlgmr.msra.gmra.mxu1 %vm450_vm0, %v7672_v29  ;;  %9115 = vmatprep.mubr.msk.f32.mxu0 %vm450_vm0, %v10213_v30  ;;  %v6918_v29 = vld [vmem:[%s13352_s0 + $0x20] ss:$44 sps:$4 sm:$0xff]  }
  0x95   :  { %9227 = vmatprep.mubr.msk.f32.mxu1 %vm450_vm0, %v7673_v31  ;;  %v8017_v31 = vunpack.c.h.bf16 %v8200_v47 }
  0x97   :  { %9116 = vmatmul.mubr.msk.f32.gmra.mxu0 %vm450_vm0, %v10216_v32 }
  0x98   :  { %9228 = vmatmul.mubr.msk.f32.gmra.mxu1 %vm450_vm0, %v7676_v33  ;;  %9118 = vmatprep.mubr.msk.f32.mxu0 %vm450_vm0, %v10243_v38  ;;  %v246_v33 = vunpack.c.l.bf16 %v6918_v29 }
  0x99   :  { %9230 = vmatprep.mubr.msk.f32.mxu1 %vm450_vm0, %v7677_v39  ;;  %v1678_v39 = vunpack.c.h.bf16 %v6918_v29 }
  0x9b   :  { %9119 = vmatmul.mubr.msk.f32.gmra.mxu0 %vm450_vm0, %v10251_v40 }
  0x9c   :  { %9231 = vmatmul.mubr.msk.f32.gmra.mxu1 %vm450_vm0, %v7680_v41  ;;  %9121 = vmatprep.mubr.msk.f32.mxu0 %vm450_vm0, %v8016_v23 }
  0x9d   :  { %9233 = vmatprep.mubr.msk.f32.mxu1 %vm450_vm0, %v13369_v27 }
  0x9f   :  { %9122 = vmatmul.mubr.msk.f32.gmra.mxu0 %vm450_vm0, %v8017_v31 }
  0xa0   :  { %9234 = vmatmul.mubr.msk.f32.gmra.mxu1 %vm450_vm0, %v246_v33  ;;  %9124 = vmatprep.mubr.msk.f32.mxu0 %vm450_vm0, %v1678_v39  ;;  %v278_v33 = vunpack.c.l.bf16 %v10540_v3 }
  0xa1   :  { %9236 = vmatprep.mubr.msk.f32.mxu1 %vm450_vm0, %v10184_v22  ;;  %v6927_v22 = vld [vmem:[%s13352_s0 + $0x4c] ss:$28 sps:$4 sm:$0xff]  }
  0xa2   :  { %v262_v41 = vunpack.c.h.bf16 %v6927_v22 }
  0xa3   :  { %9125 = vmatmul.mubr.msk.f32.gmra.mxu0 %vm450_vm0, %v10302_v54 }
  0xa4   :  { %9237 = vmatmul.mubr.msk.f32.gmra.mxu1 %vm450_vm0, %v10207_v28  ;;  %9127 = vmatprep.mubr.msk.f32.mxu0 %vm450_vm0, %v10318_v58  ;;  %v1685_v28 = vunpack.c.l.bf16 %v10424_v19 }
  0xa5   :  { %9239 = vmatprep.mubr.msk.f32.mxu1 %vm450_vm0, %v10213_v30  ;;  %v255_v30 = vunpack.c.l.bf16 %v6927_v22 }
  0xa7   :  { %9128 = vmatmul.mubr.msk.f32.gmra.mxu0 %vm450_vm0, %v10324_v59 }
  0xa8   :  { %9240 = vmatmul.mubr.msk.f32.gmra.mxu1 %vm450_vm0, %v10216_v32  ;;  %9130 = vmatprep.mubr.msk.f32.mxu0 %vm450_vm0, %v10339_v63  ;;  %v8207_v32 = vld [vmem:[%s13352_s0 + $0x88] sm:$0xff]  }
  0xa9   :  { %9242 = vmatprep.mubr.msk.f32.mxu1 %vm450_vm0, %v10243_v38  ;;  %v8044_v35 = vunpack.c.l.bf16 %v8207_v32  ;;  %v10825_v38 = vld [vmem:[%s13352_s0 + $0x94] ss:$72 sps:$4 sm:$0xff]  }
  0xab   :  { %9131 = vmatmul.mubr.msk.f32.gmra.mxu0 %vm450_vm0, %v10345_v0 }
  0xac   :  { %9243 = vmatmul.mubr.msk.f32.gmra.mxu1 %vm450_vm0, %v10251_v40  ;;  %9133 = vmatprep.mubr.msk.f32.mxu0 %vm450_vm0, %v10360_v4  ;;  %v8045_v40 = vunpack.c.h.bf16 %v8207_v32 }
  0xad   :  { %9245 = vmatprep.mubr.msk.f32.mxu1 %vm450_vm0, %v8016_v23 }
  0xaf   :  { %9134 = vmatmul.mubr.msk.f32.gmra.mxu0 %vm450_vm0, %v1685_v28 }
  0xb0   :  { %9246 = vmatmul.mubr.msk.f32.gmra.mxu1 %vm450_vm0, %v8017_v31  ;;  %9136 = vmatprep.mubr.msk.f32.mxu0 %vm450_vm0, %v10379_v10 }
  0xb1   :  { %9248 = vmatprep.mubr.msk.f32.mxu1 %vm450_vm0, %v255_v30 }
  0xb3   :  { %9137 = vmatmul.mubr.msk.f32.gmra.mxu0 %vm450_vm0, %v10385_v11 }
  0xb4   :  { %9249 = vmatmul.mubr.msk.f32.gmra.mxu1 %vm450_vm0, %v10302_v54  ;;  %9139 = vmatprep.mubr.msk.f32.mxu0 %vm450_vm0, %v10395_v13  ;;  %v1694_v54 = vunpack.c.l.bf16 %v10825_v38 }
  0xb5   :  { %9251 = vmatprep.mubr.msk.f32.mxu1 %vm450_vm0, %v10318_v58  ;;  %v13367_v58 = vmov 0.0  }
  0xb6   :  { %10051 = vmatprep.subr.mxu1 %v13367_v58  ;;  %9320 = vmatprep.subr.mxu0 %v13367_v58 }
  0xb7   :  { %9140 = vmatmul.mubr.msk.f32.gmra.mxu0 %vm450_vm0, %v10401_v14 }
  0xb8   :  { %9252 = vmatmul.mubr.msk.f32.gmra.mxu1 %vm450_vm0, %v10324_v59  ;;  %9142 = vmatprep.mubr.msk.f32.mxu0 %vm450_vm0, %v10410_v16  ;;  %v7399_v59 = vld [vmem:[%s13353_s3 + $0x98] sm:$0xff] }
  0xb9   :  { %9254 = vmatprep.mubr.msk.f32.mxu1 %vm450_vm0, %v10339_v63  ;;  %10055 = vmatpush3.msra.mxu1 %v7399_v59  ;;  %v10866_v63 = vld [vmem:[%s13352_s0 + $0x94] ss:$72 sps:$4 sm:$0xff]  }
  0xba   :  { %9321 = vmatpush3.msra.mxu0 %v7399_v59  ;;  %10052 = vmatprep.subr.mxu1 %v13367_v58 }
  0xbb   :  { %9143 = vmatmul.mubr.msk.f32.gmra.mxu0 %vm450_vm0, %v10416_v17  ;;  %9322 = vmatprep.subr.mxu0 %v13367_v58 }
  0xbc   :  { %9255 = vmatmul.mubr.msk.f32.gmra.mxu1 %vm450_vm0, %v10345_v0  ;;  %9145 = vmatprep.mubr.msk.f32.mxu0 %vm450_vm0, %v8044_v35  ;;  %v1701_v0 = vunpack.c.l.bf16 %v10480_v48 }
  0xbd   :  { %9257 = vmatprep.mubr.msk.f32.mxu1 %vm450_vm0, %v10360_v4  ;;  %v271_v4 = vunpack.c.l.bf16 %v10866_v63 }
  0xbf   :  { %9146 = vmatmul.mubr.msk.f32.gmra.mxu0 %vm450_vm0, %v8045_v40 }
  0xc0   :  { %9258 = vmatmul.mubr.msk.f32.gmra.mxu1 %vm450_vm0, %v262_v41  ;;  %9148 = vmatprep.mubr.msk.f32.mxu0 %vm450_vm0, %v1694_v54 }
  0xc1   :  { %9260 = vmatprep.mubr.msk.f32.mxu1 %vm450_vm0, %v10379_v10 }
  0xc3   :  { %9149 = vmatmul.mubr.msk.f32.gmra.mxu0 %vm450_vm0, %v10443_v34 }
  0xc4   :  { %9261 = vmatmul.mubr.msk.f32.gmra.mxu1 %vm450_vm0, %v10385_v11  ;;  %9151 = vmatprep.mubr.msk.f32.mxu0 %vm450_vm0, %v10451_v37 }
  0xc5   :  { %9263 = vmatprep.mubr.msk.f32.mxu1 %vm450_vm0, %v10395_v13 }
  0xc7   :  { %9152 = vmatmul.mubr.msk.f32.gmra.mxu0 %vm450_vm0, %v10457_v42 }
  0xc8   :  { %9264 = vmatmul.mubr.msk.f32.gmra.mxu1 %vm450_vm0, %v10401_v14  ;;  %9154 = vmatprep.mubr.msk.f32.mxu0 %vm450_vm0, %v10466_v44 }
  0xc9   :  { %9266 = vmatprep.mubr.msk.f32.mxu1 %vm450_vm0, %v10410_v16 }
  0xcb   :  { %9155 = vmatmul.mubr.msk.f32.gmra.mxu0 %vm450_vm0, %v10472_v45 }
  0xcc   :  { %9267 = vmatmul.mubr.msk.f32.gmra.mxu1 %vm450_vm0, %v10416_v17  ;;  %9157 = vmatprep.mubr.msk.f32.mxu0 %vm450_vm0, %v10486_v49  ;;  %v10895_v17 = vld [vmem:[%s13352_s0 + $0xd0] sm:$0xff]  }
  0xcd   :  { %9269 = vmatprep.mubr.msk.f32.mxu1 %vm450_vm0, %v8044_v35 }
  0xcf   :  { %9158 = vmatmul.mubr.msk.f32.gmra.mxu0 %vm450_vm0, %v1701_v0 }
  0xd0   :  { %9270 = vmatmul.mubr.msk.f32.gmra.mxu1 %vm450_vm0, %v8045_v40  ;;  %9160 = vmatprep.mubr.msk.f32.mxu0 %vm450_vm0, %v10499_v53 }
  0xd1   :  { %9272 = vmatprep.mubr.msk.f32.mxu1 %vm450_vm0, %v271_v4 }
  0xd3   :  { %v8890_v10 = vpop.f32.mrf.mxu0  ;;  %9161 = vmatmul.mubr.msk.f32.gmra.mxu0 %vm450_vm0, %v10503_v55 }
  0xd4   :  { %v9002_v11 = vpop.f32.mrf.mxu1  ;;  %9273 = vmatmul.mubr.msk.f32.gmra.mxu1 %vm450_vm0, %v10443_v34  ;;  %9163 = vmatprep.mubr.msk.f32.mxu0 %vm450_vm0, %v10511_v57 }
  0xd5   :  { %v10886_v13 = vadd.f32 %v9002_v11, %v8890_v10  ;;  %9275 = vmatprep.mubr.msk.f32.mxu1 %vm450_vm0, %v10451_v37  ;;  %v709_v14 = vpop.f32.mrf.mxu0  ;;  %v8072_v37 = vunpack.c.l.bf16 %v10895_v17 }
  0xd6   :  { %v1286_v16 = vpop.f32.mrf.mxu1 }
  0xd7   :  { %v10897_v19 = vadd.f32 %v1286_v16, %v709_v14  ;;  %v8893_v48 = vpop.f32.mrf.mxu0  ;;  %9164 = vmatmul.mubr.msk.f32.gmra.mxu0 %vm450_vm0, %v10517_v60 }
  0xd8   :  { %v9005_v61 = vpop.f32.mrf.mxu1  ;;  %9276 = vmatmul.mubr.msk.f32.gmra.mxu1 %vm450_vm0, %v10457_v42  ;;  %9166 = vmatprep.mubr.msk.f32.mxu0 %vm450_vm0, %v10526_v62  ;;  %v8073_v42 = vunpack.c.h.bf16 %v10895_v17 }
  0xd9   :  { %v10903_v34 = vadd.f32 %v9005_v61, %v8893_v48  ;;  %9278 = vmatprep.mubr.msk.f32.mxu1 %vm450_vm0, %v10466_v44  ;;  %v719_v9 = vpop.f32.mrf.mxu0  ;;  %v1710_v44 = vunpack.c.h.bf16 %v10825_v38 }
  0xda   :  { %v1296_v47 = vpop.f32.mrf.mxu1 }
  0xdb   :  { %v10910_v23 = vadd.f32 %v1296_v47, %v719_v9  ;;  %v8896_v29 = vpop.f32.mrf.mxu0  ;;  %9167 = vmatmul.mubr.msk.f32.gmra.mxu0 %vm450_vm0, %v10532_v1 }
  0xdc   :  { %v9008_v31 = vpop.f32.mrf.mxu1  ;;  %9279 = vmatmul.mubr.msk.f32.gmra.mxu1 %vm450_vm0, %v10472_v45  ;;  %9169 = vmatprep.mubr.msk.f32.mxu0 %vm450_vm0, %v8072_v37 }
  0xdd   :  { %v10918_v27 = vadd.f32 %v9008_v31, %v8896_v29  ;;  %9281 = vmatprep.mubr.msk.f32.mxu1 %vm450_vm0, %v10486_v49  ;;  %v729_v39 = vpop.f32.mrf.mxu0 }
  0xde   :  { %v1306_v22 = vpop.f32.mrf.mxu1 }
  0xdf   :  { %v10924_v28 = vadd.f32 %v1306_v22, %v729_v39  ;;  %v8899_v30 = vpop.f32.mrf.mxu0  ;;  %9170 = vmatmul.mubr.msk.f32.gmra.mxu0 %vm450_vm0, %v8073_v42 }
  0xe0   :  { %v9011_v32 = vpop.f32.mrf.mxu1  ;;  %9282 = vmatmul.mubr.msk.f32.gmra.mxu1 %vm450_vm0, %v278_v33  ;;  %9172 = vmatprep.mubr.msk.f32.mxu0 %vm450_vm0, %v1710_v44  ;;  %v7397_v33 = vld [vmem:[%s13353_s3 + $0x88] sm:$0xff] }
  0xe1   :  { %v10928_v45 = vadd.f32 %v9011_v32, %v8899_v30  ;;  %9284 = vmatprep.mubr.msk.f32.mxu1 %vm450_vm0, %v10499_v53  ;;  %v739_v49 = vpop.f32.mrf.mxu0  ;;  %v7398_v53 = vld [vmem:[%s13353_s3 + $0x90] sm:$0xff]  ;;  %v11006_v32 = vld [vmem:[%s13352_s0 + $0x118] sm:$0xff]  }
  0xe2   :  { %v1316_v3 = vpop.f32.mrf.mxu1  ;;  %10056 = vmatpush3.msra.mxu1 %v7398_v53  ;;  %9323 = vmatpush3.msra.mxu0 %v7398_v53 }
  0xe3   :  { %v10933_v35 = vadd.f32 %v1316_v3, %v739_v49  ;;  %v8902_v38 = vpop.f32.mrf.mxu0  ;;  %9173 = vmatmul.mubr.msk.f32.gmra.mxu0 %vm450_vm0, %v10559_v12  ;;  %9324 = vmatprep.subr.mxu0 %v13367_v58 }
  0xe4   :  { %v9014_v40 = vpop.f32.mrf.mxu1  ;;  %9285 = vmatmul.mubr.msk.f32.gmra.mxu1 %vm450_vm0, %v10503_v55  ;;  %9175 = vmatprep.mubr.msk.f32.mxu0 %vm450_vm0, %v10567_v18 }
  0xe5   :  { %v10939_v41 = vadd.f32 %v9014_v40, %v8902_v38  ;;  %9287 = vmatprep.mubr.msk.f32.mxu1 %vm450_vm0, %v10511_v57  ;;  %v749_v54 = vpop.f32.mrf.mxu0  ;;  %10053 = vmatprep.subr.mxu1 %v13367_v58  ;;  %v8100_v38 = vunpack.c.l.bf16 %v11006_v32 }
  0xe6   :  { %v1326_v59 = vpop.f32.mrf.mxu1  ;;  %9325 = vmatpush3.msra.mxu0 %v7397_v33  ;;  %10057 = vmatpush3.msra.mxu1 %v7397_v33 }
  0xe7   :  { %v10948_v0 = vadd.f32 %v1326_v59, %v749_v54  ;;  %v8905_v55 = vpop.f32.mrf.mxu0  ;;  %9176 = vmatmul.mubr.msk.f32.gmra.mxu0 %vm450_vm0, %v10573_v20  ;;  %9326 = vmatprep.subr.mxu0 %v13367_v58  ;;  %v7239_v54 = vld [vmem:[%s13352_s0 + $0x124] ss:$28 sps:$4 sm:$0xff]  }
  0xe8   :  { %v9017_v4 = vpop.f32.mrf.mxu1  ;;  %9288 = vmatmul.mubr.msk.f32.gmra.mxu1 %vm450_vm0, %v10517_v60  ;;  %9178 = vmatprep.mubr.msk.f32.mxu0 %vm450_vm0, %v10582_v24  ;;  %v1717_v60 = vunpack.c.l.bf16 %v10596_v36 }
  0xe9   :  { %v10956_v57 = vadd.f32 %v9017_v4, %v8905_v55  ;;  %9290 = vmatprep.mubr.msk.f32.mxu1 %vm450_vm0, %v10526_v62  ;;  %v759_v10 = vpop.f32.mrf.mxu0  ;;  %v287_v62 = vunpack.c.h.bf16 %v10866_v63  ;;  %10054 = vmatprep.subr.mxu1 %v13367_v58  ;;  %v294_v55 = vunpack.c.l.bf16 %v10656_v15 }
  0xea   :  { %v1336_v11 = vpop.f32.mrf.mxu1 }
  0xeb   :  { %v10962_v14 = vadd.f32 %v1336_v11, %v759_v10  ;;  %v8908_v16 = vpop.f32.mrf.mxu0  ;;  %9179 = vmatmul.mubr.msk.f32.gmra.mxu0 %vm450_vm0, %v10588_v25  ;;  %v1726_v10 = vunpack.c.l.bf16 %v7239_v54 }
  0xec   :  { %v9020_v17 = vpop.f32.mrf.mxu1  ;;  %9291 = vmatmul.mubr.msk.f32.gmra.mxu1 %vm450_vm0, %v10532_v1  ;;  %9181 = vmatprep.mubr.msk.f32.mxu0 %vm450_vm0, %v10602_v43 }
  0xed   :  { %v10969_v48 = vadd.f32 %v9020_v17, %v8908_v16  ;;  %9293 = vmatprep.mubr.msk.f32.mxu1 %vm450_vm0, %v8072_v37  ;;  %v769_v61 = vpop.f32.mrf.mxu0 }
  0xee   :  { %v1346_v9 = vpop.f32.mrf.mxu1 }
  0xef   :  { %v10975_v47 = vadd.f32 %v1346_v9, %v769_v61  ;;  %v8911_v29 = vpop.f32.mrf.mxu0  ;;  %9182 = vmatmul.mubr.msk.f32.gmra.mxu0 %vm450_vm0, %v1717_v60  ;;  %v13370_v9 = vunpack.c.l.bf16 %v10670_v51 }
  0xf0   :  { %v9023_v31 = vpop.f32.mrf.mxu1  ;;  %9294 = vmatmul.mubr.msk.f32.gmra.mxu1 %vm450_vm0, %v8073_v42  ;;  %9184 = vmatprep.mubr.msk.f32.mxu0 %vm450_vm0, %v10615_v52 }
  0xf1   :  { %v10979_v1 = vadd.f32 %v9023_v31, %v8911_v29  ;;  %9296 = vmatprep.mubr.msk.f32.mxu1 %vm450_vm0, %v287_v62  ;;  %v779_v36 = vpop.f32.mrf.mxu0  ;;  %v13371_v31 = vunpack.c.h.bf16 %v10670_v51 }
  0xf2   :  { %v1356_v37 = vpop.f32.mrf.mxu1 }
  0xf3   :  { %v10984_v63 = vadd.f32 %v1356_v37, %v779_v36  ;;  %v8914_v44 = vpop.f32.mrf.mxu0  ;;  %9185 = vmatmul.mubr.msk.f32.gmra.mxu0 %vm450_vm0, %v10619_v56 }
  0xf4   :  { %v9026_v39 = vpop.f32.mrf.mxu1  ;;  %9297 = vmatmul.mubr.msk.f32.gmra.mxu1 %vm450_vm0, %v10559_v12  ;;  %9187 = vmatprep.mubr.msk.f32.mxu0 %vm450_vm0, %v10627_v2  ;;  %v7396_v12 = vld [vmem:[%s13353_s3 + $0x80] sm:$0xff] }
  0xf5   :  { %v10993_v42 = vadd.f32 %v9026_v39, %v8914_v44  ;;  %9299 = vmatprep.mubr.msk.f32.mxu1 %vm450_vm0, %v10567_v18  ;;  %v10999_v22 = vpop.f32.mrf.mxu0  ;;  %9327 = vmatpush3.msra.mxu0 %v7396_v12  ;;  %v13372_v44 = vunpack.c.l.bf16 %v10681_v6 }
  0xf6   :  { %v11001_v30 = vpop.f32.mrf.mxu1  ;;  %10058 = vmatpush3.msra.mxu1 %v7396_v12  ;;  %9390 = vmatprep.subr.mxu0 %v13367_v58 }
  0xf7   :  { %v8917_v18 = vpop.f32.mrf.mxu0  ;;  %9188 = vmatmul.mubr.msk.f32.gmra.mxu0 %vm450_vm0, %v10633_v5  ;;  %9355 = vmatprep.subr.mxu1 %v13367_v58 }
  0xf8   :  { %v9029_v49 = vpop.f32.mrf.mxu1  ;;  %9300 = vmatmul.mubr.msk.f32.gmra.mxu1 %vm450_vm0, %v10573_v20  ;;  %9190 = vmatprep.mubr.msk.f32.mxu0 %vm450_vm0, %v10642_v7 }
  0xf9   :  { %v11017_v3 = vadd.f32 %v9029_v49, %v8917_v18  ;;  %9302 = vmatprep.mubr.msk.f32.mxu1 %vm450_vm0, %v10582_v24  ;;  %v11024_v40 = vpop.f32.mrf.mxu0  ;;  %v8101_v24 = vunpack.c.h.bf16 %v11006_v32 }
  0xfa   :  { %v11026_v53 = vpop.f32.mrf.mxu1 }
  0xfb   :  { %v8920_v20 = vpop.f32.mrf.mxu0  ;;  %9191 = vmatmul.mubr.msk.f32.gmra.mxu0 %vm450_vm0, %v10648_v8 }
  0xfc   :  { %v9032_v59 = vpop.f32.mrf.mxu1  ;;  %9303 = vmatmul.mubr.msk.f32.gmra.mxu1 %vm450_vm0, %v10588_v25  ;;  %9193 = vmatprep.mubr.msk.f32.mxu0 %vm450_vm0, %v8100_v38 }
  0xfd   :  { %v11039_v4 = vadd.f32 %v9032_v59, %v8920_v20  ;;  %9305 = vmatprep.mubr.msk.f32.mxu1 %vm450_vm0, %v10602_v43  ;;  %v11044_v11 = vpop.f32.mrf.mxu0 }
  0xfe   :  { %v11046_v16 = vpop.f32.mrf.mxu1 }
  0xff   :  { %v8923_v17 = vpop.f32.mrf.mxu0  ;;  %9194 = vmatmul.mubr.msk.f32.gmra.mxu0 %vm450_vm0, %v8101_v24 }
 0x100   :  { %v9035_v60 = vpop.f32.mrf.mxu1  ;;  %9306 = vmatmul.mubr.msk.f32.gmra.mxu1 %vm450_vm0, %v294_v55  ;;  %9196 = vmatprep.mubr.msk.f32.mxu0 %vm450_vm0, %v1726_v10 }
 0x101   :  { %v11050_v25 = vadd.f32 %v9035_v60, %v8923_v17  ;;  %9308 = vmatprep.mubr.msk.f32.mxu1 %vm450_vm0, %v10615_v52  ;;  %v11055_v15 = vpop.f32.mrf.mxu0 }
 0x102   :  { %v11057_v43 = vpop.f32.mrf.mxu1 }
 0x103   :  { %v8926_v62 = vpop.f32.mrf.mxu0  ;;  %9197 = vmatmul.mubr.msk.f32.gmra.mxu0 %vm450_vm0, %v13370_v9 }
 0x104   :  { %v9038_v61 = vpop.f32.mrf.mxu1  ;;  %9309 = vmatmul.mubr.msk.f32.gmra.mxu1 %vm450_vm0, %v10619_v56  ;;  %9199 = vmatprep.mubr.msk.f32.mxu0 %vm450_vm0, %v13371_v31 }
 0x105   :  { %v11064_v29 = vadd.f32 %v9038_v61, %v8926_v62  ;;  %9311 = vmatprep.mubr.msk.f32.mxu1 %vm450_vm0, %v10627_v2  ;;  %v11071_v52 = vpop.f32.mrf.mxu0 }
 0x106   :  { %v11073_v36 = vpop.f32.mrf.mxu1 }
 0x107   :  { %v8929_v37 = vpop.f32.mrf.mxu0  ;;  %9200 = vmatmul.mubr.msk.f32.gmra.mxu0 %vm450_vm0, %v13372_v44 }
 0x108   :  { %v9041_v33 = vpop.f32.mrf.mxu1  ;;  %9312 = vmatmul.mubr.msk.f32.gmra.mxu1 %vm450_vm0, %v10633_v5  ;;  %9202 = vmatprep.mubr.msk.f32.mxu0 %vm450_vm0, %v7997_v50  ;;  %v1733_v5 = vunpack.c.h.bf16 %v7239_v54 }
 0x109   :  { %v11080_v56 = vadd.f32 %v9041_v33, %v8929_v37  ;;  %9314 = vmatprep.mubr.msk.f32.mxu1 %vm450_vm0, %v10642_v7  ;;  %v11087_v2 = vpop.f32.mrf.mxu0 }
 0x10a   :  { %v11089_v51 = vpop.f32.mrf.mxu1 }
 0x10b   :  { %v8932_v39 = vpop.f32.mrf.mxu0  ;;  %9203 = vmatmul.mubr.msk.f32.gmra.mxu0 %vm450_vm0, %v8000_v26 }
 0x10c   :  { %v9044_v32 = vpop.f32.mrf.mxu1  ;;  %9315 = vmatmul.mubr.msk.f32.gmra.mxu1 %vm450_vm0, %v10648_v8  ;;  %9205 = vmatprep.mubr.msk.f32.mxu0 %vm450_vm0, %v8001_v21 }
 0x10d   :  { %v11096_v6 = vadd.f32 %v9044_v32, %v8932_v39  ;;  %9317 = vmatprep.mubr.msk.f32.mxu1 %vm450_vm0, %v8100_v38  ;;  %v11102_v7 = vpop.f32.mrf.mxu0 }
 0x10e   :  { %v11104_v50 = vpop.f32.mrf.mxu1 }
 0x10f   :  { %v8935_v12 = vpop.f32.mrf.mxu0  ;;  %9206 = vmatmul.mubr.msk.f32.gmra.mxu0 %vm450_vm0, %v1733_v5 }
 0x110   :  { %v9047_v18 = vpop.f32.mrf.mxu1  ;;  %9318 = vmatmul.mubr.msk.f32.gmra.mxu1 %vm450_vm0, %v8101_v24  ;;  %9328 = vmatprep.mubr.msk.f32.mxu0 %vm10063_vm1, %v13367_v58 }
 0x111   :  { %v11108_v8 = vadd.f32 %v9047_v18, %v8935_v12  ;;  %9349 = vmatprep.mubr.msk.f32.mxu1 %vm10063_vm1, %v13367_v58  ;;  %v11114_v21 = vpop.f32.mrf.mxu0 }
 0x112   :  { %v11116_v46 = vpop.f32.mrf.mxu1 }
 0x113   :  { %v8938_v26 = vpop.f32.mrf.mxu0 }
 0x114   :  { %v9050_v49 = vpop.f32.mrf.mxu1 }
 0x115   :  { %v11118_v38 = vadd.f32 %v9050_v49, %v8938_v26  ;;  %v11120_v54 = vpop.f32.mrf.mxu0 }
 0x116   :  { %v11122_v20 = vpop.f32.mrf.mxu1 }
 0x117   :  { %v8941_v59 = vpop.f32.mrf.mxu0 }
 0x118   :  { %v9053_v24 = vpop.f32.mrf.mxu1 }
 0x119   :  { %v11124_v55 = vadd.f32 %v9053_v24, %v8941_v59  ;;  %v11126_v10 = vpop.f32.mrf.mxu0 }
 0x11a   :  { %v11128_v17 = vpop.f32.mrf.mxu1 }
 0x11b   :  { %13373 = vst [vmem:[#allocation4_spill] sm:$0xff] %v11124_v55  ;;  %v8944_v60 = vpop.f32.mrf.mxu0 }
 0x11c   :  { %v9056_v62 = vpop.f32.mrf.mxu1 }
 0x11d   :  { %v11130_v61 = vadd.f32 %v9056_v62, %v8944_v60  ;;  %v11132_v9 = vpop.f32.mrf.mxu0 }
 0x11e   :  { %13375 = vst [vmem:[#allocation6_spill] sm:$0xff] %v11132_v9  ;;  %v11134_v31 = vpop.f32.mrf.mxu1 }
 0x11f   :  { %13374 = vst [vmem:[#allocation5_spill] sm:$0xff] %v11130_v61  ;;  %13376 = vst [vmem:[#allocation7_spill] sm:$0xff] %v11134_v31  ;;  %v8947_v37 = vpop.f32.mrf.mxu0 }
 0x120   :  { %v9059_v33 = vpop.f32.mrf.mxu1 }
 0x121   :  { %v11136_v44 = vadd.f32 %v9059_v33, %v8947_v37  ;;  %v11138_v39 = vpop.f32.mrf.mxu0 }
 0x122   :  { %13378 = vst [vmem:[#allocation9_spill] sm:$0xff] %v11138_v39  ;;  %v11140_v32 = vpop.f32.mrf.mxu1 }
 0x123   :  { %13377 = vst [vmem:[#allocation8_spill] sm:$0xff] %v11136_v44  ;;  %13379 = vst [vmem:[#allocation10_spill] sm:$0xff] %v11140_v32  ;;  %v8950_v5 = vpop.f32.mrf.mxu0 }
 0x124   :  { %v9062_v12 = vpop.f32.mrf.mxu1 }
 0x125   :  { %v11142_v18 = vadd.f32 %v9062_v12, %v8950_v5  ;;  %v11144_v26 = vpop.f32.mrf.mxu0 }
 0x126   :  { %13381 = vst [vmem:[#allocation12_spill] sm:$0xff] %v11144_v26  ;;  %v11146_v49 = vpop.f32.mrf.mxu1 }
 0x127   :  { %13380 = vst [vmem:[#allocation11_spill] sm:$0xff] %v11142_v18  ;;  %13382 = vst [vmem:[#allocation13_spill] sm:$0xff] %v11146_v49  ;;  %v8953_v59 = vpop.f32.mrf.mxu0 }
 0x128   :  { %v9065_v24 = vpop.f32.mrf.mxu1 }
 0x129   :  { %v11148_v60 = vadd.f32 %v9065_v24, %v8953_v59  ;;  %v11150_v62 = vpop.f32.mrf.mxu0 }
 0x12a   :  { %13384 = vst [vmem:[#allocation15_spill] sm:$0xff] %v11150_v62  ;;  %v11152_v37 = vpop.f32.mrf.mxu1 }
 0x12b   :  { %13383 = vst [vmem:[#allocation14_spill] sm:$0xff] %v11148_v60  ;;  %13385 = vst [vmem:[#allocation16_spill] sm:$0xff] %v11152_v37  ;;  %v8956_v33 = vpop.f32.mrf.mxu0 }
 0x12c   :  { %v9068_v58 = vpop.f32.mrf.mxu1 }
 0x12d   :  { %v11154_v44 = vadd.f32 %v9068_v58, %v8956_v33  ;;  %v11156_v32 = vpop.f32.mrf.mxu0 }
 0x12e   :  { %13387 = vst [vmem:[#allocation18_spill] sm:$0xff] %v11156_v32  ;;  %v11158_v5 = vpop.f32.mrf.mxu1 }
 0x12f   :  { %13386 = vst [vmem:[#allocation17_spill] sm:$0xff] %v11154_v44  ;;  %13388 = vst [vmem:[#allocation19_spill] sm:$0xff] %v11158_v5  ;;  %v8959_v12 = vpop.f32.mrf.mxu0 }
 0x130   :  { %v9071_v18 = vpop.f32.mrf.mxu1 }
 0x131   :  { %v11160_v26 = vadd.f32 %v9071_v18, %v8959_v12  ;;  %v11162_v49 = vpop.f32.mrf.mxu0 }
 0x132   :  { %13390 = vst [vmem:[#allocation21_spill] sm:$0xff] %v11162_v49  ;;  %v11164_v59 = vpop.f32.mrf.mxu1 }
 0x133   :  { %13389 = vst [vmem:[#allocation20_spill] sm:$0xff] %v11160_v26  ;;  %13391 = vst [vmem:[#allocation22_spill] sm:$0xff] %v11164_v59  ;;  %v8962_v24 = vpop.f32.mrf.mxu0 }
 0x134   :  { %v9074_v60 = vpop.f32.mrf.mxu1 }
 0x135   :  { %v11166_v62 = vadd.f32 %v9074_v60, %v8962_v24  ;;  %v11168_v37 = vpop.f32.mrf.mxu0 }
 0x136   :  { %13393 = vst [vmem:[#allocation24_spill] sm:$0xff] %v11168_v37  ;;  %v11170_v58 = vpop.f32.mrf.mxu1 }
 0x137   :  { %13392 = vst [vmem:[#allocation23_spill] sm:$0xff] %v11166_v62  ;;  %13394 = vst [vmem:[#allocation25_spill] sm:$0xff] %v11170_v58  ;;  %v8965_v33 = vpop.f32.mrf.mxu0 }
 0x138   :  { %v9077_v44 = vpop.f32.mrf.mxu1 }
 0x139   :  { %v11172_v32 = vadd.f32 %v9077_v44, %v8965_v33  ;;  %v11174_v5 = vpop.f32.mrf.mxu0 }
 0x13a   :  { %13396 = vst [vmem:[#allocation27_spill] sm:$0xff] %v11174_v5  ;;  %v11176_v18 = vpop.f32.mrf.mxu1 }
 0x13b   :  { %13395 = vst [vmem:[#allocation26_spill] sm:$0xff] %v11172_v32  ;;  %13397 = vst [vmem:[#allocation28_spill] sm:$0xff] %v11176_v18  ;;  %v8968_v12 = vpop.f32.mrf.mxu0 }
 0x13c   :  { %v9080_v26 = vpop.f32.mrf.mxu1 }
 0x13d   :  { %v11178_v49 = vadd.f32 %v9080_v26, %v8968_v12  ;;  %v11180_v59 = vpop.f32.mrf.mxu0 }
 0x13e   :  { %13399 = vst [vmem:[#allocation30_spill] sm:$0xff] %v11180_v59  ;;  %v11182_v60 = vpop.f32.mrf.mxu1 }
 0x13f   :  { %13398 = vst [vmem:[#allocation29_spill] sm:$0xff] %v11178_v49  ;;  %13400 = vst [vmem:[#allocation31_spill] sm:$0xff] %v11182_v60  ;;  %v8971_v24 = vpop.f32.mrf.mxu0 }
 0x140   :  { %v9083_v62 = vpop.f32.mrf.mxu1 }
 0x141   :  { %v11184_v37 = vadd.f32 %v9083_v62, %v8971_v24  ;;  %v11186_v58 = vpop.f32.mrf.mxu0 }
 0x142   :  { %13402 = vst [vmem:[#allocation33_spill] sm:$0xff] %v11186_v58  ;;  %v11188_v44 = vpop.f32.mrf.mxu1 }
 0x143   :  { %13401 = vst [vmem:[#allocation32_spill] sm:$0xff] %v11184_v37  ;;  %13403 = vst [vmem:[#allocation34_spill] sm:$0xff] %v11188_v44  ;;  %v8974_v33 = vpop.f32.mrf.mxu0 }
 0x144   :  { %v9086_v32 = vpop.f32.mrf.mxu1 }
 0x145   :  { %v11190_v5 = vadd.f32 %v9086_v32, %v8974_v33  ;;  %v11192_v18 = vpop.f32.mrf.mxu0 }
 0x146   :  { %13405 = vst [vmem:[#allocation36_spill] sm:$0xff] %v11192_v18  ;;  %v11194_v26 = vpop.f32.mrf.mxu1 }
 0x147   :  { %13404 = vst [vmem:[#allocation35_spill] sm:$0xff] %v11190_v5  ;;  %13406 = vst [vmem:[#allocation37_spill] sm:$0xff] %v11194_v26  ;;  %v8977_v12 = vpop.f32.mrf.mxu0 }
 0x148   :  { %v9089_v49 = vpop.f32.mrf.mxu1 }
 0x149   :  { %v11196_v59 = vadd.f32 %v9089_v49, %v8977_v12  ;;  %v11198_v60 = vpop.f32.mrf.mxu0 }
 0x14a   :  { %13408 = vst [vmem:[#allocation39_spill] sm:$0xff] %v11198_v60  ;;  %v11200_v62 = vpop.f32.mrf.mxu1 }
 0x14b   :  { %13407 = vst [vmem:[#allocation38_spill] sm:$0xff] %v11196_v59  ;;  %13409 = vst [vmem:[#allocation40_spill] sm:$0xff] %v11200_v62  ;;  %v8980_v24 = vpop.f32.mrf.mxu0 }
 0x14c   :  { %v9092_v37 = vpop.f32.mrf.mxu1 }
 0x14d   :  { %v11202_v58 = vadd.f32 %v9092_v37, %v8980_v24  ;;  %v11204_v44 = vpop.f32.mrf.mxu0  ;;  %v11217_v37 = vld [vmem:[%s13354_s2] ss:$0 sm:$0xff] }
 0x14e   :  { %13411 = vst [vmem:[#allocation42_spill] sm:$0xff] %v11204_v44  ;;  %v11206_v32 = vpop.f32.mrf.mxu1 }
 0x14f   :  { %13410 = vst [vmem:[#allocation41_spill] sm:$0xff] %v11202_v58  ;;  %13412 = vst [vmem:[#allocation43_spill] sm:$0xff] %v11206_v32  ;;  %v8983_v33 = vpop.f32.mrf.mxu0 }
 0x150   :  { %v9095_v5 = vpop.f32.mrf.mxu1 }
 0x151   :  { %v11208_v18 = vadd.f32 %v9095_v5, %v8983_v33  ;;  %v11210_v26 = vpop.f32.mrf.mxu0 }
 0x152   :  { %13414 = vst [vmem:[#allocation45_spill] sm:$0xff] %v11210_v26  ;;  %v11212_v49 = vpop.f32.mrf.mxu1 }
 0x153   :  { %13413 = vst [vmem:[#allocation44_spill] sm:$0xff] %v11208_v18  ;;  %13415 = vst [vmem:[#allocation46_spill] sm:$0xff] %v11212_v49  ;;  %v9114_v12 = vpop.f32.mrf.mxu0 }
 0x154   :  { %v9226_v59 = vpop.f32.mrf.mxu1 }
 0x155   :  { %v2584_v60 = vadd.f32 %v9226_v59, %v9114_v12  ;;  %v2001_v24 = vpop.f32.mrf.mxu0 }
 0x156   :  { %v2578_v58 = vpop.f32.mrf.mxu1 }
 0x157   :  { %v2898_v32 = vadd.f32 %v2584_v60, %v10886_v13  ;;  %v2579_v44 = vadd.f32 %v2578_v58, %v2001_v24  ;;  %v9117_v62 = vpop.f32.mrf.mxu0 }
 0x158   :  { %v9229_v5 = vpop.f32.mrf.mxu1 }
 0x159   :  { %v2969_v33 = vadd.f32 %v11217_v37, %v2898_v32  ;;  %v2897_v18 = vadd.f32 %v2579_v44, %v10897_v19  ;;  %v2594_v49 = vadd.f32 %v9229_v5, %v9117_v62  ;;  %v2011_v26 = vpop.f32.mrf.mxu0 }
 0x15a   :  { %v2588_v59 = vpop.f32.mrf.mxu1 }
 0x15b   :  { %v3033_v12 = vmax.f32 %v2969_v33, 0.0  ;;  %v2968_v39 = vadd.f32 %v11217_v37, %v2897_v18  ;;  %v2900_v61 = vadd.f32 %v2594_v49, %v10903_v34  ;;  %v2589_v31 = vadd.f32 %v2588_v59, %v2011_v26  ;;  %v9120_v9 = vpop.f32.mrf.mxu0 }
 0x15c   :  { %v9232_v55 = vpop.f32.mrf.mxu1 }
 0x15d   :  { %3098 = vst.msk [vmem:[#allocation2 + $0x8] sm:$0xff] %vm3096_vm2, %v3033_v12  ;;  %v3032_v13 = vmax.f32 %v2968_v39, 0.0  ;;  %v2971_v58 = vadd.f32 %v11217_v37, %v2900_v61  ;;  %v2899_v60 = vadd.f32 %v2589_v31, %v10910_v23  ;;  %v2604_v19 = vadd.f32 %v9232_v55, %v9120_v9  ;;  %v2021_v44 = vpop.f32.mrf.mxu0 }
 0x15e   :  { %v2598_v62 = vpop.f32.mrf.mxu1 }
 0x15f   :  { %3097 = vst.msk [vmem:[#allocation2] sm:$0xff] %vm3096_vm2, %v3032_v13  ;;  %v3035_v32 = vmax.f32 %v2971_v58, 0.0  ;;  %v2970_v18 = vadd.f32 %v11217_v37, %v2899_v60  ;;  %v2902_v34 = vadd.f32 %v2604_v19, %v10918_v27  ;;  %v2599_v26 = vadd.f32 %v2598_v62, %v2021_v44  ;;  %v9123_v49 = vpop.f32.mrf.mxu0 }
 0x160   :  { %v9235_v24 = vpop.f32.mrf.mxu1 }
 0x161   :  { %3100 = vst.msk [vmem:[#allocation2 + $0x18] sm:$0xff] %vm3096_vm2, %v3035_v32  ;;  %v3034_v39 = vmax.f32 %v2970_v18, 0.0  ;;  %v2973_v61 = vadd.f32 %v11217_v37, %v2902_v34  ;;  %v2901_v23 = vadd.f32 %v2599_v26, %v10924_v28  ;;  %v2614_v55 = vadd.f32 %v9235_v24, %v9123_v49  ;;  %v2031_v9 = vpop.f32.mrf.mxu0 }
 0x162   :  { %v2608_v31 = vpop.f32.mrf.mxu1 }
 0x163   :  { %3099 = vst.msk [vmem:[#allocation2 + $0x10] sm:$0xff] %vm3096_vm2, %v3034_v39  ;;  %v3037_v5 = vmax.f32 %v2973_v61, 0.0  ;;  %v2972_v33 = vadd.f32 %v11217_v37, %v2901_v23  ;;  %v2904_v27 = vadd.f32 %v2614_v55, %v10928_v45  ;;  %v2609_v59 = vadd.f32 %v2608_v31, %v2031_v9  ;;  %v9126_v12 = vpop.f32.mrf.mxu0 }
 0x164   :  { %v9238_v13 = vpop.f32.mrf.mxu1 }
 0x165   :  { %3102 = vst.msk [vmem:[#allocation2 + $0x28] sm:$0xff] %vm3096_vm2, %v3037_v5  ;;  %v3036_v58 = vmax.f32 %v2972_v33, 0.0  ;;  %v2975_v60 = vadd.f32 %v11217_v37, %v2904_v27  ;;  %v2903_v28 = vadd.f32 %v2609_v59, %v10933_v35  ;;  %v2624_v19 = vadd.f32 %v9238_v13, %v9126_v12  ;;  %v2041_v44 = vpop.f32.mrf.mxu0 }
 0x166   :  { %v2618_v62 = vpop.f32.mrf.mxu1 }
 0x167   :  { %3101 = vst.msk [vmem:[#allocation2 + $0x20] sm:$0xff] %vm3096_vm2, %v3036_v58  ;;  %v3039_v32 = vmax.f32 %v2975_v60, 0.0  ;;  %v2974_v18 = vadd.f32 %v11217_v37, %v2903_v28  ;;  %v2906_v45 = vadd.f32 %v2624_v19, %v10939_v41  ;;  %v2619_v34 = vadd.f32 %v2618_v62, %v2041_v44  ;;  %v9129_v26 = vpop.f32.mrf.mxu0 }
 0x168   :  { %v9241_v49 = vpop.f32.mrf.mxu1 }
 0x169   :  { %3104 = vst.msk [vmem:[#allocation2 + $0x38] sm:$0xff] %vm3096_vm2, %v3039_v32  ;;  %v3038_v24 = vmax.f32 %v2974_v18, 0.0  ;;  %v2977_v39 = vadd.f32 %v11217_v37, %v2906_v45  ;;  %v2905_v35 = vadd.f32 %v2619_v34, %v10948_v0  ;;  %v2634_v61 = vadd.f32 %v9241_v49, %v9129_v26  ;;  %v2051_v23 = vpop.f32.mrf.mxu0 }
 0x16a   :  { %v2628_v55 = vpop.f32.mrf.mxu1 }
 0x16b   :  { %3103 = vst.msk [vmem:[#allocation2 + $0x30] sm:$0xff] %vm3096_vm2, %v3038_v24  ;;  %v3041_v9 = vmax.f32 %v2977_v39, 0.0  ;;  %v2976_v31 = vadd.f32 %v11217_v37, %v2905_v35  ;;  %v2908_v41 = vadd.f32 %v2634_v61, %v10956_v57  ;;  %v2629_v5 = vadd.f32 %v2628_v55, %v2051_v23  ;;  %v9132_v33 = vpop.f32.mrf.mxu0 }
 0x16c   :  { %v9244_v27 = vpop.f32.mrf.mxu1 }
 0x16d   :  { %3106 = vst.msk [vmem:[#allocation2 + $0x48] sm:$0xff] %vm3096_vm2, %v3041_v9  ;;  %v3040_v59 = vmax.f32 %v2976_v31, 0.0  ;;  %v2979_v12 = vadd.f32 %v11217_v37, %v2908_v41  ;;  %v2907_v0 = vadd.f32 %v2629_v5, %v10962_v14  ;;  %v2644_v13 = vadd.f32 %v9244_v27, %v9132_v33  ;;  %v2061_v58 = vpop.f32.mrf.mxu0  ;;  %v7421_v41 = vld [vmem:[%s13353_s3 + $0xb8] sm:$0xff] }
 0x16e   :  { %v2638_v60 = vpop.f32.mrf.mxu1  ;;  %v1367_v5 = vadd.f32 %v11001_v30, %v10999_v22  ;;  %v13416_v22 = vmov 0.0  }
 0x16f   :  { %3105 = vst.msk [vmem:[#allocation2 + $0x40] sm:$0xff] %vm3096_vm2, %v3040_v59  ;;  %v3043_v28 = vmax.f32 %v2979_v12, 0.0  ;;  %v2978_v19 = vadd.f32 %v11217_v37, %v2907_v0  ;;  %v2910_v57 = vadd.f32 %v2644_v13, %v10969_v48  ;;  %v2639_v44 = vadd.f32 %v2638_v60, %v2061_v58  ;;  %v9135_v62 = vpop.f32.mrf.mxu0 }
 0x170   :  { %v9247_v32 = vpop.f32.mrf.mxu1 }
 0x171   :  { %3108 = vst.msk [vmem:[#allocation2 + $0x58] sm:$0xff] %vm3096_vm2, %v3043_v28  ;;  %v3042_v18 = vmax.f32 %v2978_v19, 0.0  ;;  %v2981_v45 = vadd.f32 %v11217_v37, %v2910_v57  ;;  %v2909_v14 = vadd.f32 %v2639_v44, %v10975_v47  ;;  %v2654_v34 = vadd.f32 %v9247_v32, %v9135_v62  ;;  %v2071_v26 = vpop.f32.mrf.mxu0  ;;  %v7419_v57 = vld [vmem:[%s13353_s3 + $0xa8] sm:$0xff] }
 0x172   :  { %v2648_v49 = vpop.f32.mrf.mxu1  ;;  %v1377_v44 = vadd.f32 %v11026_v53, %v11024_v40  ;;  %v7418_v40 = vld [vmem:[%s13353_s3 + $0xa0] sm:$0xff] }
 0x173   :  { %3107 = vst.msk [vmem:[#allocation2 + $0x50] sm:$0xff] %vm3096_vm2, %v3042_v18  ;;  %v3045_v24 = vmax.f32 %v2981_v45, 0.0  ;;  %v2980_v39 = vadd.f32 %v11217_v37, %v2909_v14  ;;  %v2912_v48 = vadd.f32 %v2654_v34, %v10979_v1  ;;  %v2649_v35 = vadd.f32 %v2648_v49, %v2071_v26  ;;  %v9138_v61 = vpop.f32.mrf.mxu0 }
 0x174   :  { %v9250_v23 = vpop.f32.mrf.mxu1 }
 0x175   :  { %3110 = vst.msk [vmem:[#allocation2 + $0x68] sm:$0xff] %vm3096_vm2, %v3045_v24  ;;  %v3044_v55 = vmax.f32 %v2980_v39, 0.0  ;;  %v2983_v9 = vadd.f32 %v11217_v37, %v2912_v48  ;;  %v2911_v47 = vadd.f32 %v2649_v35, %v10984_v63  ;;  %v2664_v31 = vadd.f32 %v9250_v23, %v9138_v61  ;;  %v2081_v33 = vpop.f32.mrf.mxu0  ;;  %v7420_v63 = vld [vmem:[%s13353_s3 + $0xb0] sm:$0xff] }
 0x176   :  { %v2658_v1 = vpop.f32.mrf.mxu1  ;;  %v3220_v27 = vld [vmem:[#allocation2 + $0x40] sm:$0xff]  ;;  %v1387_v35 = vadd.f32 %v11046_v16, %v11044_v11 }
 0x177   :  { %3109 = vst.msk [vmem:[#allocation2 + $0x60] sm:$0xff] %vm3096_vm2, %v3044_v55  ;;  %v3047_v59 = vmax.f32 %v2983_v9, 0.0  ;;  %v2982_v12 = vadd.f32 %v11217_v37, %v2911_v47  ;;  %v2914_v0 = vadd.f32 %v2664_v31, %v10993_v42  ;;  %v2659_v13 = vadd.f32 %v2658_v1, %v2081_v33  ;;  %9329 = vmatmul.mubr.msk.f32.vlgmr.msra.gmra.mxu0 %vm3096_vm2, %v3220_v27  ;;  %v9141_v58 = vpop.f32.mrf.mxu0 }
 0x178   :  { %v9253_v60 = vpop.f32.mrf.mxu1  ;;  %9331 = vmatprep.mubr.msk.f32.mxu0 %vm10063_vm1, %v13416_v22  ;;  %9391 = vmatpush3.msra.mxu0 %v7421_v41 }
 0x179   :  { %3112 = vst.msk [vmem:[#allocation2 + $0x78] sm:$0xff] %vm3096_vm2, %v3047_v59  ;;  %v3046_v30 = vmax.f32 %v2982_v12, 0.0  ;;  %v2985_v28 = vadd.f32 %v11217_v37, %v2914_v0  ;;  %v2913_v19 = vadd.f32 %v2659_v13, %v1367_v5  ;;  %v2674_v42 = vadd.f32 %v9253_v60, %v9141_v58  ;;  %9392 = vmatprep.subr.mxu0 %v13416_v22  ;;  %v2091_v62 = vpop.f32.mrf.mxu0 }
 0x17a   :  { %v2668_v32 = vpop.f32.mrf.mxu1  ;;  %v11285_v18 = vld [vmem:[#allocation2 + $0x50] sm:$0xff]  ;;  %9393 = vmatpush3.msra.mxu0 %v7420_v63 }
 0x17b   :  { %3111 = vst.msk [vmem:[#allocation2 + $0x70] sm:$0xff] %vm3096_vm2, %v3046_v30  ;;  %v3049_v45 = vmax.f32 %v2985_v28, 0.0  ;;  %v2984_v14 = vadd.f32 %v11217_v37, %v2913_v19  ;;  %v2916_v34 = vadd.f32 %v2674_v42, %v11017_v3  ;;  %v2669_v26 = vadd.f32 %v2668_v32, %v2091_v62  ;;  %9332 = vmatmul.mubr.msk.f32.gmra.mxu0 %vm3096_vm2, %v11285_v18  ;;  %v9144_v53 = vpop.f32.mrf.mxu0 }
 0x17c   :  { %9394 = vmatprep.subr.mxu0 %v13416_v22  ;;  %v9256_v49 = vpop.f32.mrf.mxu1  ;;  %9334 = vmatprep.mubr.msk.f32.mxu0 %vm10063_vm1, %v13416_v22 }
 0x17d   :  { %9395 = vmatpush3.msra.mxu0 %v7419_v57  ;;  %3114 = vst.msk [vmem:[#allocation2 + $0x88] sm:$0xff] %vm3096_vm2, %v3049_v45  ;;  %v3048_v24 = vmax.f32 %v2984_v14, 0.0  ;;  %v2987_v3 = vadd.f32 %v11217_v37, %v2916_v34  ;;  %v2915_v39 = vadd.f32 %v2669_v26, %v1377_v44  ;;  %v2684_v48 = vadd.f32 %v9256_v49, %v9144_v53  ;;  %v2101_v61 = vpop.f32.mrf.mxu0 }
 0x17e   :  { %9396 = vmatprep.subr.mxu0 %v13416_v22  ;;  %v2678_v23 = vpop.f32.mrf.mxu1  ;;  %v11303_v55 = vld [vmem:[#allocation2 + $0x60] sm:$0xff] }
 0x17f   :  { %9397 = vmatpush3.msra.mxu0 %v7418_v40  ;;  %3113 = vst.msk [vmem:[#allocation2 + $0x80] sm:$0xff] %vm3096_vm2, %v3048_v24  ;;  %v3051_v9 = vmax.f32 %v2987_v3, 0.0  ;;  %v2986_v47 = vadd.f32 %v11217_v37, %v2915_v39  ;;  %v2918_v31 = vadd.f32 %v2684_v48, %v11039_v4  ;;  %v2679_v41 = vadd.f32 %v2678_v23, %v2101_v61  ;;  %v9147_v5 = vpop.f32.mrf.mxu0 }
 0x180   :  { %9335 = vmatmul.mubr.msk.f32.gmra.mxu0 %vm3096_vm2, %v11303_v55  ;;  %9460 = vmatprep.subr.mxu0 %v13416_v22  ;;  %v9259_v11 = vpop.f32.mrf.mxu1  ;;  %v1397_v4 = vadd.f32 %v11057_v43, %v11055_v15  ;;  %v1407_v15 = vadd.f32 %v11073_v36, %v11071_v52  ;;  %v1417_v52 = vadd.f32 %v11089_v51, %v11087_v2 }
 0x181   :  { %9337 = vmatprep.mubr.msk.f32.mxu0 %vm10063_vm1, %v13416_v22  ;;  %3116 = vst.msk [vmem:[#allocation2 + $0x98] sm:$0xff] %vm3096_vm2, %v3051_v9  ;;  %v3050_v16 = vmax.f32 %v2986_v47, 0.0  ;;  %v2989_v33 = vadd.f32 %v11217_v37, %v2918_v31  ;;  %v2917_v1 = vadd.f32 %v2679_v41, %v1387_v35  ;;  %v2694_v27 = vadd.f32 %v9259_v11, %v9147_v5  ;;  %v2111_v59 = vpop.f32.mrf.mxu0 }
 0x182   :  { %v2688_v12 = vpop.f32.mrf.mxu1  ;;  %v1427_v2 = vadd.f32 %v11104_v50, %v11102_v7  ;;  %v1437_v7 = vadd.f32 %v11116_v46, %v11114_v21  ;;  %v1447_v21 = vadd.f32 %v11122_v20, %v11120_v54 }
 0x183   :  { %3115 = vst.msk [vmem:[#allocation2 + $0x90] sm:$0xff] %vm3096_vm2, %v3050_v16  ;;  %v3053_v0 = vmax.f32 %v2989_v33, 0.0  ;;  %v2988_v13 = vadd.f32 %v11217_v37, %v2917_v1  ;;  %v2920_v63 = vadd.f32 %v2694_v27, %v11050_v25  ;;  %v2689_v58 = vadd.f32 %v2688_v12, %v2111_v59  ;;  %v9150_v60 = vpop.f32.mrf.mxu0 }
 0x184   :  { %v9262_v30 = vpop.f32.mrf.mxu1 }
 0x185   :  { %3118 = vst.msk [vmem:[#allocation2 + $0xa8] sm:$0xff] %vm3096_vm2, %v3053_v0  ;;  %v3052_v28 = vmax.f32 %v2988_v13, 0.0  ;;  %v2991_v19 = vadd.f32 %v11217_v37, %v2920_v63  ;;  %v2919_v42 = vadd.f32 %v2689_v58, %v1397_v4  ;;  %v2704_v57 = vadd.f32 %v9262_v30, %v9150_v60  ;;  %v2121_v43 = vpop.f32.mrf.mxu0 }
 0x186   :  { %v2698_v44 = vpop.f32.mrf.mxu1 }
 0x187   :  { %3117 = vst.msk [vmem:[#allocation2 + $0xa0] sm:$0xff] %vm3096_vm2, %v3052_v28  ;;  %v3055_v62 = vmax.f32 %v2991_v19, 0.0  ;;  %v2990_v25 = vadd.f32 %v11217_v37, %v2919_v42  ;;  %v2922_v32 = vadd.f32 %v2704_v57, %v11064_v29  ;;  %v2699_v45 = vadd.f32 %v2698_v44, %v2121_v43  ;;  %v9153_v14 = vpop.f32.mrf.mxu0 }
 0x188   :  { %v9265_v34 = vpop.f32.mrf.mxu1 }
 0x189   :  { %3120 = vst.msk [vmem:[#allocation2 + $0xb8] sm:$0xff] %vm3096_vm2, %v3055_v62  ;;  %v3054_v26 = vmax.f32 %v2990_v25, 0.0  ;;  %v2993_v40 = vadd.f32 %v11217_v37, %v2922_v32  ;;  %v2921_v53 = vadd.f32 %v2699_v45, %v1407_v15  ;;  %v2714_v49 = vadd.f32 %v9265_v34, %v9153_v14  ;;  %v2131_v36 = vpop.f32.mrf.mxu0 }
 0x18a   :  { %v2708_v24 = vpop.f32.mrf.mxu1 }
 0x18b   :  { %3119 = vst.msk [vmem:[#allocation2 + $0xb0] sm:$0xff] %vm3096_vm2, %v3054_v26  ;;  %v3057_v3 = vmax.f32 %v2993_v40, 0.0  ;;  %v2992_v29 = vadd.f32 %v11217_v37, %v2921_v53  ;;  %v2924_v39 = vadd.f32 %v2714_v49, %v11080_v56  ;;  %v2709_v48 = vadd.f32 %v2708_v24, %v2131_v36  ;;  %v9156_v35 = vpop.f32.mrf.mxu0  ;;  %v13417_v36 = vld [vmem:[#allocation4_spill] sm:$0xff] }
 0x18c   :  { %v9268_v61 = vpop.f32.mrf.mxu1  ;;  %v1457_v26 = vadd.f32 %v11128_v17, %v11126_v10 }
 0x18d   :  { %3122 = vst.msk [vmem:[#allocation2 + $0xc8] sm:$0xff] %vm3096_vm2, %v3057_v3  ;;  %v3056_v23 = vmax.f32 %v2992_v29, 0.0  ;;  %v2995_v9 = vadd.f32 %v11217_v37, %v2924_v39  ;;  %v2923_v47 = vadd.f32 %v2709_v48, %v1417_v52  ;;  %v2724_v31 = vadd.f32 %v9268_v61, %v9156_v35  ;;  %v2141_v51 = vpop.f32.mrf.mxu0  ;;  %v13418_v61 = vld [vmem:[#allocation6_spill] sm:$0xff] }
 0x18e   :  { %v2718_v41 = vpop.f32.mrf.mxu1 }
 0x18f   :  { %3121 = vst.msk [vmem:[#allocation2 + $0xc0] sm:$0xff] %vm3096_vm2, %v3056_v23  ;;  %v3059_v5 = vmax.f32 %v2995_v9, 0.0  ;;  %v2994_v56 = vadd.f32 %v11217_v37, %v2923_v47  ;;  %v2926_v11 = vadd.f32 %v2724_v31, %v11096_v6  ;;  %v2719_v16 = vadd.f32 %v2718_v41, %v2141_v51  ;;  %v9159_v33 = vpop.f32.mrf.mxu0  ;;  %v13419_v23 = vld [vmem:[#allocation7_spill] sm:$0xff] }
 0x190   :  { %v9271_v1 = vpop.f32.mrf.mxu1  ;;  %v1467_v9 = vadd.f32 %v13419_v23, %v13418_v61 }
 0x191   :  { %3124 = vst.msk [vmem:[#allocation2 + $0xd8] sm:$0xff] %vm3096_vm2, %v3059_v5  ;;  %v3058_v27 = vmax.f32 %v2994_v56, 0.0  ;;  %v2997_v4 = vadd.f32 %v11217_v37, %v2926_v11  ;;  %v2925_v59 = vadd.f32 %v2719_v16, %v1427_v2  ;;  %v2734_v12 = vadd.f32 %v9271_v1, %v9159_v33  ;;  %v2151_v50 = vpop.f32.mrf.mxu0  ;;  %v13420_v5 = vld [vmem:[#allocation5_spill] sm:$0xff] }
 0x192   :  { %v2728_v0 = vpop.f32.mrf.mxu1 }
 0x193   :  { %3123 = vst.msk [vmem:[#allocation2 + $0xd0] sm:$0xff] %vm3096_vm2, %v3058_v27  ;;  %v3061_v13 = vmax.f32 %v2997_v4, 0.0  ;;  %v2996_v6 = vadd.f32 %v11217_v37, %v2925_v59  ;;  %v2928_v63 = vadd.f32 %v2734_v12, %v11108_v8  ;;  %v2729_v58 = vadd.f32 %v2728_v0, %v2151_v50  ;;  %v9162_v60 = vpop.f32.mrf.mxu0  ;;  %v13421_v12 = vld [vmem:[#allocation9_spill] sm:$0xff] }
 0x194   :  { %v9274_v30 = vpop.f32.mrf.mxu1 }
 0x195   :  { %3126 = vst.msk [vmem:[#allocation2 + $0xe8] sm:$0xff] %vm3096_vm2, %v3061_v13  ;;  %v3060_v28 = vmax.f32 %v2996_v6, 0.0  ;;  %v2999_v19 = vadd.f32 %v11217_v37, %v2928_v63  ;;  %v2927_v42 = vadd.f32 %v2729_v58, %v1437_v7  ;;  %v2744_v57 = vadd.f32 %v9274_v30, %v9162_v60  ;;  %v2161_v46 = vpop.f32.mrf.mxu0  ;;  %v13422_v7 = vld [vmem:[#allocation10_spill] sm:$0xff]  ;;  %v13423_v58 = vld [vmem:[#allocation8_spill] sm:$0xff] }
 0x196   :  { %v2738_v15 = vpop.f32.mrf.mxu1  ;;  %v3223_v43 = vld [vmem:[#allocation2 + $0xc0] sm:$0xff]  ;;  %v1477_v50 = vadd.f32 %v13422_v7, %v13421_v12 }
 0x197   :  { %3125 = vst.msk [vmem:[#allocation2 + $0xe0] sm:$0xff] %vm3096_vm2, %v3060_v28  ;;  %v3063_v44 = vmax.f32 %v2999_v19, 0.0  ;;  %v2998_v8 = vadd.f32 %v11217_v37, %v2927_v42  ;;  %v2930_v62 = vadd.f32 %v2744_v57, %v11118_v38  ;;  %v2739_v25 = vadd.f32 %v2738_v15, %v2161_v46  ;;  %9338 = vmatmul.mubr.msk.f32.gmra.mxu0 %vm3096_vm2, %v3223_v43  ;;  %v9165_v32 = vpop.f32.mrf.mxu0  ;;  %v13424_v15 = vld [vmem:[#allocation12_spill] sm:$0xff]  ;;  %v13425_v43 = vld [vmem:[#allocation13_spill] sm:$0xff] }
 0x198   :  { %v9277_v45 = vpop.f32.mrf.mxu1  ;;  %9340 = vmatprep.mubr.msk.f32.mxu0 %vm10063_vm1, %v13416_v22 }
 0x199   :  { %3128 = vst.msk [vmem:[#allocation2 + $0xf8] sm:$0xff] %vm3096_vm2, %v3063_v44  ;;  %v3062_v54 = vmax.f32 %v2998_v8, 0.0  ;;  %v3001_v20 = vadd.f32 %v11217_v37, %v2930_v62  ;;  %v2929_v14 = vadd.f32 %v2739_v25, %v1447_v21  ;;  %v2754_v34 = vadd.f32 %v9277_v45, %v9165_v32  ;;  %v2171_v40 = vpop.f32.mrf.mxu0  ;;  %v13426_v45 = vld [vmem:[#allocation11_spill] sm:$0xff] }
 0x19a   :  { %v2748_v38 = vpop.f32.mrf.mxu1  ;;  %v11362_v53 = vld [vmem:[#allocation2 + $0xd0] sm:$0xff]  ;;  %v1487_v44 = vadd.f32 %v13425_v43, %v13424_v15 }
 0x19b   :  { %3127 = vst.msk [vmem:[#allocation2 + $0xf0] sm:$0xff] %vm3096_vm2, %v3062_v54  ;;  %v3065_v49 = vmax.f32 %v3001_v20, 0.0  ;;  %v3000_v52 = vadd.f32 %v11217_v37, %v2929_v14  ;;  %v2932_v24 = vadd.f32 %v2754_v34, %v13417_v36  ;;  %v2749_v3 = vadd.f32 %v2748_v38, %v2171_v40  ;;  %9341 = vmatmul.mubr.msk.f32.gmra.mxu0 %vm3096_vm2, %v11362_v53  ;;  %v9168_v29 = vpop.f32.mrf.mxu0  ;;  %v13428_v36 = vld [vmem:[#allocation16_spill] sm:$0xff] }
 0x19c   :  { %v9280_v39 = vpop.f32.mrf.mxu1  ;;  %9343 = vmatprep.mubr.msk.f32.mxu0 %vm10063_vm1, %v13416_v22 }
 0x19d   :  { %3130 = vst.msk [vmem:[#allocation2 + $0x108] sm:$0xff] %vm3096_vm2, %v3065_v49  ;;  %v3064_v10 = vmax.f32 %v3000_v52, 0.0  ;;  %v3003_v17 = vadd.f32 %v11217_v37, %v2932_v24  ;;  %v2931_v48 = vadd.f32 %v2749_v3, %v1457_v26  ;;  %v2764_v35 = vadd.f32 %v9280_v39, %v9168_v29  ;;  %v2181_v47 = vpop.f32.mrf.mxu0  ;;  %v13427_v52 = vld [vmem:[#allocation15_spill] sm:$0xff] }
 0x19e   :  { %v2758_v31 = vpop.f32.mrf.mxu1  ;;  %v11375_v2 = vld [vmem:[#allocation2 + $0xe0] sm:$0xff]  ;;  %v1497_v24 = vadd.f32 %v13428_v36, %v13427_v52 }
 0x19f   :  { %3129 = vst.msk [vmem:[#allocation2 + $0x100] sm:$0xff] %vm3096_vm2, %v3064_v10  ;;  %v3067_v51 = vmax.f32 %v3003_v17, 0.0  ;;  %v3002_v41 = vadd.f32 %v11217_v37, %v2931_v48  ;;  %v2934_v56 = vadd.f32 %v2764_v35, %v13420_v5  ;;  %v2759_v11 = vadd.f32 %v2758_v31, %v2181_v47  ;;  %9344 = vmatmul.mubr.msk.f32.gmra.mxu0 %vm3096_vm2, %v11375_v2  ;;  %v9171_v16 = vpop.f32.mrf.mxu0  ;;  %v13429_v17 = vld [vmem:[#allocation14_spill] sm:$0xff]  ;;  %v13431_v5 = vld [vmem:[#allocation19_spill] sm:$0xff] }
 0x1a0   :  { %v9283_v33 = vpop.f32.mrf.mxu1  ;;  %9346 = vmatprep.mubr.msk.f32.mxu0 %vm10063_vm1, %v13416_v22 }
 0x1a1   :  { %3132 = vst.msk [vmem:[#allocation2 + $0x118] sm:$0xff] %vm3096_vm2, %v3067_v51  ;;  %v3066_v1 = vmax.f32 %v3002_v41, 0.0  ;;  %v3005_v27 = vadd.f32 %v11217_v37, %v2934_v56  ;;  %v2933_v4 = vadd.f32 %v2759_v11, %v1467_v9  ;;  %v2774_v59 = vadd.f32 %v9283_v33, %v9171_v16  ;;  %v2191_v0 = vpop.f32.mrf.mxu0  ;;  %v13430_v41 = vld [vmem:[#allocation18_spill] sm:$0xff] }
 0x1a2   :  { %v2768_v13 = vpop.f32.mrf.mxu1  ;;  %v1507_v56 = vadd.f32 %v13431_v5, %v13430_v41  ;;  %v13441_v5 = vld [vmem:[#allocation26_spill] sm:$0xff] }
 0x1a3   :  { %3131 = vst.msk [vmem:[#allocation2 + $0x110] sm:$0xff] %vm3096_vm2, %v3066_v1  ;;  %v3069_v6 = vmax.f32 %v3005_v27, 0.0  ;;  %v3004_v63 = vadd.f32 %v11217_v37, %v2933_v4  ;;  %v2936_v60 = vadd.f32 %v2774_v59, %v13423_v58  ;;  %v2769_v30 = vadd.f32 %v2768_v13, %v2191_v0  ;;  %v9174_v28 = vpop.f32.mrf.mxu0  ;;  %v13432_v27 = vld [vmem:[#allocation17_spill] sm:$0xff]  ;;  %v13434_v58 = vld [vmem:[#allocation22_spill] sm:$0xff] }
 0x1a4   :  { %v9286_v19 = vpop.f32.mrf.mxu1 }
 0x1a5   :  { %3134 = vst.msk [vmem:[#allocation2 + $0x128] sm:$0xff] %vm3096_vm2, %v3069_v6  ;;  %v3068_v42 = vmax.f32 %v3004_v63, 0.0  ;;  %v3007_v57 = vadd.f32 %v11217_v37, %v2936_v60  ;;  %v2935_v21 = vadd.f32 %v2769_v30, %v1477_v50  ;;  %v2784_v46 = vadd.f32 %v9286_v19, %v9174_v28  ;;  %v2201_v8 = vpop.f32.mrf.mxu0  ;;  %v13433_v63 = vld [vmem:[#allocation21_spill] sm:$0xff] }
 0x1a6   :  { %v2778_v62 = vpop.f32.mrf.mxu1  ;;  %v1517_v60 = vadd.f32 %v13434_v58, %v13433_v63 }
 0x1a7   :  { %3133 = vst.msk [vmem:[#allocation2 + $0x120] sm:$0xff] %vm3096_vm2, %v3068_v42  ;;  %v3071_v25 = vmax.f32 %v3007_v57, 0.0  ;;  %v3006_v32 = vadd.f32 %v11217_v37, %v2935_v21  ;;  %v2938_v54 = vadd.f32 %v2784_v46, %v13426_v45  ;;  %v2779_v20 = vadd.f32 %v2778_v62, %v2201_v8  ;;  %v9177_v14 = vpop.f32.mrf.mxu0  ;;  %v13435_v57 = vld [vmem:[#allocation20_spill] sm:$0xff]  ;;  %v13437_v45 = vld [vmem:[#allocation25_spill] sm:$0xff] }
 0x1a8   :  { %v9289_v34 = vpop.f32.mrf.mxu1 }
 0x1a9   :  { %3136 = vst.msk [vmem:[#allocation2 + $0x138] sm:$0xff] %vm3096_vm2, %v3071_v25  ;;  %v3070_v26 = vmax.f32 %v3006_v32, 0.0  ;;  %v3009_v40 = vadd.f32 %v11217_v37, %v2938_v54  ;;  %v2937_v38 = vadd.f32 %v2779_v20, %v1487_v44  ;;  %v2794_v49 = vadd.f32 %v9289_v34, %v9177_v14  ;;  %v2211_v3 = vpop.f32.mrf.mxu0  ;;  %v13436_v32 = vld [vmem:[#allocation24_spill] sm:$0xff] }
 0x1aa   :  { %v2788_v29 = vpop.f32.mrf.mxu1  ;;  %v1527_v54 = vadd.f32 %v13437_v45, %v13436_v32  ;;  %v7387_v32 = vld [vmem:[%s13353_s3 + $0x38] sm:$0xff]  ;;  %v13445_v45 = vld [vmem:[#allocation33_spill] sm:$0xff] }
 0x1ab   :  { %3135 = vst.msk [vmem:[#allocation2 + $0x130] sm:$0xff] %vm3096_vm2, %v3070_v26  ;;  %v3073_v39 = vmax.f32 %v3009_v40, 0.0  ;;  %v3008_v10 = vadd.f32 %v11217_v37, %v2937_v38  ;;  %v2940_v48 = vadd.f32 %v2794_v49, %v13429_v17  ;;  %v2789_v35 = vadd.f32 %v2788_v29, %v2211_v3  ;;  %v9180_v61 = vpop.f32.mrf.mxu0  ;;  %v13438_v38 = vld [vmem:[#allocation23_spill] sm:$0xff]  ;;  %v3173_v17 = vld [vmem:[%s13353_s3 + $0x18] sm:$0xff] }
 0x1ac   :  { %v9292_v23 = vpop.f32.mrf.mxu1 }
 0x1ad   :  { %3138 = vst.msk [vmem:[#allocation2 + $0x148] sm:$0xff] %vm3096_vm2, %v3073_v39  ;;  %v3072_v9 = vmax.f32 %v3008_v10, 0.0  ;;  %v3011_v47 = vadd.f32 %v11217_v37, %v2940_v48  ;;  %v2939_v31 = vadd.f32 %v2789_v35, %v1497_v24  ;;  %v2804_v51 = vadd.f32 %v9292_v23, %v9180_v61  ;;  %v2221_v11 = vpop.f32.mrf.mxu0  ;;  %v13439_v48 = vld [vmem:[#allocation27_spill] sm:$0xff]  ;;  %v13440_v35 = vld [vmem:[#allocation28_spill] sm:$0xff] }
 0x1ae   :  { %v2798_v16 = vpop.f32.mrf.mxu1  ;;  %v1537_v61 = vadd.f32 %v13440_v35, %v13439_v48 }
 0x1af   :  { %3137 = vst.msk [vmem:[#allocation2 + $0x140] sm:$0xff] %vm3096_vm2, %v3072_v9  ;;  %v3075_v33 = vmax.f32 %v3011_v47, 0.0  ;;  %v3010_v1 = vadd.f32 %v11217_v37, %v2939_v31  ;;  %v2942_v4 = vadd.f32 %v2804_v51, %v13432_v27  ;;  %v2799_v59 = vadd.f32 %v2798_v16, %v2221_v11  ;;  %v9183_v12 = vpop.f32.mrf.mxu0  ;;  %v3509_v31 = vld [vmem:[#allocation2 + $0x48] sm:$0xff]  ;;  %v3172_v16 = vld [vmem:[%s13353_s3 + $0x10] sm:$0xff] }
 0x1b0   :  { %v9295_v7 = vpop.f32.mrf.mxu1 }
 0x1b1   :  { %3140 = vst.msk [vmem:[#allocation2 + $0x158] sm:$0xff] %vm3096_vm2, %v3075_v33  ;;  %v3074_v50 = vmax.f32 %v3010_v1, 0.0  ;;  %v3013_v0 = vadd.f32 %v11217_v37, %v2942_v4  ;;  %v2941_v13 = vadd.f32 %v2799_v59, %v1507_v56  ;;  %v2814_v6 = vadd.f32 %v9295_v7, %v9183_v12  ;;  %v2231_v30 = vpop.f32.mrf.mxu0  ;;  %v7443_v33 = vld [vmem:[%s13353_s3 + $0xd8] sm:$0xff] }
 0x1b2   :  { %v2808_v28 = vpop.f32.mrf.mxu1 }
 0x1b3   :  { %3139 = vst.msk [vmem:[#allocation2 + $0x150] sm:$0xff] %vm3096_vm2, %v3074_v50  ;;  %v3077_v19 = vmax.f32 %v3013_v0, 0.0  ;;  %v3012_v42 = vadd.f32 %v11217_v37, %v2941_v13  ;;  %v2944_v21 = vadd.f32 %v2814_v6, %v13435_v57  ;;  %v2809_v46 = vadd.f32 %v2808_v28, %v2231_v30  ;;  %v9186_v15 = vpop.f32.mrf.mxu0  ;;  %v3171_v50 = vld [vmem:[%s13353_s3 + $0x8] sm:$0xff]  ;;  %v13442_v0 = vld [vmem:[#allocation30_spill] sm:$0xff]  ;;  %v13443_v13 = vld [vmem:[#allocation31_spill] sm:$0xff] }
 0x1b4   :  { %v9298_v43 = vpop.f32.mrf.mxu1  ;;  %v1547_v6 = vadd.f32 %v13443_v13, %v13442_v0 }
 0x1b5   :  { %3142 = vst.msk [vmem:[#allocation2 + $0x168] sm:$0xff] %vm3096_vm2, %v3077_v19  ;;  %v3076_v44 = vmax.f32 %v3012_v42, 0.0  ;;  %v3015_v8 = vadd.f32 %v11217_v37, %v2944_v21  ;;  %v2943_v62 = vadd.f32 %v2809_v46, %v1517_v60  ;;  %v2824_v25 = vadd.f32 %v9298_v43, %v9186_v15  ;;  %v2241_v20 = vpop.f32.mrf.mxu0  ;;  %v13444_v19 = vld [vmem:[#allocation29_spill] sm:$0xff]  ;;  %v11470_v21 = vld [vmem:[#allocation2 + $0x58] sm:$0xff]  ;;  %v3170_v46 = vld [vmem:[%s13353_s3] sm:$0xff] }
 0x1b6   :  { %v2818_v14 = vpop.f32.mrf.mxu1  ;;  %v3226_v34 = vld [vmem:[#allocation2 + $0x140] sm:$0xff] }
 0x1b7   :  { %3141 = vst.msk [vmem:[#allocation2 + $0x160] sm:$0xff] %vm3096_vm2, %v3076_v44  ;;  %v3079_v26 = vmax.f32 %v3015_v8, 0.0  ;;  %v3014_v40 = vadd.f32 %v11217_v37, %v2943_v62  ;;  %v2946_v49 = vadd.f32 %v2824_v25, %v13438_v38  ;;  %v2819_v52 = vadd.f32 %v2818_v14, %v2241_v20  ;;  %9347 = vmatmul.mubr.msk.f32.gmra.mxu0 %vm3096_vm2, %v3226_v34  ;;  %v9189_v36 = vpop.f32.mrf.mxu0 }
 0x1b8   :  { %v9301_v24 = vpop.f32.mrf.mxu1  ;;  %9398 = vmatprep.mubr.msk.f32.mxu0 %vm10063_vm1, %v13416_v22 }
 0x1b9   :  { %3144 = vst.msk [vmem:[#allocation2 + $0x178] sm:$0xff] %vm3096_vm2, %v3079_v26  ;;  %v3078_v3 = vmax.f32 %v3014_v40, 0.0  ;;  %v3017_v29 = vadd.f32 %v11217_v37, %v2946_v49  ;;  %v2945_v39 = vadd.f32 %v2819_v52, %v1527_v54  ;;  %v2834_v10 = vadd.f32 %v9301_v24, %v9189_v36  ;;  %v2251_v23 = vpop.f32.mrf.mxu0  ;;  %v13446_v54 = vld [vmem:[#allocation34_spill] sm:$0xff]  ;;  %v3161_v26 = vld [vmem:[#allocation2] sm:$0xff]  ;;  %v13447_v49 = vld [vmem:[#allocation32_spill] sm:$0xff] }
 0x1ba   :  { %v2828_v9 = vpop.f32.mrf.mxu1  ;;  %v11436_v47 = vld [vmem:[#allocation2 + $0x150] sm:$0xff]  ;;  %v1557_v20 = vadd.f32 %v13446_v54, %v13445_v45  ;;  %v11493_v24 = vld [vmem:[#allocation2 + $0x68] sm:$0xff] }
 0x1bb   :  { %3143 = vst.msk [vmem:[#allocation2 + $0x170] sm:$0xff] %vm3096_vm2, %v3078_v3  ;;  %v3081_v51 = vmax.f32 %v3017_v29, 0.0  ;;  %v3016_v41 = vadd.f32 %v11217_v37, %v2945_v39  ;;  %v2948_v56 = vadd.f32 %v2834_v10, %v13441_v5  ;;  %v2829_v11 = vadd.f32 %v2828_v9, %v2251_v23  ;;  %9350 = vmatmul.mubr.msk.f32.vlgmr.msra.gmra.mxu1 %vm3096_vm2, %v11436_v47  ;;  %v9192_v1 = vpop.f32.mrf.mxu0  ;;  %v7442_v39 = vld [vmem:[%s13353_s3 + $0xd0] sm:$0xff] }
 0x1bc   :  { %9399 = vmatmul.mubr.msk.f32.vlgmr.msra.gmra.mxu0 %vm3096_vm2, %v3509_v31  ;;  %v9304_v27 = vpop.f32.mrf.mxu1  ;;  %9356 = vmatpush3.msra.mxu1 %v3173_v17  ;;  %v13449_v23 = vld [vmem:[#allocation37_spill] sm:$0xff] }
 0x1bd   :  { %9352 = vmatprep.mubr.msk.f32.mxu1 %vm10063_vm1, %v13416_v22  ;;  %3146 = vst.msk [vmem:[#allocation2 + $0x188] sm:$0xff] %vm3096_vm2, %v3081_v51  ;;  %v3080_v4 = vmax.f32 %v3016_v41, 0.0  ;;  %v3019_v59 = vadd.f32 %v11217_v37, %v2948_v56  ;;  %v2947_v12 = vadd.f32 %v2829_v11, %v1537_v61  ;;  %v2844_v7 = vadd.f32 %v9304_v27, %v9192_v1  ;;  %v2261_v63 = vpop.f32.mrf.mxu0  ;;  %v13448_v61 = vld [vmem:[#allocation36_spill] sm:$0xff]  ;;  %v11509_v41 = vld [vmem:[#allocation2 + $0x10] sm:$0xff] }
 0x1be   :  { %9357 = vmatprep.subr.mxu1 %v13416_v22  ;;  %9401 = vmatprep.mubr.msk.f32.mxu0 %vm10063_vm1, %v13416_v22  ;;  %v2838_v58 = vpop.f32.mrf.mxu1  ;;  %v11462_v60 = vld [vmem:[#allocation2 + $0x160] sm:$0xff]  ;;  %v1567_v9 = vadd.f32 %v13449_v23, %v13448_v61  ;;  %v7386_v5 = vld [vmem:[%s13353_s3 + $0x30] sm:$0xff]  ;;  %v3512_v27 = vld [vmem:[#allocation2 + $0xc8] sm:$0xff] }
 0x1bf   :  { %9358 = vmatpush3.msra.mxu1 %v3172_v16  ;;  %9461 = vmatpush3.msra.mxu0 %v7443_v33  ;;  %3145 = vst.msk [vmem:[#allocation2 + $0x180] sm:$0xff] %vm3096_vm2, %v3080_v4  ;;  %v3083_v30 = vmax.f32 %v3019_v59, 0.0  ;;  %v3018_v28 = vadd.f32 %v11217_v37, %v2947_v12  ;;  %v2950_v42 = vadd.f32 %v2844_v7, %v13444_v19  ;;  %v9195_v15 = vpop.f32.mrf.mxu0  ;;  %v13450_v16 = vld [vmem:[#allocation35_spill] sm:$0xff]  ;;  %v7441_v12 = vld [vmem:[%s13353_s3 + $0xc8] sm:$0xff] }
 0x1c0   :  { %v2839_v57 = vadd.f32 %v2838_v58, %v2261_v63  ;;  %9353 = vmatmul.mubr.msk.f32.gmra.mxu1 %vm3096_vm2, %v11462_v60  ;;  %9359 = vmatprep.subr.mxu1 %v13416_v22  ;;  %v9307_v43 = vpop.f32.mrf.mxu1  ;;  %v13452_v63 = vld [vmem:[#allocation40_spill] sm:$0xff]  ;;  %v11533_v19 = vld [vmem:[#allocation2 + $0x20] sm:$0xff] }
 0x1c1   :  { %9402 = vmatmul.mubr.msk.f32.gmra.mxu0 %vm3096_vm2, %v11470_v21  ;;  %9360 = vmatpush3.msra.mxu1 %v3171_v50  ;;  %3148 = vst.msk [vmem:[#allocation2 + $0x198] sm:$0xff] %vm3096_vm2, %v3083_v30  ;;  %v3082_v44 = vmax.f32 %v3018_v28, 0.0  ;;  %v3021_v8 = vadd.f32 %v11217_v37, %v2950_v42  ;;  %v2854_v25 = vadd.f32 %v9307_v43, %v9195_v15  ;;  %v2271_v14 = vpop.f32.mrf.mxu0  ;;  %v7385_v42 = vld [vmem:[%s13353_s3 + $0x28] sm:$0xff]  ;;  %v13453_v15 = vld [vmem:[#allocation38_spill] sm:$0xff] }
 0x1c2   :  { %v2949_v62 = vadd.f32 %v2839_v57, %v1547_v6  ;;  %9361 = vmatprep.subr.mxu1 %v13416_v22  ;;  %9363 = vmatprep.mubr.msk.f32.mxu1 %vm10063_vm1, %v13416_v22  ;;  %v2848_v34 = vpop.f32.mrf.mxu1  ;;  %v13451_v6 = vld [vmem:[#allocation39_spill] sm:$0xff] }
 0x1c3   :  { %9362 = vmatpush3.msra.mxu1 %v3170_v46  ;;  %9404 = vmatprep.mubr.msk.f32.mxu0 %vm10063_vm1, %v13416_v22  ;;  %3147 = vst.msk [vmem:[#allocation2 + $0x190] sm:$0xff] %vm3096_vm2, %v3082_v44  ;;  %v3085_v40 = vmax.f32 %v3021_v8, 0.0  ;;  %v2952_v52 = vadd.f32 %v2854_v25, %v13447_v49  ;;  %v2849_v36 = vadd.f32 %v2848_v34, %v2271_v14  ;;  %v9198_v3 = vpop.f32.mrf.mxu0  ;;  %v11544_v57 = vld [vmem:[%s13354_s2] ss:$0 sm:$0xff]  ;;  %v11550_v8 = vld [vmem:[#allocation2 + $0xd8] sm:$0xff] }
 0x1c4   :  { %v3020_v38 = vadd.f32 %v11217_v37, %v2949_v62  ;;  %9364 = vmatmul.mubr.msk.f32.vlgmr.msra.gmra.mxu1 %vm3096_vm2, %v3161_v26  ;;  %9425 = vmatprep.subr.mxu1 %v13416_v22  ;;  %v9310_v29 = vpop.f32.mrf.mxu1  ;;  %v1577_v58 = vadd.f32 %v13452_v63, %v13451_v6  ;;  %v13454_v34 = vld [vmem:[#allocation42_spill] sm:$0xff]  ;;  %v13455_v26 = vld [vmem:[#allocation43_spill] sm:$0xff] }
 0x1c5   :  { %9405 = vmatmul.mubr.msk.f32.gmra.mxu0 %vm3096_vm2, %v11493_v24  ;;  %9426 = vmatpush3.msra.mxu1 %v7387_v32  ;;  %3150 = vst.msk [vmem:[#allocation2 + $0x1a8] sm:$0xff] %vm3096_vm2, %v3085_v40  ;;  %v3023_v17 = vadd.f32 %v11217_v37, %v2952_v52  ;;  %v2951_v48 = vadd.f32 %v2849_v36, %v1557_v20  ;;  %v2281_v31 = vpop.f32.mrf.mxu0  ;;  %v7440_v32 = vld [vmem:[%s13353_s3 + $0xc0] sm:$0xff] }
 0x1c6   :  { %v3084_v10 = vmax.f32 %v3020_v38, 0.0  ;;  %v2864_v35 = vadd.f32 %v9310_v29, %v9198_v3  ;;  %9366 = vmatprep.mubr.msk.f32.mxu1 %vm10063_vm1, %v13416_v22  ;;  %9407 = vmatprep.mubr.msk.f32.mxu0 %vm10063_vm1, %v13416_v22  ;;  %v2858_v51 = vpop.f32.mrf.mxu1  ;;  %v1587_v40 = vadd.f32 %v13455_v26, %v13454_v34  ;;  %v11565_v52 = vld [vmem:[#allocation2 + $0x80] sm:$0xff]  ;;  %v11714_v26 = vld [vmem:[#allocation2 + $0xf0] sm:$0xff] }
 0x1c7   :  { %9427 = vmatprep.subr.mxu1 %v13416_v22  ;;  %9462 = vmatprep.subr.mxu0 %v13416_v22  ;;  %v3087_v56 = vmax.f32 %v3023_v17, 0.0  ;;  %v3022_v11 = vadd.f32 %v11217_v37, %v2951_v48  ;;  %v2859_v1 = vadd.f32 %v2858_v51, %v2281_v31  ;;  %v9201_v4 = vpop.f32.mrf.mxu0  ;;  %v7384_v36 = vld [vmem:[%s13353_s3 + $0x20] sm:$0xff]  ;;  %v11577_v48 = vld [vmem:[#allocation2 + $0xe8] sm:$0xff] }
 0x1c8   :  { %3149 = vst.msk [vmem:[#allocation2 + $0x1a0] sm:$0xff] %vm3096_vm2, %v3084_v10  ;;  %v2954_v33 = vadd.f32 %v2864_v35, %v13450_v16  ;;  %9367 = vmatmul.mubr.msk.f32.gmra.mxu1 %vm3096_vm2, %v11509_v41  ;;  %9463 = vmatpush3.msra.mxu0 %v7442_v39  ;;  %v9313_v59 = vpop.f32.mrf.mxu1  ;;  %v13456_v39 = vld [vmem:[#allocation41_spill] sm:$0xff]  ;;  %v11605_v63 = vld [vmem:[#allocation2 + $0xa0] sm:$0xff] }
 0x1c9   :  { %9408 = vmatmul.mubr.msk.f32.gmra.mxu0 %vm3096_vm2, %v3512_v27  ;;  %9369 = vmatprep.mubr.msk.f32.mxu1 %vm10063_vm1, %v13416_v22  ;;  %3152 = vst.msk [vmem:[#allocation2 + $0x1b8] sm:$0xff] %vm3096_vm2, %v3087_v56  ;;  %v3086_v7 = vmax.f32 %v3022_v11, 0.0  ;;  %v2953_v0 = vadd.f32 %v2859_v1, %v1567_v9  ;;  %v2874_v13 = vadd.f32 %v9313_v59, %v9201_v4  ;;  %v2291_v30 = vpop.f32.mrf.mxu0  ;;  %v13458_v56 = vld [vmem:[#allocation46_spill] sm:$0xff]  ;;  %v11589_v1 = vld [vmem:[#allocation2 + $0x90] sm:$0xff]  ;;  %v13459_v59 = vld [vmem:[#allocation44_spill] sm:$0xff] }
 0x1ca   :  { %v3025_v50 = vadd.f32 %v11217_v37, %v2954_v33  ;;  %9410 = vmatprep.mubr.msk.f32.mxu0 %vm10063_vm1, %v13416_v22  ;;  %9428 = vmatpush3.msra.mxu1 %v7386_v5  ;;  %v2868_v28 = vpop.f32.mrf.mxu1  ;;  %v13457_v5 = vld [vmem:[#allocation45_spill] sm:$0xff]  ;;  %v7388_v34 = vld [vmem:[%s13353_s3 + $0x40] sm:$0xff] }
 0x1cb   :  { %9429 = vmatprep.subr.mxu1 %v13416_v22  ;;  %9464 = vmatprep.subr.mxu0 %v13416_v22  ;;  %3151 = vst.msk [vmem:[#allocation2 + $0x1b0] sm:$0xff] %vm3096_vm2, %v3086_v7  ;;  %v3024_v46 = vadd.f32 %v11544_v57, %v2953_v0  ;;  %v2956_v43 = vadd.f32 %v2874_v13, %v13453_v15  ;;  %v9204_v62 = vpop.f32.mrf.mxu0  ;;  %v7465_v15 = vld [vmem:[%s13353_s3 + $0xf8] sm:$0xff] }
 0x1cc   :  { %v3089_v37 = vmax.f32 %v3025_v50, 0.0  ;;  %v2869_v44 = vadd.f32 %v2868_v28, %v2291_v30  ;;  %9370 = vmatmul.mubr.msk.f32.gmra.mxu1 %vm3096_vm2, %v11533_v19  ;;  %9465 = vmatpush3.msra.mxu0 %v7441_v12  ;;  %v9316_v25 = vpop.f32.mrf.mxu1  ;;  %v1597_v11 = vadd.f32 %v13458_v56, %v13457_v5  ;;  %v3515_v50 = vld [vmem:[#allocation2 + $0x148] sm:$0xff]  ;;  %v11611_v28 = vld [vmem:[#allocation2 + $0x158] sm:$0xff]  ;;  %v7499_v5 = vld [vmem:[%s13353_s3 + $0x130] sm:$0xff] }
 0x1cd   :  { %9411 = vmatmul.mubr.msk.f32.gmra.mxu0 %vm3096_vm2, %v11550_v8  ;;  %9372 = vmatprep.mubr.msk.f32.mxu1 %vm10063_vm1, %v13416_v22  ;;  %v3088_v45 = vmax.f32 %v3024_v46, 0.0  ;;  %v3027_v54 = vadd.f32 %v11544_v57, %v2956_v43  ;;  %v2884_v14 = vadd.f32 %v9316_v25, %v9204_v62  ;;  %v2301_v38 = vpop.f32.mrf.mxu0  ;;  %v11633_v46 = vld [vmem:[#allocation2 + $0x110] sm:$0xff]  ;;  %v7391_v62 = vld [vmem:[%s13353_s3 + $0x58] sm:$0xff]  ;;  %v3175_v25 = vld [vmem:[#allocation2 + $0x8] sm:$0xff] }
 0x1ce   :  { %3154 = vst.msk [vmem:[#allocation2 + $0x1c8] sm:$0xff] %vm3096_vm2, %v3089_v37  ;;  %v2955_v20 = vadd.f32 %v2869_v44, %v1577_v58  ;;  %9413 = vmatprep.mubr.msk.f32.mxu0 %vm10063_vm1, %v13416_v22  ;;  %9430 = vmatpush3.msra.mxu1 %v7385_v42  ;;  %v2878_v49 = vpop.f32.mrf.mxu1  ;;  %v11620_v37 = vld [vmem:[#allocation2 + $0x100] sm:$0xff]  ;;  %v7464_v43 = vld [vmem:[%s13353_s3 + $0xf0] sm:$0xff]  ;;  %v3207_v56 = vld [vmem:[#allocation2 + $0x38] sm:$0xff] }
 0x1cf   :  { %9466 = vmatprep.subr.mxu0 %v13416_v22  ;;  %9431 = vmatprep.subr.mxu1 %v13416_v22  ;;  %3153 = vst.msk [vmem:[#allocation2 + $0x1c0] sm:$0xff] %vm3096_vm2, %v3088_v45  ;;  %v3091_v3 = vmax.f32 %v3027_v54, 0.0  ;;  %v2958_v10 = vadd.f32 %v2884_v14, %v13456_v39  ;;  %v2879_v17 = vadd.f32 %v2878_v49, %v2301_v38  ;;  %v9207_v35 = vpop.f32.mrf.mxu0  ;;  %v11649_v44 = vld [vmem:[#allocation2 + $0x120] sm:$0xff]  ;;  %v11677_v45 = vld [vmem:[#allocation2 + $0x18] sm:$0xff]  ;;  %v7390_v54 = vld [vmem:[%s13353_s3 + $0x50] sm:$0xff] }
 0x1d0   :  { %v3026_v29 = vadd.f32 %v11544_v57, %v2955_v20  ;;  %9373 = vmatmul.mubr.msk.f32.gmra.mxu1 %vm3096_vm2, %v11565_v52  ;;  %9467 = vmatpush3.msra.mxu0 %v7440_v32  ;;  %v9319_v61 = vpop.f32.mrf.mxu1  ;;  %v3800_v32 = vld [vmem:[#allocation2 + $0x70] sm:$0xff]  ;;  %v11692_v20 = vld [vmem:[#allocation2 + $0x28] sm:$0xff]  ;;  %v7487_v49 = vld [vmem:[%s13353_s3 + $0x118] sm:$0xff] }
 0x1d1   :  { %9414 = vmatmul.mubr.msk.f32.gmra.mxu0 %vm3096_vm2, %v11577_v48  ;;  %9375 = vmatprep.mubr.msk.f32.mxu1 %vm10063_vm1, %v13416_v22  ;;  %3156 = vst.msk [vmem:[#allocation2 + $0x1d8] sm:$0xff] %vm3096_vm2, %v3091_v3  ;;  %v3029_v9 = vadd.f32 %v11544_v57, %v2958_v10  ;;  %v2957_v31 = vadd.f32 %v2879_v17, %v1587_v40  ;;  %v2311_v16 = vpop.f32.mrf.mxu0  ;;  %v7389_v14 = vld [vmem:[%s13353_s3 + $0x48] sm:$0xff]  ;;  %v11747_v38 = vld [vmem:[#allocation2 + $0x170] sm:$0xff]  ;;  %v4089_v39 = vld [vmem:[#allocation2 + $0x78] sm:$0xff] }
 0x1d2   :  { %v3090_v23 = vmax.f32 %v3026_v29, 0.0  ;;  %v2894_v51 = vadd.f32 %v9319_v61, %v9207_v35  ;;  %9416 = vmatprep.mubr.msk.f32.mxu0 %vm10063_vm1, %v13416_v22  ;;  %9432 = vmatpush3.msra.mxu1 %v7384_v36  ;;  %v2888_v33 = vpop.f32.mrf.mxu1  ;;  %v11733_v40 = vld [vmem:[#allocation2 + $0xa8] sm:$0xff]  ;;  %v7486_v36 = vld [vmem:[%s13353_s3 + $0x110] sm:$0xff]  ;;  %v7395_v29 = vld [vmem:[%s13353_s3 + $0x78] sm:$0xff] }
 0x1d3   :  { %9495 = vmatprep.subr.mxu1 %v13416_v22  ;;  %9530 = vmatprep.subr.mxu0 %v13416_v22  ;;  %v3093_v27 = vmax.f32 %v3029_v9, 0.0  ;;  %v3028_v4 = vadd.f32 %v11544_v57, %v2957_v31  ;;  %v2889_v7 = vadd.f32 %v2888_v33, %v2311_v16  ;;  %v11771_v3 = vld [vmem:[#allocation2 + $0x128] sm:$0xff]  ;;  %v3192_v10 = vld [vmem:[#allocation2 + $0x30] sm:$0xff]  ;;  %v11859_v35 = vld [vmem:[#allocation2 + $0x178] sm:$0xff] }
 0x1d4   :  { %3155 = vst.msk [vmem:[#allocation2 + $0x1d0] sm:$0xff] %vm3096_vm2, %v3090_v23  ;;  %v2960_v12 = vadd.f32 %v2894_v51, %v13459_v59  ;;  %9376 = vmatmul.mubr.msk.f32.gmra.mxu1 %vm3096_vm2, %v11589_v1  ;;  %v7393_v17 = vld [vmem:[%s13353_s3 + $0x68] sm:$0xff]  ;;  %v7513_v61 = vld [vmem:[%s13353_s3 + $0x158] sm:$0xff]  ;;  %v7512_v23 = vld [vmem:[%s13353_s3 + $0x150] sm:$0xff] }
 0x1d5   :  { %9417 = vmatmul.mubr.msk.f32.gmra.mxu0 %vm3096_vm2, %v3515_v50  ;;  %9378 = vmatprep.mubr.msk.f32.mxu1 %vm10063_vm1, %v13416_v22  ;;  %3158 = vst.msk [vmem:[#allocation2 + $0x1e8] sm:$0xff] %vm3096_vm2, %v3093_v27  ;;  %v3092_v0 = vmax.f32 %v3028_v4, 0.0  ;;  %v2959_v6 = vadd.f32 %v2889_v7, %v1597_v11  ;;  %v11881_v9 = vld [vmem:[#allocation2 + $0x130] sm:$0xff]  ;;  %v7500_v31 = vld [vmem:[%s13353_s3 + $0x138] sm:$0xff]  ;;  %v7510_v51 = vld [vmem:[%s13353_s3 + $0x140] sm:$0xff] }
 0x1d6   :  { %v3031_v13 = vadd.f32 %v11544_v57, %v2960_v12  ;;  %9419 = vmatprep.mubr.msk.f32.mxu0 %vm10063_vm1, %v13416_v22  ;;  %v7498_v11 = vld [vmem:[%s13353_s3 + $0x128] sm:$0xff]  ;;  %v7497_v27 = vld [vmem:[%s13353_s3 + $0x120] sm:$0xff] }
 0x1d7   :  { %3157 = vst.msk [vmem:[#allocation2 + $0x1e0] sm:$0xff] %vm3096_vm2, %v3092_v0  ;;  %v3030_v30 = vadd.f32 %v11544_v57, %v2959_v6  ;;  %v11625_v57 = vld [vmem:[#allocation2 + $0x168] sm:$0xff]  ;;  %v4382_v7 = vld [vmem:[#allocation2 + $0x180] sm:$0xff]  ;;  %v11961_v0 = vld [vmem:[#allocation2 + $0xb8] sm:$0xff] }
 0x1d8   :  { %v3095_v58 = vmax.f32 %v3031_v13, 0.0  ;;  %9379 = vmatmul.mubr.msk.f32.gmra.mxu1 %vm3096_vm2, %v11605_v63  ;;  %v11965_v13 = vld [vmem:[#allocation2 + $0x190] sm:$0xff]  ;;  %v11975_v6 = vld [vmem:[#allocation2 + $0x1a0] sm:$0xff] }
 0x1d9   :  { %9420 = vmatmul.mubr.msk.f32.gmra.mxu0 %vm3096_vm2, %v11611_v28  ;;  %9381 = vmatprep.mubr.msk.f32.mxu1 %vm10063_vm1, %v13416_v22  ;;  %v3094_v42 = vmax.f32 %v3030_v30, 0.0  ;;  %v7538_v30 = vld [vmem:[%s13353_s3 + $0x190] sm:$0xff] }
 0x1da   :  { %3160 = vst.msk [vmem:[#allocation2 + $0x1f8] sm:$0xff] %vm3096_vm2, %v3095_v58  ;;  %9422 = vmatprep.mubr.msk.f32.mxu0 %vm10063_vm1, %v13416_v22  ;;  %v7539_v58 = vld [vmem:[%s13353_s3 + $0x198] sm:$0xff] }
 0x1db   :  { %3159 = vst.msk [vmem:[#allocation2 + $0x1f0] sm:$0xff] %vm3096_vm2, %v3094_v42  ;;  %v7526_v42 = vld [vmem:[%s13353_s3 + $0x178] sm:$0xff] }
 0x1dc   :  { %9382 = vmatmul.mubr.msk.f32.gmra.mxu1 %vm3096_vm2, %v11620_v37 }
 0x1dd   :  { %9423 = vmatmul.mubr.msk.f32.gmra.mxu0 %vm3096_vm2, %v11625_v57  ;;  %9384 = vmatprep.mubr.msk.f32.mxu1 %vm10063_vm1, %v13416_v22 }
 0x1de   :  { %9468 = vmatprep.mubr.msk.f32.mxu0 %vm10063_vm1, %v13416_v22 }
 0x1e0   :  { %9385 = vmatmul.mubr.msk.f32.gmra.mxu1 %vm3096_vm2, %v11633_v46 }
 0x1e1   :  { %9469 = vmatmul.mubr.msk.f32.vlgmr.msra.gmra.mxu0 %vm3096_vm2, %v11285_v18  ;;  %9387 = vmatprep.mubr.msk.f32.mxu1 %vm10063_vm1, %v13416_v22  ;;  %v7463_v18 = vld [vmem:[%s13353_s3 + $0xe8] sm:$0xff] }
 0x1e2   :  { %9471 = vmatprep.mubr.msk.f32.mxu0 %vm10063_vm1, %v13416_v22  ;;  %9531 = vmatpush3.msra.mxu0 %v7465_v15 }
 0x1e3   :  { %9532 = vmatprep.subr.mxu0 %v13416_v22 }
 0x1e4   :  { %9388 = vmatmul.mubr.msk.f32.gmra.mxu1 %vm3096_vm2, %v11649_v44  ;;  %9533 = vmatpush3.msra.mxu0 %v7464_v43  ;;  %v7524_v43 = vld [vmem:[%s13353_s3 + $0x168] sm:$0xff] }
 0x1e5   :  { %9472 = vmatmul.mubr.msk.f32.gmra.mxu0 %vm3096_vm2, %v11303_v55  ;;  %9433 = vmatprep.mubr.msk.f32.mxu1 %vm10063_vm1, %v13416_v22  ;;  %v7462_v55 = vld [vmem:[%s13353_s3 + $0xe0] sm:$0xff] }
 0x1e6   :  { %9474 = vmatprep.mubr.msk.f32.mxu0 %vm10063_vm1, %v13416_v22  ;;  %9534 = vmatprep.subr.mxu0 %v13416_v22 }
 0x1e7   :  { %9535 = vmatpush3.msra.mxu0 %v7463_v18 }
 0x1e8   :  { %9434 = vmatmul.mubr.msk.f32.vlgmr.msra.gmra.mxu1 %vm3096_vm2, %v3175_v25  ;;  %9536 = vmatprep.subr.mxu0 %v13416_v22 }
 0x1e9   :  { %9475 = vmatmul.mubr.msk.f32.gmra.mxu0 %vm3096_vm2, %v3800_v32  ;;  %9496 = vmatpush3.msra.mxu1 %v7391_v62  ;;  %v7523_v62 = vld [vmem:[%s13353_s3 + $0x160] sm:$0xff]  ;;  %v4543_v32 = vld [vmem:[#allocation2 + $0x188] sm:$0xff] }
 0x1ea   :  { %9436 = vmatprep.mubr.msk.f32.mxu1 %vm10063_vm1, %v13416_v22  ;;  %9477 = vmatprep.mubr.msk.f32.mxu0 %vm10063_vm1, %v13416_v22 }
 0x1eb   :  { %9497 = vmatprep.subr.mxu1 %v13416_v22  ;;  %9537 = vmatpush3.msra.mxu0 %v7462_v55  ;;  %v4706_v55 = vld [vmem:[#allocation2 + $0x1b0] sm:$0xff] }
 0x1ec   :  { %9437 = vmatmul.mubr.msk.f32.gmra.mxu1 %vm3096_vm2, %v11677_v45  ;;  %9600 = vmatprep.subr.mxu0 %v13416_v22 }
 0x1ed   :  { %9478 = vmatmul.mubr.msk.f32.gmra.mxu0 %vm3096_vm2, %v11362_v53  ;;  %9439 = vmatprep.mubr.msk.f32.mxu1 %vm10063_vm1, %v13416_v22  ;;  %v11706_v53 = vld [vmem:[#allocation2 + $0x88] sm:$0xff] }
 0x1ee   :  { %9480 = vmatprep.mubr.msk.f32.mxu0 %vm10063_vm1, %v13416_v22  ;;  %9498 = vmatpush3.msra.mxu1 %v7390_v54  ;;  %v7565_v54 = vld [vmem:[%s13353_s3 + $0x1d8] sm:$0xff] }
 0x1ef   :  { %9499 = vmatprep.subr.mxu1 %v13416_v22 }
 0x1f0   :  { %9440 = vmatmul.mubr.msk.f32.gmra.mxu1 %vm3096_vm2, %v11692_v20 }
 0x1f1   :  { %9481 = vmatmul.mubr.msk.f32.gmra.mxu0 %vm3096_vm2, %v11375_v2  ;;  %9442 = vmatprep.mubr.msk.f32.mxu1 %vm10063_vm1, %v13416_v22  ;;  %v11722_v2 = vld [vmem:[#allocation2 + $0x98] sm:$0xff] }
 0x1f2   :  { %9483 = vmatprep.mubr.msk.f32.mxu0 %vm10063_vm1, %v13416_v22  ;;  %9500 = vmatpush3.msra.mxu1 %v7389_v14  ;;  %v7564_v14 = vld [vmem:[%s13353_s3 + $0x1d0] sm:$0xff] }
 0x1f3   :  { %9501 = vmatprep.subr.mxu1 %v13416_v22 }
 0x1f4   :  { %9443 = vmatmul.mubr.msk.f32.gmra.mxu1 %vm3096_vm2, %v11706_v53 }
 0x1f5   :  { %9484 = vmatmul.mubr.msk.f32.gmra.mxu0 %vm3096_vm2, %v11714_v26  ;;  %9445 = vmatprep.mubr.msk.f32.mxu1 %vm10063_vm1, %v13416_v22 }
 0x1f6   :  { %9486 = vmatprep.mubr.msk.f32.mxu0 %vm10063_vm1, %v13416_v22  ;;  %9502 = vmatpush3.msra.mxu1 %v7388_v34  ;;  %v12113_v34 = vld [vmem:[#allocation2 + $0xd0] sm:$0xff] }
 0x1f7   :  { %9565 = vmatprep.subr.mxu1 %v13416_v22 }
 0x1f8   :  { %9446 = vmatmul.mubr.msk.f32.gmra.mxu1 %vm3096_vm2, %v11722_v2 }
 0x1f9   :  { %9487 = vmatmul.mubr.msk.f32.gmra.mxu0 %vm3096_vm2, %v11436_v47  ;;  %9448 = vmatprep.mubr.msk.f32.mxu1 %vm10063_vm1, %v13416_v22  ;;  %v11743_v47 = vld [vmem:[#allocation2 + $0x108] sm:$0xff] }
 0x1fa   :  { %9489 = vmatprep.mubr.msk.f32.mxu0 %vm10063_vm1, %v13416_v22 }
 0x1fc   :  { %9449 = vmatmul.mubr.msk.f32.gmra.mxu1 %vm3096_vm2, %v11733_v40 }
 0x1fd   :  { %9490 = vmatmul.mubr.msk.f32.gmra.mxu0 %vm3096_vm2, %v11462_v60  ;;  %9451 = vmatprep.mubr.msk.f32.mxu1 %vm10063_vm1, %v13416_v22  ;;  %v11755_v60 = vld [vmem:[#allocation2 + $0x118] sm:$0xff] }
 0x1fe   :  { %9492 = vmatprep.mubr.msk.f32.mxu0 %vm10063_vm1, %v13416_v22 }
 0x200   :  { %9452 = vmatmul.mubr.msk.f32.gmra.mxu1 %vm3096_vm2, %v11743_v47 }
 0x201   :  { %9493 = vmatmul.mubr.msk.f32.gmra.mxu0 %vm3096_vm2, %v11747_v38  ;;  %9454 = vmatprep.mubr.msk.f32.mxu1 %vm10063_vm1, %v13416_v22 }
 0x202   :  { %9538 = vmatprep.mubr.msk.f32.mxu0 %vm10063_vm1, %v13416_v22 }
 0x204   :  { %9455 = vmatmul.mubr.msk.f32.gmra.mxu1 %vm3096_vm2, %v11755_v60 }
 0x205   :  { %9539 = vmatmul.mubr.msk.f32.vlgmr.msra.gmra.mxu0 %vm3096_vm2, %v11470_v21  ;;  %9457 = vmatprep.mubr.msk.f32.mxu1 %vm10063_vm1, %v13416_v22  ;;  %v7485_v21 = vld [vmem:[%s13353_s3 + $0x108] sm:$0xff] }
 0x206   :  { %9541 = vmatprep.mubr.msk.f32.mxu0 %vm10063_vm1, %v13416_v22  ;;  %9601 = vmatpush3.msra.mxu0 %v7487_v49  ;;  %v7552_v49 = vld [vmem:[%s13353_s3 + $0x1b8] sm:$0xff] }
 0x207   :  { %9602 = vmatprep.subr.mxu0 %v13416_v22 }
 0x208   :  { %9458 = vmatmul.mubr.msk.f32.gmra.mxu1 %vm3096_vm2, %v11771_v3  ;;  %9603 = vmatpush3.msra.mxu0 %v7486_v36 }
 0x209   :  { %9542 = vmatmul.mubr.msk.f32.gmra.mxu0 %vm3096_vm2, %v11493_v24  ;;  %9503 = vmatprep.mubr.msk.f32.mxu1 %vm10063_vm1, %v13416_v22  ;;  %v7484_v24 = vld [vmem:[%s13353_s3 + $0x100] sm:$0xff] }
 0x20a   :  { %9544 = vmatprep.mubr.msk.f32.mxu0 %vm10063_vm1, %v13416_v22  ;;  %9604 = vmatprep.subr.mxu0 %v13416_v22 }
 0x20b   :  { %9605 = vmatpush3.msra.mxu0 %v7485_v21  ;;  %v12132_v21 = vld [vmem:[#allocation2 + $0xe0] sm:$0xff] }
 0x20c   :  { %9504 = vmatmul.mubr.msk.f32.vlgmr.msra.gmra.mxu1 %vm3096_vm2, %v11509_v41  ;;  %9606 = vmatprep.subr.mxu0 %v13416_v22  ;;  %v7394_v41 = vld [vmem:[%s13353_s3 + $0x70] sm:$0xff] }
 0x20d   :  { %9545 = vmatmul.mubr.msk.f32.gmra.mxu0 %vm3096_vm2, %v4089_v39  ;;  %9566 = vmatpush3.msra.mxu1 %v7395_v29  ;;  %v7562_v29 = vld [vmem:[%s13353_s3 + $0x1c0] sm:$0xff] }
 0x20e   :  { %9506 = vmatprep.mubr.msk.f32.mxu1 %vm10063_vm1, %v13416_v22  ;;  %9547 = vmatprep.mubr.msk.f32.mxu0 %vm10063_vm1, %v13416_v22 }
 0x20f   :  { %9567 = vmatprep.subr.mxu1 %v13416_v22  ;;  %9607 = vmatpush3.msra.mxu0 %v7484_v24 }
 0x210   :  { %9507 = vmatmul.mubr.msk.f32.gmra.mxu1 %vm3096_vm2, %v11533_v19  ;;  %9670 = vmatprep.subr.mxu0 %v13416_v22  ;;  %v7392_v19 = vld [vmem:[%s13353_s3 + $0x60] sm:$0xff] }
 0x211   :  { %9548 = vmatmul.mubr.msk.f32.gmra.mxu0 %vm3096_vm2, %v11550_v8  ;;  %9509 = vmatprep.mubr.msk.f32.mxu1 %vm10063_vm1, %v13416_v22  ;;  %v11830_v8 = vld [vmem:[#allocation2 + $0xf8] sm:$0xff] }
 0x212   :  { %9550 = vmatprep.mubr.msk.f32.mxu0 %vm10063_vm1, %v13416_v22  ;;  %9568 = vmatpush3.msra.mxu1 %v7394_v41 }
 0x213   :  { %9569 = vmatprep.subr.mxu1 %v13416_v22 }
 0x214   :  { %9510 = vmatmul.mubr.msk.f32.gmra.mxu1 %vm3096_vm2, %v3192_v10  ;;  %v5023_v10 = vld [vmem:[#allocation2 + $0x140] sm:$0xff] }
 0x215   :  { %9551 = vmatmul.mubr.msk.f32.gmra.mxu0 %vm3096_vm2, %v11577_v48  ;;  %9512 = vmatprep.mubr.msk.f32.mxu1 %vm10063_vm1, %v13416_v22  ;;  %v11847_v48 = vld [vmem:[#allocation2 + $0xb0] sm:$0xff] }
 0x216   :  { %9553 = vmatprep.mubr.msk.f32.mxu0 %vm10063_vm1, %v13416_v22  ;;  %9570 = vmatpush3.msra.mxu1 %v7393_v17 }
 0x217   :  { %9571 = vmatprep.subr.mxu1 %v13416_v22 }
 0x218   :  { %9513 = vmatmul.mubr.msk.f32.gmra.mxu1 %vm3096_vm2, %v11589_v1 }
 0x219   :  { %9554 = vmatmul.mubr.msk.f32.gmra.mxu0 %vm3096_vm2, %v11830_v8  ;;  %9515 = vmatprep.mubr.msk.f32.mxu1 %vm10063_vm1, %v13416_v22 }
 0x21a   :  { %9556 = vmatprep.mubr.msk.f32.mxu0 %vm10063_vm1, %v13416_v22  ;;  %9572 = vmatpush3.msra.mxu1 %v7392_v19 }
 0x21b   :  { %9635 = vmatprep.subr.mxu1 %v13416_v22 }
 0x21c   :  { %9516 = vmatmul.mubr.msk.f32.gmra.mxu1 %vm3096_vm2, %v11605_v63 }
 0x21d   :  { %9557 = vmatmul.mubr.msk.f32.gmra.mxu0 %vm3096_vm2, %v11611_v28  ;;  %9518 = vmatprep.mubr.msk.f32.mxu1 %vm10063_vm1, %v13416_v22  ;;  %v11997_v28 = vld [vmem:[#allocation2 + $0x138] sm:$0xff] }
 0x21e   :  { %9559 = vmatprep.mubr.msk.f32.mxu0 %vm10063_vm1, %v13416_v22 }
 0x220   :  { %9519 = vmatmul.mubr.msk.f32.gmra.mxu1 %vm3096_vm2, %v11847_v48 }
 0x221   :  { %9560 = vmatmul.mubr.msk.f32.gmra.mxu0 %vm3096_vm2, %v11625_v57  ;;  %9521 = vmatprep.mubr.msk.f32.mxu1 %vm10063_vm1, %v13416_v22 }
 0x222   :  { %9562 = vmatprep.mubr.msk.f32.mxu0 %vm10063_vm1, %v13416_v22 }
 0x224   :  { %9522 = vmatmul.mubr.msk.f32.gmra.mxu1 %vm3096_vm2, %v11633_v46 }
 0x225   :  { %9563 = vmatmul.mubr.msk.f32.gmra.mxu0 %vm3096_vm2, %v11859_v35  ;;  %9524 = vmatprep.mubr.msk.f32.mxu1 %vm10063_vm1, %v13416_v22 }
 0x226   :  { %9608 = vmatprep.mubr.msk.f32.mxu0 %vm10063_vm1, %v13416_v22 }
 0x228   :  { %9525 = vmatmul.mubr.msk.f32.gmra.mxu1 %vm3096_vm2, %v11649_v44 }
 0x229   :  { %9609 = vmatmul.mubr.msk.f32.vlgmr.msra.gmra.mxu0 %vm3096_vm2, %v11565_v52  ;;  %9527 = vmatprep.mubr.msk.f32.mxu1 %vm10063_vm1, %v13416_v22  ;;  %v7511_v52 = vld [vmem:[%s13353_s3 + $0x148] sm:$0xff] }
 0x22a   :  { %9611 = vmatprep.mubr.msk.f32.mxu0 %vm10063_vm1, %v13416_v22  ;;  %9671 = vmatpush3.msra.mxu0 %v7513_v61  ;;  %v12168_v61 = vld [vmem:[#allocation2 + $0x150] sm:$0xff] }
 0x22b   :  { %9672 = vmatprep.subr.mxu0 %v13416_v22 }
 0x22c   :  { %9528 = vmatmul.mubr.msk.f32.gmra.mxu1 %vm3096_vm2, %v11881_v9  ;;  %9673 = vmatpush3.msra.mxu0 %v7512_v23 }
 0x22d   :  { %9612 = vmatmul.mubr.msk.f32.gmra.mxu0 %vm3096_vm2, %v11589_v1  ;;  %9573 = vmatprep.mubr.msk.f32.mxu1 %vm10063_vm1, %v13416_v22 }
 0x22e   :  { %9614 = vmatprep.mubr.msk.f32.mxu0 %vm10063_vm1, %v13416_v22  ;;  %9674 = vmatprep.subr.mxu0 %v13416_v22 }
 0x22f   :  { %9675 = vmatpush3.msra.mxu0 %v7511_v52 }
 0x230   :  { %9574 = vmatmul.mubr.msk.f32.vlgmr.msra.gmra.mxu1 %vm3096_vm2, %v11677_v45  ;;  %9676 = vmatprep.subr.mxu0 %v13416_v22  ;;  %v12093_v45 = vld [vmem:[#allocation2 + $0x198] sm:$0xff] }
 0x231   :  { %9615 = vmatmul.mubr.msk.f32.gmra.mxu0 %vm3096_vm2, %v11605_v63  ;;  %9636 = vmatpush3.msra.mxu1 %v7500_v31  ;;  %v7549_v31 = vld [vmem:[%s13353_s3 + $0x1a0] sm:$0xff] }
 0x232   :  { %9576 = vmatprep.mubr.msk.f32.mxu1 %vm10063_vm1, %v13416_v22  ;;  %9617 = vmatprep.mubr.msk.f32.mxu0 %vm10063_vm1, %v13416_v22 }
 0x233   :  { %9637 = vmatprep.subr.mxu1 %v13416_v22  ;;  %9677 = vmatpush3.msra.mxu0 %v7510_v51 }
 0x234   :  { %9577 = vmatmul.mubr.msk.f32.gmra.mxu1 %vm3096_vm2, %v11692_v20  ;;  %9740 = vmatprep.subr.mxu0 %v13416_v22  ;;  %v5020_v20 = vld [vmem:[#allocation2 + $0xc0] sm:$0xff] }
 0x235   :  { %9618 = vmatmul.mubr.msk.f32.gmra.mxu0 %vm3096_vm2, %v11620_v37  ;;  %9579 = vmatprep.mubr.msk.f32.mxu1 %vm10063_vm1, %v13416_v22  ;;  %v7525_v37 = vld [vmem:[%s13353_s3 + $0x170] sm:$0xff] }
 0x236   :  { %9620 = vmatprep.mubr.msk.f32.mxu0 %vm10063_vm1, %v13416_v22  ;;  %9638 = vmatpush3.msra.mxu1 %v7499_v5  ;;  %v12186_v5 = vld [vmem:[#allocation2 + $0x160] sm:$0xff] }
 0x237   :  { %9639 = vmatprep.subr.mxu1 %v13416_v22  ;;  %v11928_v16 = vpop.f32.mrf.mxu0 }
 0x238   :  { %9580 = vmatmul.mubr.msk.f32.gmra.mxu1 %vm3096_vm2, %v3207_v56 }
 0x239   :  { %9621 = vmatmul.mubr.msk.f32.gmra.mxu0 %vm3096_vm2, %v11633_v46  ;;  %9582 = vmatprep.mubr.msk.f32.mxu1 %vm10063_vm1, %v13416_v22  ;;  %v9330_v33 = vpop.f32.mrf.mxu0 }
 0x23a   :  { %9623 = vmatprep.mubr.msk.f32.mxu0 %vm10063_vm1, %v13416_v22  ;;  %9640 = vmatpush3.msra.mxu1 %v7498_v11 }
 0x23b   :  { %9641 = vmatprep.subr.mxu1 %v13416_v22  ;;  %v11941_v4 = vpop.f32.mrf.mxu0 }
 0x23c   :  { %9583 = vmatmul.mubr.msk.f32.gmra.mxu1 %vm3096_vm2, %v11722_v2 }
 0x23d   :  { %9624 = vmatmul.mubr.msk.f32.gmra.mxu0 %vm3096_vm2, %v11649_v44  ;;  %9585 = vmatprep.mubr.msk.f32.mxu1 %vm10063_vm1, %v13416_v22  ;;  %v9333_v59 = vpop.f32.mrf.mxu0 }
 0x23e   :  { %9626 = vmatprep.mubr.msk.f32.mxu0 %vm10063_vm1, %v13416_v22  ;;  %9642 = vmatpush3.msra.mxu1 %v7497_v27 }
 0x23f   :  { %9705 = vmatprep.subr.mxu1 %v13416_v22 }
 0x240   :  { %v11952_v12 = vpop.f32.mrf.mxu0  ;;  %9586 = vmatmul.mubr.msk.f32.gmra.mxu1 %vm3096_vm2, %v11733_v40 }
 0x241   :  { %9627 = vmatmul.mubr.msk.f32.gmra.mxu0 %vm3096_vm2, %v4382_v7  ;;  %9588 = vmatprep.mubr.msk.f32.mxu1 %vm10063_vm1, %v13416_v22 }
 0x242   :  { %v9336_v50 = vpop.f32.mrf.mxu0  ;;  %9629 = vmatprep.mubr.msk.f32.mxu0 %vm10063_vm1, %v13416_v22 }
 0x244   :  { %9589 = vmatmul.mubr.msk.f32.gmra.mxu1 %vm3096_vm2, %v11961_v0 }
 0x245   :  { %9630 = vmatmul.mubr.msk.f32.gmra.mxu0 %vm3096_vm2, %v11965_v13  ;;  %9591 = vmatprep.mubr.msk.f32.mxu1 %vm10063_vm1, %v13416_v22 }
 0x246   :  { %9632 = vmatprep.mubr.msk.f32.mxu0 %vm10063_vm1, %v13416_v22 }
 0x248   :  { %9592 = vmatmul.mubr.msk.f32.gmra.mxu1 %vm3096_vm2, %v11755_v60 }
 0x249   :  { %9633 = vmatmul.mubr.msk.f32.gmra.mxu0 %vm3096_vm2, %v11975_v6  ;;  %9594 = vmatprep.mubr.msk.f32.mxu1 %vm10063_vm1, %v13416_v22 }
 0x24a   :  { %9678 = vmatprep.mubr.msk.f32.mxu0 %vm10063_vm1, %v13416_v22 }
 0x24c   :  { %9595 = vmatmul.mubr.msk.f32.gmra.mxu1 %vm3096_vm2, %v11771_v3 }
 0x24d   :  { %9679 = vmatmul.mubr.msk.f32.vlgmr.msra.gmra.mxu0 %vm3096_vm2, %v11589_v1  ;;  %9597 = vmatprep.mubr.msk.f32.mxu1 %vm10063_vm1, %v13416_v22  ;;  %v7537_v1 = vld [vmem:[%s13353_s3 + $0x188] sm:$0xff] }
 0x24e   :  { %9681 = vmatprep.mubr.msk.f32.mxu0 %vm10063_vm1, %v13416_v22  ;;  %9741 = vmatpush3.msra.mxu0 %v7539_v58 }
 0x24f   :  { %9742 = vmatprep.subr.mxu0 %v13416_v22 }
 0x250   :  { %9598 = vmatmul.mubr.msk.f32.gmra.mxu1 %vm3096_vm2, %v11997_v28  ;;  %9743 = vmatpush3.msra.mxu0 %v7538_v30 }
 0x251   :  { %9682 = vmatmul.mubr.msk.f32.gmra.mxu0 %vm3096_vm2, %v11605_v63  ;;  %9643 = vmatprep.mubr.msk.f32.mxu1 %vm10063_vm1, %v13416_v22  ;;  %v7536_v63 = vld [vmem:[%s13353_s3 + $0x180] sm:$0xff] }
 0x252   :  { %9684 = vmatprep.mubr.msk.f32.mxu0 %vm10063_vm1, %v13416_v22  ;;  %9744 = vmatprep.subr.mxu0 %v13416_v22 }
 0x253   :  { %9745 = vmatpush3.msra.mxu0 %v7537_v1 }
 0x254   :  { %9644 = vmatmul.mubr.msk.f32.vlgmr.msra.gmra.mxu1 %vm3096_vm2, %v11706_v53  ;;  %9746 = vmatprep.subr.mxu0 %v13416_v22  ;;  %v12108_v53 = vld [vmem:[#allocation2 + $0x1a8] sm:$0xff] }
 0x255   :  { %9685 = vmatmul.mubr.msk.f32.gmra.mxu0 %vm3096_vm2, %v11847_v48  ;;  %9706 = vmatpush3.msra.mxu1 %v7526_v42 }
 0x256   :  { %9646 = vmatprep.mubr.msk.f32.mxu1 %vm10063_vm1, %v13416_v22  ;;  %9687 = vmatprep.mubr.msk.f32.mxu0 %vm10063_vm1, %v13416_v22 }
 0x257   :  { %9707 = vmatprep.subr.mxu1 %v13416_v22  ;;  %9747 = vmatpush3.msra.mxu0 %v7536_v63  ;;  %v12031_v57 = vpop.f32.mrf.mxu0 }
 0x258   :  { %9647 = vmatmul.mubr.msk.f32.gmra.mxu1 %vm3096_vm2, %v11722_v2  ;;  %9810 = vmatprep.subr.mxu0 %v13416_v22 }
 0x259   :  { %9688 = vmatmul.mubr.msk.f32.gmra.mxu0 %vm3096_vm2, %v11633_v46  ;;  %9649 = vmatprep.mubr.msk.f32.mxu1 %vm10063_vm1, %v13416_v22  ;;  %v9339_v15 = vpop.f32.mrf.mxu0 }
 0x25a   :  { %9690 = vmatprep.mubr.msk.f32.mxu0 %vm10063_vm1, %v13416_v22  ;;  %9708 = vmatpush3.msra.mxu1 %v7525_v37 }
 0x25b   :  { %9709 = vmatprep.subr.mxu1 %v13416_v22  ;;  %v12046_v18 = vpop.f32.mrf.mxu0 }
 0x25c   :  { %9650 = vmatmul.mubr.msk.f32.gmra.mxu1 %vm3096_vm2, %v11733_v40 }
 0x25d   :  { %9691 = vmatmul.mubr.msk.f32.gmra.mxu0 %vm3096_vm2, %v11649_v44  ;;  %9652 = vmatprep.mubr.msk.f32.mxu1 %vm10063_vm1, %v13416_v22  ;;  %v9342_v46 = vpop.f32.mrf.mxu0 }
 0x25e   :  { %9693 = vmatprep.mubr.msk.f32.mxu0 %vm10063_vm1, %v13416_v22  ;;  %9710 = vmatpush3.msra.mxu1 %v7524_v43 }
 0x25f   :  { %9711 = vmatprep.subr.mxu1 %v13416_v22  ;;  %v12060_v25 = vpop.f32.mrf.mxu0 }
 0x260   :  { %9653 = vmatmul.mubr.msk.f32.gmra.mxu1 %vm3096_vm2, %v11743_v47  ;;  %v7563_v47 = vld [vmem:[%s13353_s3 + $0x1c8] sm:$0xff] }
 0x261   :  { %9694 = vmatmul.mubr.msk.f32.gmra.mxu0 %vm3096_vm2, %v11881_v9  ;;  %9655 = vmatprep.mubr.msk.f32.mxu1 %vm10063_vm1, %v13416_v22  ;;  %v9345_v44 = vpop.f32.mrf.mxu0 }
 0x262   :  { %9696 = vmatprep.mubr.msk.f32.mxu0 %vm10063_vm1, %v13416_v22  ;;  %9712 = vmatpush3.msra.mxu1 %v7523_v62  ;;  %v4867_v44 = vld [vmem:[#allocation2 + $0x1b8] sm:$0xff] }
 0x263   :  { %9775 = vmatprep.subr.mxu1 %v13416_v22 }
 0x264   :  { %9656 = vmatmul.mubr.msk.f32.gmra.mxu1 %vm3096_vm2, %v11755_v60 }
 0x265   :  { %9697 = vmatmul.mubr.msk.f32.gmra.mxu0 %vm3096_vm2, %v11965_v13  ;;  %9658 = vmatprep.mubr.msk.f32.mxu1 %vm10063_vm1, %v13416_v22  ;;  %v12212_v13 = vld [vmem:[#allocation2 + $0x1d0] sm:$0xff] }
 0x266   :  { %9699 = vmatprep.mubr.msk.f32.mxu0 %vm10063_vm1, %v13416_v22 }
 0x268   :  { %9659 = vmatmul.mubr.msk.f32.gmra.mxu1 %vm3096_vm2, %v11771_v3 }
 0x269   :  { %9700 = vmatmul.mubr.msk.f32.gmra.mxu0 %vm3096_vm2, %v11975_v6  ;;  %9661 = vmatprep.mubr.msk.f32.mxu1 %vm10063_vm1, %v13416_v22 }
 0x26a   :  { %9702 = vmatprep.mubr.msk.f32.mxu0 %vm10063_vm1, %v13416_v22 }
 0x26c   :  { %9662 = vmatmul.mubr.msk.f32.gmra.mxu1 %vm3096_vm2, %v4543_v32 }
 0x26d   :  { %9703 = vmatmul.mubr.msk.f32.gmra.mxu0 %vm3096_vm2, %v4706_v55  ;;  %9664 = vmatprep.mubr.msk.f32.mxu1 %vm10063_vm1, %v13416_v22 }
 0x26e   :  { %9748 = vmatprep.mubr.msk.f32.mxu0 %vm10063_vm1, %v13416_v22 }
 0x270   :  { %9665 = vmatmul.mubr.msk.f32.gmra.mxu1 %vm3096_vm2, %v12093_v45 }
 0x271   :  { %9749 = vmatmul.mubr.msk.f32.vlgmr.msra.gmra.mxu0 %vm3096_vm2, %v5020_v20  ;;  %9667 = vmatprep.mubr.msk.f32.mxu1 %vm10063_vm1, %v13416_v22 }
 0x272   :  { %9751 = vmatprep.mubr.msk.f32.mxu0 %vm10063_vm1, %v13416_v22  ;;  %9811 = vmatpush3.msra.mxu0 %v7565_v54  ;;  %v7578_v54 = vld [vmem:[%s13353_s3 + $0x1f8] sm:$0xff] }
 0x273   :  { %9812 = vmatprep.subr.mxu0 %v13416_v22 }
 0x274   :  { %9668 = vmatmul.mubr.msk.f32.gmra.mxu1 %vm3096_vm2, %v12108_v53  ;;  %9813 = vmatpush3.msra.mxu0 %v7564_v14  ;;  %v5181_v14 = vld [vmem:[#allocation2 + $0xc8] sm:$0xff] }
 0x275   :  { %9752 = vmatmul.mubr.msk.f32.gmra.mxu0 %vm3096_vm2, %v12113_v34  ;;  %9713 = vmatprep.mubr.msk.f32.mxu1 %vm10063_vm1, %v13416_v22 }
 0x276   :  { %9754 = vmatprep.mubr.msk.f32.mxu0 %vm10063_vm1, %v13416_v22  ;;  %9814 = vmatprep.subr.mxu0 %v13416_v22 }
 0x277   :  { %9815 = vmatpush3.msra.mxu0 %v7563_v47  ;;  %v12128_v36 = vpop.f32.mrf.mxu0 }
 0x278   :  { %9714 = vmatmul.mubr.msk.f32.vlgmr.msra.gmra.mxu1 %vm3096_vm2, %v11722_v2  ;;  %9816 = vmatprep.subr.mxu0 %v13416_v22  ;;  %v7551_v2 = vld [vmem:[%s13353_s3 + $0x1b0] sm:$0xff] }
 0x279   :  { %9755 = vmatmul.mubr.msk.f32.gmra.mxu0 %vm3096_vm2, %v12132_v21  ;;  %9776 = vmatpush3.msra.mxu1 %v7552_v49  ;;  %v9348_v39 = vpop.f32.mrf.mxu0 }
 0x27a   :  { %9716 = vmatprep.mubr.msk.f32.mxu1 %vm10063_vm1, %v13416_v22  ;;  %9757 = vmatprep.mubr.msk.f32.mxu0 %vm10063_vm1, %v13416_v22 }
 0x27b   :  { %9777 = vmatprep.subr.mxu1 %v13416_v22  ;;  %9817 = vmatpush3.msra.mxu0 %v7562_v29  ;;  %v12148_v24 = vpop.f32.mrf.mxu1 }
 0x27c   :  { %v12150_v41 = vpop.f32.mrf.mxu0  ;;  %9717 = vmatmul.mubr.msk.f32.gmra.mxu1 %vm3096_vm2, %v11733_v40  ;;  %9880 = vmatprep.subr.mxu0 %v13416_v22  ;;  %v7550_v40 = vld [vmem:[%s13353_s3 + $0x1a8] sm:$0xff] }
 0x27d   :  { %9758 = vmatmul.mubr.msk.f32.gmra.mxu0 %vm3096_vm2, %v5023_v10  ;;  %9719 = vmatprep.mubr.msk.f32.mxu1 %vm10063_vm1, %v13416_v22  ;;  %v9351_v17 = vpop.f32.mrf.mxu1 }
 0x27e   :  { %v9400_v19 = vpop.f32.mrf.mxu0  ;;  %9760 = vmatprep.mubr.msk.f32.mxu0 %vm10063_vm1, %v13416_v22  ;;  %9778 = vmatpush3.msra.mxu1 %v7551_v2  ;;  %v12296_v17 = vld [vmem:[#allocation2 + $0xe8] sm:$0xff] }
 0x27f   :  { %9779 = vmatprep.subr.mxu1 %v13416_v22 }
 0x280   :  { %v12164_v48 = vpop.f32.mrf.mxu1  ;;  %9720 = vmatmul.mubr.msk.f32.gmra.mxu1 %vm3096_vm2, %v11961_v0 }
 0x281   :  { %v12170_v23 = vpop.f32.mrf.mxu0  ;;  %9761 = vmatmul.mubr.msk.f32.gmra.mxu0 %vm3096_vm2, %v12168_v61  ;;  %9722 = vmatprep.mubr.msk.f32.mxu1 %vm10063_vm1, %v13416_v22 }
 0x282   :  { %v9354_v9 = vpop.f32.mrf.mxu1  ;;  %9763 = vmatprep.mubr.msk.f32.mxu0 %vm10063_vm1, %v13416_v22  ;;  %9780 = vmatpush3.msra.mxu1 %v7550_v40 }
 0x283   :  { %v9403_v52 = vpop.f32.mrf.mxu0  ;;  %9781 = vmatprep.subr.mxu1 %v13416_v22 }
 0x284   :  { %v12182_v51 = vpop.f32.mrf.mxu1  ;;  %9723 = vmatmul.mubr.msk.f32.gmra.mxu1 %vm3096_vm2, %v11755_v60  ;;  %v5026_v60 = vld [vmem:[#allocation2 + $0x1c0] sm:$0xff] }
 0x285   :  { %v12188_v56 = vpop.f32.mrf.mxu0  ;;  %9764 = vmatmul.mubr.msk.f32.gmra.mxu0 %vm3096_vm2, %v12186_v5  ;;  %9725 = vmatprep.mubr.msk.f32.mxu1 %vm10063_vm1, %v13416_v22 }
 0x286   :  { %v9365_v11 = vpop.f32.mrf.mxu1  ;;  %9766 = vmatprep.mubr.msk.f32.mxu0 %vm10063_vm1, %v13416_v22  ;;  %9782 = vmatpush3.msra.mxu1 %v7549_v31  ;;  %v5184_v31 = vld [vmem:[#allocation2 + $0x148] sm:$0xff] }
 0x287   :  { %v9406_v33 = vpop.f32.mrf.mxu0  ;;  %9845 = vmatprep.subr.mxu1 %v13416_v22 }
 0x288   :  { %v12197_v27 = vpop.f32.mrf.mxu1  ;;  %9726 = vmatmul.mubr.msk.f32.gmra.mxu1 %vm3096_vm2, %v11771_v3 }
 0x289   :  { %v12201_v59 = vpop.f32.mrf.mxu0  ;;  %9767 = vmatmul.mubr.msk.f32.gmra.mxu0 %vm3096_vm2, %v5026_v60  ;;  %9728 = vmatprep.mubr.msk.f32.mxu1 %vm10063_vm1, %v13416_v22 }
 0x28a   :  { %v9368_v7 = vpop.f32.mrf.mxu1  ;;  %9769 = vmatprep.mubr.msk.f32.mxu0 %vm10063_vm1, %v13416_v22 }
 0x28b   :  { %v9409_v50 = vpop.f32.mrf.mxu0 }
 0x28c   :  { %v12208_v0 = vpop.f32.mrf.mxu1  ;;  %9729 = vmatmul.mubr.msk.f32.gmra.mxu1 %vm3096_vm2, %v11997_v28  ;;  %v12224_v28 = vld [vmem:[#allocation2 + $0x1e0] sm:$0xff]  ;;  %v12331_v50 = vld [vmem:[#allocation2 + $0x158] sm:$0xff] }
 0x28d   :  { %v12214_v3 = vpop.f32.mrf.mxu0  ;;  %9770 = vmatmul.mubr.msk.f32.gmra.mxu0 %vm3096_vm2, %v12212_v13  ;;  %9731 = vmatprep.mubr.msk.f32.mxu1 %vm10063_vm1, %v13416_v22 }
 0x28e   :  { %v9371_v6 = vpop.f32.mrf.mxu1  ;;  %9772 = vmatprep.mubr.msk.f32.mxu0 %vm10063_vm1, %v13416_v22 }
 0x28f   :  { %v9412_v58 = vpop.f32.mrf.mxu0 }
 0x290   :  { %v3479_v30 = vpop.f32.mrf.mxu1  ;;  %9732 = vmatmul.mubr.msk.f32.gmra.mxu1 %vm3096_vm2, %v12093_v45 }
 0x291   :  { %v12227_v1 = vadd.f32 %v3479_v30, %v12031_v57  ;;  %v12229_v42 = vpop.f32.mrf.mxu0  ;;  %9773 = vmatmul.mubr.msk.f32.gmra.mxu0 %vm3096_vm2, %v12224_v28  ;;  %9734 = vmatprep.mubr.msk.f32.mxu1 %vm10063_vm1, %v13416_v22 }
 0x292   :  { %v9374_v63 = vpop.f32.mrf.mxu1  ;;  %9818 = vmatprep.mubr.msk.f32.mxu0 %vm10063_vm1, %v13416_v22 }
 0x293   :  { %v9415_v37 = vpop.f32.mrf.mxu0  ;;  %v12347_v63 = vld [vmem:[#allocation2 + $0x168] sm:$0xff] }
 0x294   :  { %v3484_v15 = vpop.f32.mrf.mxu1  ;;  %9735 = vmatmul.mubr.msk.f32.gmra.mxu1 %vm3096_vm2, %v12108_v53 }
 0x295   :  { %v12240_v57 = vadd.f32 %v3484_v15, %v12046_v18  ;;  %v12242_v43 = vpop.f32.mrf.mxu0  ;;  %9819 = vmatmul.mubr.msk.f32.vlgmr.msra.gmra.mxu0 %vm3096_vm2, %v12113_v34  ;;  %9737 = vmatprep.mubr.msk.f32.mxu1 %vm10063_vm1, %v13416_v22 }
 0x296   :  { %v9377_v46 = vpop.f32.mrf.mxu1  ;;  %9821 = vmatprep.mubr.msk.f32.mxu0 %vm10063_vm1, %v13416_v22 }
 0x297   :  { %v9418_v62 = vpop.f32.mrf.mxu0 }
 0x298   :  { %v3489_v32 = vpop.f32.mrf.mxu1  ;;  %9738 = vmatmul.mubr.msk.f32.gmra.mxu1 %vm3096_vm2, %v4867_v44  ;;  %v5187_v62 = vld [vmem:[#allocation2 + $0x1c8] sm:$0xff] }
 0x299   :  { %v12252_v18 = vadd.f32 %v3489_v32, %v12060_v25  ;;  %v12254_v55 = vpop.f32.mrf.mxu0  ;;  %9822 = vmatmul.mubr.msk.f32.gmra.mxu0 %vm3096_vm2, %v12132_v21  ;;  %9783 = vmatprep.mubr.msk.f32.mxu1 %vm10063_vm1, %v13416_v22  ;;  %v12277_v21 = vld [vmem:[#allocation2 + $0xd8] sm:$0xff]  ;;  %v5350_v32 = vld [vmem:[#allocation2 + $0x1f0] sm:$0xff] }
 0x29a   :  { %v9380_v45 = vpop.f32.mrf.mxu1  ;;  %9824 = vmatprep.mubr.msk.f32.mxu0 %vm10063_vm1, %v13416_v22 }
 0x29b   :  { %v9421_v20 = vpop.f32.mrf.mxu0 }
 0x29c   :  { %v3494_v25 = vpop.f32.mrf.mxu1  ;;  %9784 = vmatmul.mubr.msk.f32.vlgmr.msra.gmra.mxu1 %vm3096_vm2, %v5181_v14  ;;  %v5188_v20 = vld [vmem:[#allocation2 + $0x1d8] sm:$0xff] }
 0x29d   :  { %v12267_v53 = vadd.f32 %v3494_v25, %v12128_v36  ;;  %v12269_v34 = vpop.f32.mrf.mxu0  ;;  %9825 = vmatmul.mubr.msk.f32.gmra.mxu0 %vm3096_vm2, %v11714_v26  ;;  %9846 = vmatpush3.msra.mxu1 %v7578_v54  ;;  %v7577_v36 = vld [vmem:[%s13353_s3 + $0x1f0] sm:$0xff] }
 0x29e   :  { %v9383_v47 = vpop.f32.mrf.mxu1  ;;  %9786 = vmatprep.mubr.msk.f32.mxu1 %vm10063_vm1, %v13416_v22  ;;  %9827 = vmatprep.mubr.msk.f32.mxu0 %vm10063_vm1, %v13416_v22 }
 0x29f   :  { %v9424_v49 = vpop.f32.mrf.mxu0  ;;  %9847 = vmatprep.subr.mxu1 %v13416_v22 }
 0x2a0   :  { %v3499_v29 = vpop.f32.mrf.mxu1  ;;  %9787 = vmatmul.mubr.msk.f32.gmra.mxu1 %vm3096_vm2, %v12277_v21 }
 0x2a1   :  { %v12286_v26 = vadd.f32 %v3499_v29, %v12148_v24  ;;  %v12288_v39 = vpop.f32.mrf.mxu0  ;;  %9828 = vmatmul.mubr.msk.f32.gmra.mxu0 %vm3096_vm2, %v12168_v61  ;;  %9789 = vmatprep.mubr.msk.f32.mxu1 %vm10063_vm1, %v13416_v22  ;;  %v7576_v24 = vld [vmem:[%s13353_s3 + $0x1e8] sm:$0xff] }
 0x2a2   :  { %v9386_v2 = vpop.f32.mrf.mxu1  ;;  %9830 = vmatprep.mubr.msk.f32.mxu0 %vm10063_vm1, %v13416_v22  ;;  %9848 = vmatpush3.msra.mxu1 %v7577_v36  ;;  %v5189_v36 = vld [vmem:[#allocation2 + $0x1e8] sm:$0xff] }
 0x2a3   :  { %v9470_v10 = vpop.f32.mrf.mxu0  ;;  %9849 = vmatprep.subr.mxu1 %v13416_v22 }
 0x2a4   :  { %v3504_v19 = vpop.f32.mrf.mxu1  ;;  %9790 = vmatmul.mubr.msk.f32.gmra.mxu1 %vm3096_vm2, %v12296_v17 }
 0x2a5   :  { %v12305_v40 = vadd.f32 %v3504_v19, %v12164_v48  ;;  %v12307_v61 = vpop.f32.mrf.mxu0  ;;  %9831 = vmatmul.mubr.msk.f32.gmra.mxu0 %vm3096_vm2, %v12186_v5  ;;  %9792 = vmatprep.mubr.msk.f32.mxu1 %vm10063_vm1, %v13416_v22  ;;  %v7575_v48 = vld [vmem:[%s13353_s3 + $0x1e0] sm:$0xff] }
 0x2a6   :  { %v9389_v9 = vpop.f32.mrf.mxu1  ;;  %9833 = vmatprep.mubr.msk.f32.mxu0 %vm10063_vm1, %v13416_v22  ;;  %9850 = vmatpush3.msra.mxu1 %v7576_v24 }
 0x2a7   :  { %v9473_v52 = vpop.f32.mrf.mxu0  ;;  %9851 = vmatprep.subr.mxu1 %v13416_v22 }
 0x2a8   :  { %v3753_v11 = vpop.f32.mrf.mxu1  ;;  %9793 = vmatmul.mubr.msk.f32.gmra.mxu1 %vm3096_vm2, %v5184_v31 }
 0x2a9   :  { %v12321_v5 = vadd.f32 %v3753_v11, %v12150_v41  ;;  %v12323_v33 = vpop.f32.mrf.mxu0  ;;  %9834 = vmatmul.mubr.msk.f32.gmra.mxu0 %vm3096_vm2, %v11747_v38  ;;  %9795 = vmatprep.mubr.msk.f32.mxu1 %vm10063_vm1, %v13416_v22 }
 0x2aa   :  { %v9435_v60 = vpop.f32.mrf.mxu1  ;;  %9836 = vmatprep.mubr.msk.f32.mxu0 %vm10063_vm1, %v13416_v22  ;;  %9852 = vmatpush3.msra.mxu1 %v7575_v48 }
 0x2ab   :  { %v9476_v7 = vpop.f32.mrf.mxu0  ;;  %9899 = vmatprep.subr.mxu1 %v13416_v22 }
 0x2ac   :  { %v3758_v41 = vpop.f32.mrf.mxu1  ;;  %9796 = vmatmul.mubr.msk.f32.gmra.mxu1 %vm3096_vm2, %v12331_v50 }
 0x2ad   :  { %v12337_v6 = vadd.f32 %v3758_v41, %v12170_v23  ;;  %v12339_v38 = vpop.f32.mrf.mxu0  ;;  %9837 = vmatmul.mubr.msk.f32.gmra.mxu0 %vm3096_vm2, %v12212_v13  ;;  %9798 = vmatprep.mubr.msk.f32.mxu1 %vm10063_vm1, %v13416_v22 }
 0x2ae   :  { %v9438_v58 = vpop.f32.mrf.mxu1  ;;  %9839 = vmatprep.mubr.msk.f32.mxu0 %vm10063_vm1, %v13416_v22 }
 0x2af   :  { %v9479_v30 = vpop.f32.mrf.mxu0 }
 0x2b0   :  { %v3763_v37 = vpop.f32.mrf.mxu1  ;;  %9799 = vmatmul.mubr.msk.f32.gmra.mxu1 %vm3096_vm2, %v12347_v63 }
 0x2b1   :  { %v12352_v23 = vadd.f32 %v3763_v37, %v12188_v56  ;;  %v12354_v15 = vpop.f32.mrf.mxu0  ;;  %9840 = vmatmul.mubr.msk.f32.gmra.mxu0 %vm3096_vm2, %v12224_v28  ;;  %9801 = vmatprep.mubr.msk.f32.mxu1 %vm10063_vm1, %v13416_v22 }
 0x2b2   :  { %v9441_v13 = vpop.f32.mrf.mxu1  ;;  %9842 = vmatprep.mubr.msk.f32.mxu0 %vm10063_vm1, %v13416_v22 }
 0x2b3   :  { %v9482_v46 = vpop.f32.mrf.mxu0 }
 0x2b4   :  { %v3768_v44 = vpop.f32.mrf.mxu1  ;;  %9802 = vmatmul.mubr.msk.f32.gmra.mxu1 %vm3096_vm2, %v5187_v62 }
 0x2b5   :  { %v12364_v56 = vadd.f32 %v3768_v44, %v12201_v59  ;;  %v12366_v45 = vpop.f32.mrf.mxu0  ;;  %9843 = vmatmul.mubr.msk.f32.gmra.mxu0 %vm3096_vm2, %v5350_v32  ;;  %9804 = vmatprep.mubr.msk.f32.mxu1 %vm10063_vm1, %v13416_v22 }
 0x2b6   :  { %v9444_v28 = vpop.f32.mrf.mxu1  ;;  %9896 = vmatprep.mubr.msk.f32.mxu0 %vm10063_vm1, %v13416_v22 }
 0x2b7   :  { %v9485_v54 = vpop.f32.mrf.mxu0 }
 0x2b8   :  { %v3773_v14 = vpop.f32.mrf.mxu1  ;;  %9805 = vmatmul.mubr.msk.f32.gmra.mxu1 %vm3096_vm2, %v5188_v20 }
 0x2b9   :  { %v12375_v25 = vadd.f32 %v3773_v14, %v12214_v3  ;;  %v12377_v59 = vpop.f32.mrf.mxu0  ;;  %9807 = vmatprep.mubr.msk.f32.mxu1 %vm10063_vm1, %v13416_v22 }
 0x2ba   :  { %v9447_v47 = vpop.f32.mrf.mxu1 }
 0x2bb   :  { %v9488_v49 = vpop.f32.mrf.mxu0 }
 0x2bc   :  { %v3778_v29 = vpop.f32.mrf.mxu1  ;;  %9808 = vmatmul.mubr.msk.f32.gmra.mxu1 %vm3096_vm2, %v5189_v36 }
 0x2bd   :  { %v12383_v2 = vadd.f32 %v3778_v29, %v12229_v42  ;;  %v12385_v10 = vpop.f32.mrf.mxu0  ;;  %9853 = vmatprep.mubr.msk.f32.mxu1 %vm10063_vm1, %v13416_v22 }
 0x2be   :  { %v9450_v3 = vpop.f32.mrf.mxu1 }
 0x2bf   :  { %v9491_v24 = vpop.f32.mrf.mxu0 }
 0x2c0   :  { %v3783_v19 = vpop.f32.mrf.mxu1  ;;  %9854 = vmatmul.mubr.msk.f32.vlgmr.msra.gmra.mxu1 %vm3096_vm2, %v12277_v21 }
 0x2c1   :  { %v12392_v9 = vadd.f32 %v3783_v19, %v12242_v43  ;;  %v12394_v52 = vpop.f32.mrf.mxu0  ;;  %9856 = vmatprep.mubr.msk.f32.mxu1 %vm10063_vm1, %v13416_v22  ;;  %v5511_v19 = vld [vmem:[#allocation2 + $0x1f8] sm:$0xff] }
 0x2c2   :  { %v9453_v42 = vpop.f32.mrf.mxu1 }
 0x2c3   :  { %v9494_v31 = vpop.f32.mrf.mxu0 }
 0x2c4   :  { %v3788_v48 = vpop.f32.mrf.mxu1  ;;  %9857 = vmatmul.mubr.msk.f32.gmra.mxu1 %vm3096_vm2, %v12296_v17 }
 0x2c5   :  { %v12401_v11 = vadd.f32 %v3788_v48, %v12254_v55  ;;  %v12403_v60 = vpop.f32.mrf.mxu0  ;;  %9859 = vmatprep.mubr.msk.f32.mxu1 %vm10063_vm1, %v13416_v22 }
 0x2c6   :  { %v9456_v43 = vpop.f32.mrf.mxu1 }
 0x2c7   :  { %v9540_v21 = vpop.f32.mrf.mxu0 }
 0x2c8   :  { %v3793_v7 = vpop.f32.mrf.mxu1  ;;  %9860 = vmatmul.mubr.msk.f32.gmra.mxu1 %vm3096_vm2, %v11830_v8 }
 0x2c9   :  { %v12410_v41 = vadd.f32 %v3793_v7, %v12269_v34  ;;  %v12412_v58 = vpop.f32.mrf.mxu0  ;;  %9862 = vmatprep.mubr.msk.f32.mxu1 %vm10063_vm1, %v13416_v22 }
 0x2ca   :  { %v9459_v55 = vpop.f32.mrf.mxu1 }
 0x2cb   :  { %v9543_v17 = vpop.f32.mrf.mxu0 }
 0x2cc   :  { %v4042_v30 = vpop.f32.mrf.mxu1  ;;  %9863 = vmatmul.mubr.msk.f32.gmra.mxu1 %vm3096_vm2, %v12331_v50 }
 0x2cd   :  { %v12419_v37 = vadd.f32 %v4042_v30, %v12288_v39  ;;  %v12421_v13 = vpop.f32.mrf.mxu0  ;;  %9865 = vmatprep.mubr.msk.f32.mxu1 %vm10063_vm1, %v13416_v22  ;;  %v3465_v30 = vadd.f32 %v12182_v51, %v11928_v16 }
 0x2ce   :  { %v9505_v8 = vpop.f32.mrf.mxu1 }
 0x2cf   :  { %v9546_v34 = vpop.f32.mrf.mxu0 }
 0x2d0   :  { %v4047_v46 = vpop.f32.mrf.mxu1  ;;  %9866 = vmatmul.mubr.msk.f32.gmra.mxu1 %vm3096_vm2, %v12347_v63 }
 0x2d1   :  { %v12428_v62 = vadd.f32 %v4047_v46, %v12307_v61  ;;  %v12430_v44 = vpop.f32.mrf.mxu0  ;;  %9868 = vmatprep.mubr.msk.f32.mxu1 %vm10063_vm1, %v13416_v22 }
 0x2d2   :  { %v9508_v39 = vpop.f32.mrf.mxu1 }
 0x2d3   :  { %v9549_v50 = vpop.f32.mrf.mxu0 }
 0x2d4   :  { %v4052_v32 = vpop.f32.mrf.mxu1  ;;  %9869 = vmatmul.mubr.msk.f32.gmra.mxu1 %vm3096_vm2, %v11859_v35 }
 0x2d5   :  { %v12437_v28 = vadd.f32 %v4052_v32, %v12323_v33  ;;  %v12439_v54 = vpop.f32.mrf.mxu0  ;;  %9871 = vmatprep.mubr.msk.f32.mxu1 %vm10063_vm1, %v13416_v22 }
 0x2d6   :  { %v9511_v61 = vpop.f32.mrf.mxu1 }
 0x2d7   :  { %v9552_v63 = vpop.f32.mrf.mxu0 }
 0x2d8   :  { %v4057_v14 = vpop.f32.mrf.mxu1  ;;  %9872 = vmatmul.mubr.msk.f32.gmra.mxu1 %vm3096_vm2, %v5188_v20 }
 0x2d9   :  { %v12445_v47 = vadd.f32 %v4057_v14, %v12339_v38  ;;  %v12447_v49 = vpop.f32.mrf.mxu0  ;;  %9874 = vmatprep.mubr.msk.f32.mxu1 %vm10063_vm1, %v13416_v22 }
 0x2da   :  { %v9514_v35 = vpop.f32.mrf.mxu1 }
 0x2db   :  { %v9555_v33 = vpop.f32.mrf.mxu0 }
 0x2dc   :  { %v4062_v29 = vpop.f32.mrf.mxu1  ;;  %9875 = vmatmul.mubr.msk.f32.gmra.mxu1 %vm3096_vm2, %v5189_v36 }
 0x2dd   :  { %v12453_v3 = vadd.f32 %v4062_v29, %v12354_v15  ;;  %v12455_v24 = vpop.f32.mrf.mxu0  ;;  %9877 = vmatprep.mubr.msk.f32.mxu1 %vm10063_vm1, %v13416_v22 }
 0x2de   :  { %v9517_v38 = vpop.f32.mrf.mxu1 }
 0x2df   :  { %v9558_v20 = vpop.f32.mrf.mxu0 }
 0x2e0   :  { %v4067_v42 = vpop.f32.mrf.mxu1  ;;  %9878 = vmatmul.mubr.msk.f32.gmra.mxu1 %vm3096_vm2, %v5511_v19 }
 0x2e1   :  { %v12461_v31 = vadd.f32 %v4067_v42, %v12366_v45  ;;  %v12463_v48 = vpop.f32.mrf.mxu0  ;;  %9915 = vmatprep.mubr.msk.f32.mxu1 %vm10063_vm1, %v13416_v22 }
 0x2e2   :  { %v9520_v15 = vpop.f32.mrf.mxu1 }
 0x2e3   :  { %v9561_v36 = vpop.f32.mrf.mxu0 }
 0x2e4   :  { %v4072_v43 = vpop.f32.mrf.mxu1 }
 0x2e5   :  { %v12468_v21 = vadd.f32 %v4072_v43, %v12377_v59  ;;  %v12470_v7 = vpop.f32.mrf.mxu0  ;;  %v3470_v59 = vadd.f32 %v12197_v27, %v11941_v4 }
 0x2e6   :  { %v9523_v55 = vpop.f32.mrf.mxu1 }
 0x2e7   :  { %v9564_v17 = vpop.f32.mrf.mxu0 }
 0x2e8   :  { %v4077_v45 = vpop.f32.mrf.mxu1 }
 0x2e9   :  { %v12475_v8 = vadd.f32 %v4077_v45, %v12385_v10  ;;  %v4483_v34 = vpop.f32.mrf.mxu0  ;;  %v3475_v10 = vadd.f32 %v12208_v0, %v11952_v12 }
 0x2ea   :  { %v12477_v46 = vadd.f32 %v4483_v34, %v3465_v30  ;;  %v9526_v39 = vpop.f32.mrf.mxu1 }
 0x2eb   :  { %v9610_v50 = vpop.f32.mrf.mxu0 }
 0x2ec   :  { %v4082_v32 = vpop.f32.mrf.mxu1 }
 0x2ed   :  { %v12482_v61 = vadd.f32 %v4082_v32, %v12394_v52  ;;  %v4488_v63 = vpop.f32.mrf.mxu0 }
 0x2ee   :  { %v12484_v14 = vadd.f32 %v4488_v63, %v3470_v59  ;;  %v9529_v16 = vpop.f32.mrf.mxu1  ;;  %v5732_v63 = vld [vmem:[%s13355_s5 + $0x38] sm:$0xff] }
 0x2ef   :  { %v9613_v51 = vpop.f32.mrf.mxu0  ;;  %9900 = vmatpush3.msra.mxu1 %v5732_v63 }
 0x2f0   :  { %v4331_v35 = vpop.f32.mrf.mxu1  ;;  %9901 = vmatprep.subr.mxu1 %v13416_v22 }
 0x2f1   :  { %v12489_v33 = vadd.f32 %v4331_v35, %v12403_v60  ;;  %v4493_v29 = vpop.f32.mrf.mxu0 }
 0x2f2   :  { %v12491_v38 = vadd.f32 %v4493_v29, %v3475_v10  ;;  %v9575_v4 = vpop.f32.mrf.mxu1 }
 0x2f3   :  { %v9616_v27 = vpop.f32.mrf.mxu0 }
 0x2f4   :  { %v4336_v20 = vpop.f32.mrf.mxu1 }
 0x2f5   :  { %v12494_v52 = vadd.f32 %v4336_v20, %v12412_v58  ;;  %v4498_v19 = vpop.f32.mrf.mxu0 }
 0x2f6   :  { %v12497_v42 = vadd.f32 %v4498_v19, %v12227_v1  ;;  %v9578_v15 = vpop.f32.mrf.mxu1 }
 0x2f7   :  { %v9619_v36 = vpop.f32.mrf.mxu0 }
 0x2f8   :  { %v4341_v12 = vpop.f32.mrf.mxu1 }
 0x2f9   :  { %v12500_v0 = vadd.f32 %v4341_v12, %v12421_v13  ;;  %v4503_v60 = vpop.f32.mrf.mxu0  ;;  %v7612_v13 = vld [vmem:[%s13355_s5 + $0xf8] sm:$0xff]  ;;  %v7611_v12 = vld [vmem:[%s13355_s5 + $0xf0] sm:$0xff] }
 0x2fa   :  { %v12503_v43 = vadd.f32 %v4503_v60, %v12240_v57  ;;  %v9581_v55 = vpop.f32.mrf.mxu1  ;;  %9881 = vmatpush3.msra.mxu0 %v7612_v13 }
 0x2fb   :  { %v9622_v17 = vpop.f32.mrf.mxu0  ;;  %9882 = vmatprep.subr.mxu0 %v13416_v22 }
 0x2fc   :  { %v4346_v30 = vpop.f32.mrf.mxu1  ;;  %9883 = vmatpush3.msra.mxu0 %v7611_v12  ;;  %v5727_v17 = vld [vmem:[%s13355_s5 + $0x10] sm:$0xff] }
 0x2fd   :  { %v12506_v58 = vadd.f32 %v4346_v30, %v12430_v44  ;;  %v4508_v45 = vpop.f32.mrf.mxu0  ;;  %9884 = vmatprep.subr.mxu0 %v13416_v22 }
 0x2fe   :  { %v12509_v1 = vadd.f32 %v4508_v45, %v12252_v18  ;;  %v9584_v34 = vpop.f32.mrf.mxu1 }
 0x2ff   :  { %v9625_v39 = vpop.f32.mrf.mxu0 }
 0x300   :  { %v4351_v50 = vpop.f32.mrf.mxu1  ;;  %v5726_v39 = vld [vmem:[%s13355_s5 + $0x8] sm:$0xff] }
 0x301   :  { %v12515_v57 = vadd.f32 %v4351_v50, %v12439_v54  ;;  %v4513_v59 = vpop.f32.mrf.mxu0 }
 0x302   :  { %v12518_v32 = vadd.f32 %v4513_v59, %v12267_v53  ;;  %v9587_v44 = vpop.f32.mrf.mxu1  ;;  %v5731_v53 = vld [vmem:[%s13355_s5 + $0x30] sm:$0xff]  ;;  %v5725_v59 = vld [vmem:[%s13355_s5] sm:$0xff] }
 0x303   :  { %v9628_v18 = vpop.f32.mrf.mxu0  ;;  %9902 = vmatpush3.msra.mxu1 %v5731_v53 }
 0x304   :  { %v4356_v16 = vpop.f32.mrf.mxu1  ;;  %9903 = vmatprep.subr.mxu1 %v13416_v22 }
 0x305   :  { %v12525_v51 = vadd.f32 %v4356_v16, %v12447_v49  ;;  %v4518_v54 = vpop.f32.mrf.mxu0  ;;  %v5730_v49 = vld [vmem:[%s13355_s5 + $0x28] sm:$0xff] }
 0x306   :  { %v12532_v10 = vadd.f32 %v4518_v54, %v12286_v26  ;;  %v9590_v35 = vpop.f32.mrf.mxu1  ;;  %9904 = vmatpush3.msra.mxu1 %v5730_v49  ;;  %v5729_v26 = vld [vmem:[%s13355_s5 + $0x20] sm:$0xff]  ;;  %v7608_v49 = vld [vmem:[%s13355_s5 + $0xd8] sm:$0xff] }
 0x307   :  { %v9631_v29 = vpop.f32.mrf.mxu0  ;;  %9905 = vmatprep.subr.mxu1 %v13416_v22 }
 0x308   :  { %v4361_v4 = vpop.f32.mrf.mxu1  ;;  %9906 = vmatpush3.msra.mxu1 %v5729_v26 }
 0x309   :  { %v12539_v27 = vadd.f32 %v4361_v4, %v12455_v24  ;;  %v4523_v20 = vpop.f32.mrf.mxu0  ;;  %9907 = vmatprep.subr.mxu1 %v13416_v22  ;;  %v5728_v24 = vld [vmem:[%s13355_s5 + $0x18] sm:$0xff] }
 0x30a   :  { %v12546_v19 = vadd.f32 %v4523_v20, %v12305_v40  ;;  %v9593_v15 = vpop.f32.mrf.mxu1  ;;  %9908 = vmatpush3.msra.mxu1 %v5728_v24 }
 0x30b   :  { %v9634_v36 = vpop.f32.mrf.mxu0  ;;  %9909 = vmatprep.subr.mxu1 %v13416_v22 }
 0x30c   :  { %v4366_v60 = vpop.f32.mrf.mxu1  ;;  %9910 = vmatpush3.msra.mxu1 %v5727_v17 }
 0x30d   :  { %v12556_v55 = vadd.f32 %v4366_v60, %v12463_v48  ;;  %v4805_v40 = vpop.f32.mrf.mxu0  ;;  %v7610_v48 = vld [vmem:[%s13355_s5 + $0xe8] sm:$0xff]  ;;  %9911 = vmatprep.subr.mxu1 %v13416_v22 }
 0x30e   :  { %v12564_v30 = vadd.f32 %v4805_v40, %v12419_v37  ;;  %v9596_v45 = vpop.f32.mrf.mxu1  ;;  %9885 = vmatpush3.msra.mxu0 %v7610_v48  ;;  %9912 = vmatpush3.msra.mxu1 %v5726_v39 }
 0x30f   :  { %v9680_v34 = vpop.f32.mrf.mxu0  ;;  %9886 = vmatprep.subr.mxu0 %v13416_v22  ;;  %9913 = vmatprep.subr.mxu1 %v13416_v22 }
 0x310   :  { %v4371_v50 = vpop.f32.mrf.mxu1  ;;  %9914 = vmatpush3.msra.mxu1 %v5725_v59 }
 0x311   :  { %v12574_v13 = vadd.f32 %v4371_v50, %v12470_v7  ;;  %v4810_v37 = vpop.f32.mrf.mxu0  ;;  %v7609_v7 = vld [vmem:[%s13355_s5 + $0xe0] sm:$0xff]  ;;  %9937 = vmatprep.subr.mxu1 %v13416_v22 }
 0x312   :  { %v12582_v44 = vadd.f32 %v4810_v37, %v12428_v62  ;;  %v9599_v18 = vpop.f32.mrf.mxu1  ;;  %9887 = vmatpush3.msra.mxu0 %v7609_v7 }
 0x313   :  { %v9683_v63 = vpop.f32.mrf.mxu0  ;;  %9888 = vmatprep.subr.mxu0 %v13416_v22 }
 0x314   :  { %v4644_v16 = vpop.f32.mrf.mxu1  ;;  %9889 = vmatpush3.msra.mxu0 %v7608_v49 }
 0x315   :  { %v12589_v54 = vadd.f32 %v4644_v16, %v12321_v5  ;;  %v4815_v53 = vpop.f32.mrf.mxu0  ;;  %9890 = vmatprep.subr.mxu0 %v13416_v22  ;;  %v7607_v5 = vld [vmem:[%s13355_s5 + $0xd0] sm:$0xff] }
 0x316   :  { %v12593_v62 = vadd.f32 %v4815_v53, %v12437_v28  ;;  %v9645_v35 = vpop.f32.mrf.mxu1  ;;  %9891 = vmatpush3.msra.mxu0 %v7607_v5 }
 0x317   :  { %v9686_v29 = vpop.f32.mrf.mxu0  ;;  %9892 = vmatprep.subr.mxu0 %v13416_v22 }
 0x318   :  { %v4649_v4 = vpop.f32.mrf.mxu1 }
 0x319   :  { %v12599_v20 = vadd.f32 %v4649_v4, %v12337_v6  ;;  %v4820_v26 = vpop.f32.mrf.mxu0  ;;  %v7606_v6 = vld [vmem:[%s13355_s5 + $0xc8] sm:$0xff] }
 0x31a   :  { %v12606_v28 = vadd.f32 %v4820_v26, %v12445_v47  ;;  %v9648_v15 = vpop.f32.mrf.mxu1  ;;  %9893 = vmatpush3.msra.mxu0 %v7606_v6  ;;  %v7605_v47 = vld [vmem:[%s13355_s5 + $0xc0] sm:$0xff] }
 0x31b   :  { %v9689_v36 = vpop.f32.mrf.mxu0  ;;  %9894 = vmatprep.subr.mxu0 %v13416_v22 }
 0x31c   :  { %v4654_v12 = vpop.f32.mrf.mxu1  ;;  %9895 = vmatpush3.msra.mxu0 %v7605_v47 }
 0x31d   :  { %v12613_v24 = vadd.f32 %v4654_v12, %v12352_v23  ;;  %v4825_v60 = vpop.f32.mrf.mxu0  ;;  %9918 = vmatprep.subr.mxu0 %v13416_v22 }
 0x31e   :  { %v12620_v40 = vadd.f32 %v4825_v60, %v12453_v3  ;;  %v9651_v17 = vpop.f32.mrf.mxu1 }
 0x31f   :  { %v9692_v45 = vpop.f32.mrf.mxu0 }
 0x320   :  { %v4659_v34 = vpop.f32.mrf.mxu1 }
 0x321   :  { %v12624_v48 = vadd.f32 %v4659_v34, %v12364_v56  ;;  %v4830_v23 = vpop.f32.mrf.mxu0 }
 0x322   :  { %v12627_v39 = vadd.f32 %v4830_v23, %v12461_v31  ;;  %v9654_v50 = vpop.f32.mrf.mxu1 }
 0x323   :  { %v9695_v37 = vpop.f32.mrf.mxu0 }
 0x324   :  { %v4664_v59 = vpop.f32.mrf.mxu1 }
 0x325   :  { %v12630_v18 = vadd.f32 %v4664_v59, %v12375_v25  ;;  %v4835_v3 = vpop.f32.mrf.mxu0 }
 0x326   :  { %v12633_v63 = vadd.f32 %v4835_v3, %v12468_v21  ;;  %v9657_v7 = vpop.f32.mrf.mxu1 }
 0x327   :  { %v9698_v16 = vpop.f32.mrf.mxu0 }
 0x328   :  { %v4669_v53 = vpop.f32.mrf.mxu1 }
 0x329   :  { %v12636_v56 = vadd.f32 %v4669_v53, %v12383_v2  ;;  %v4840_v35 = vpop.f32.mrf.mxu0 }
 0x32a   :  { %v12639_v31 = vadd.f32 %v4840_v35, %v12475_v8  ;;  %v9660_v29 = vpop.f32.mrf.mxu1 }
 0x32b   :  { %v9701_v49 = vpop.f32.mrf.mxu0 }
 0x32c   :  { %v4674_v4 = vpop.f32.mrf.mxu1 }
 0x32d   :  { %v12642_v25 = vadd.f32 %v4674_v4, %v12392_v9  ;;  %v4845_v26 = vpop.f32.mrf.mxu0 }
 0x32e   :  { %v12645_v21 = vadd.f32 %v4845_v26, %v12482_v61  ;;  %v9663_v5 = vpop.f32.mrf.mxu1 }
 0x32f   :  { %v9704_v15 = vpop.f32.mrf.mxu0 }
 0x330   :  { %v4679_v36 = vpop.f32.mrf.mxu1 }
 0x331   :  { %v12648_v2 = vadd.f32 %v4679_v36, %v12401_v11  ;;  %v5127_v6 = vpop.f32.mrf.mxu0 }
 0x332   :  { %v12651_v8 = vadd.f32 %v5127_v6, %v12477_v46  ;;  %v9666_v12 = vpop.f32.mrf.mxu1 }
 0x333   :  { %v9750_v60 = vpop.f32.mrf.mxu0 }
 0x334   :  { %v4684_v47 = vpop.f32.mrf.mxu1 }
 0x335   :  { %v12654_v9 = vadd.f32 %v4684_v47, %v12410_v41  ;;  %v5132_v17 = vpop.f32.mrf.mxu0 }
 0x336   :  { %v12657_v61 = vadd.f32 %v5132_v17, %v12484_v14  ;;  %v9669_v45 = vpop.f32.mrf.mxu1 }
 0x337   :  { %v9753_v34 = vpop.f32.mrf.mxu0 }
 0x338   :  { %v4966_v23 = vpop.f32.mrf.mxu1 }
 0x339   :  { %v12660_v11 = vadd.f32 %v4966_v23, %v12489_v33  ;;  %v5137_v50 = vpop.f32.mrf.mxu0 }
 0x33a   :  { %v12663_v46 = vadd.f32 %v5137_v50, %v12491_v38  ;;  %v9715_v37 = vpop.f32.mrf.mxu1 }
 0x33b   :  { %v9756_v59 = vpop.f32.mrf.mxu0 }
 0x33c   :  { %v4971_v3 = vpop.f32.mrf.mxu1 }
 0x33d   :  { %v12666_v41 = vadd.f32 %v4971_v3, %v12494_v52  ;;  %v5142_v7 = vpop.f32.mrf.mxu0 }
 0x33e   :  { %v12669_v14 = vadd.f32 %v5142_v7, %v12497_v42  ;;  %v9718_v16 = vpop.f32.mrf.mxu1 }
 0x33f   :  { %v9759_v53 = vpop.f32.mrf.mxu0 }
 0x340   :  { %v4976_v35 = vpop.f32.mrf.mxu1 }
 0x341   :  { %v12672_v33 = vadd.f32 %v4976_v35, %v12500_v0  ;;  %v5147_v29 = vpop.f32.mrf.mxu0 }
 0x342   :  { %v12675_v38 = vadd.f32 %v5147_v29, %v12503_v43  ;;  %v9721_v49 = vpop.f32.mrf.mxu1 }
 0x343   :  { %v9762_v4 = vpop.f32.mrf.mxu0 }
 0x344   :  { %v4981_v26 = vpop.f32.mrf.mxu1 }
 0x345   :  { %v12678_v52 = vadd.f32 %v4981_v26, %v12506_v58  ;;  %v5152_v5 = vpop.f32.mrf.mxu0 }
 0x346   :  { %v12681_v42 = vadd.f32 %v5152_v5, %v12509_v1  ;;  %v9724_v15 = vpop.f32.mrf.mxu1 }
 0x347   :  { %v9765_v36 = vpop.f32.mrf.mxu0 }
 0x348   :  { %v4986_v6 = vpop.f32.mrf.mxu1 }
 0x349   :  { %v12684_v0 = vadd.f32 %v4986_v6, %v12515_v57  ;;  %v5157_v12 = vpop.f32.mrf.mxu0 }
 0x34a   :  { %v12687_v43 = vadd.f32 %v5157_v12, %v12518_v32  ;;  %v9727_v60 = vpop.f32.mrf.mxu1 }
 0x34b   :  { %v9768_v47 = vpop.f32.mrf.mxu0 }
 0x34c   :  { %v4991_v17 = vpop.f32.mrf.mxu1 }
 0x34d   :  { %v12690_v58 = vadd.f32 %v4991_v17, %v12525_v51  ;;  %v5162_v45 = vpop.f32.mrf.mxu0 }
 0x34e   :  { %v12693_v1 = vadd.f32 %v5162_v45, %v12532_v10  ;;  %v9730_v34 = vpop.f32.mrf.mxu1 }
 0x34f   :  { %v9771_v23 = vpop.f32.mrf.mxu0 }
 0x350   :  { %v4996_v50 = vpop.f32.mrf.mxu1 }
 0x351   :  { %v12696_v57 = vadd.f32 %v4996_v50, %v12539_v27  ;;  %v5167_v37 = vpop.f32.mrf.mxu0 }
 0x352   :  { %v5179_v32 = vadd.f32 %v5167_v37, %v12546_v19  ;;  %v9733_v59 = vpop.f32.mrf.mxu1 }
 0x353   :  { %v9774_v3 = vpop.f32.mrf.mxu0 }
 0x354   :  { %v5001_v7 = vpop.f32.mrf.mxu1 }
 0x355   :  { %v12700_v16 = vadd.f32 %v5001_v7, %v12556_v55  ;;  %v5449_v51 = vpop.f32.mrf.mxu0 }
 0x356   :  { %v9736_v53 = vpop.f32.mrf.mxu1 }
 0x357   :  { %v9820_v35 = vpop.f32.mrf.mxu0 }
 0x358   :  { %v5006_v10 = vpop.f32.mrf.mxu1 }
 0x359   :  { %v12703_v29 = vadd.f32 %v5006_v10, %v12574_v13  ;;  %v5454_v49 = vpop.f32.mrf.mxu0 }
 0x35a   :  { %v9739_v4 = vpop.f32.mrf.mxu1 }
 0x35b   :  { %v9823_v27 = vpop.f32.mrf.mxu0 }
 0x35c   :  { %v5288_v26 = vpop.f32.mrf.mxu1 }
 0x35d   :  { %v5332_v5 = vadd.f32 %v5288_v26, %v12589_v54  ;;  %v12706_v19 = vpop.f32.mrf.mxu0 }
 0x35e   :  { %v9785_v15 = vpop.f32.mrf.mxu1 }
 0x35f   :  { %v5663_v36 = vadd.f32 %v5332_v5, %v12651_v8  ;;  %v9826_v55 = vpop.f32.mrf.mxu0 }
 0x360   :  { %v5293_v6 = vpop.f32.mrf.mxu1 }
 0x361   :  { %v5333_v12 = vadd.f32 %v5293_v6, %v12599_v20  ;;  %v12710_v60 = vpop.f32.mrf.mxu0 }
 0x362   :  { %v9788_v47 = vpop.f32.mrf.mxu1 }
 0x363   :  { %v5664_v13 = vadd.f32 %v5333_v12, %v12657_v61  ;;  %v9829_v17 = vpop.f32.mrf.mxu0 }
 0x364   :  { %v5298_v45 = vpop.f32.mrf.mxu1 }
 0x365   :  { %v5334_v34 = vadd.f32 %v5298_v45, %v12613_v24  ;;  %v12714_v23 = vpop.f32.mrf.mxu0 }
 0x366   :  { %v9791_v54 = vpop.f32.mrf.mxu1 }
 0x367   :  { %v5665_v50 = vadd.f32 %v5334_v34, %v12663_v46  ;;  %v9832_v37 = vpop.f32.mrf.mxu0 }
 0x368   :  { %v5303_v8 = vpop.f32.mrf.mxu1 }
 0x369   :  { %v5335_v59 = vadd.f32 %v5303_v8, %v12624_v48  ;;  %v12718_v3 = vpop.f32.mrf.mxu0 }
 0x36a   :  { %v9794_v20 = vpop.f32.mrf.mxu1 }
 0x36b   :  { %v12721_v7 = vadd.f32 %v5335_v59, %v12669_v14  ;;  %v9835_v61 = vpop.f32.mrf.mxu0  ;;  %v5493_v59 = vadd.f32 %v5449_v51, %v12564_v30 }
 0x36c   :  { %v5308_v53 = vpop.f32.mrf.mxu1 }
 0x36d   :  { %v5336_v35 = vadd.f32 %v5308_v53, %v12630_v18  ;;  %v12724_v24 = vpop.f32.mrf.mxu0  ;;  %v5494_v53 = vadd.f32 %v5454_v49, %v12582_v44 }
 0x36e   :  { %v9797_v10 = vpop.f32.mrf.mxu1 }
 0x36f   :  { %v12727_v4 = vadd.f32 %v5336_v35, %v12675_v38  ;;  %v9838_v46 = vpop.f32.mrf.mxu0 }
 0x370   :  { %v5313_v27 = vpop.f32.mrf.mxu1 }
 0x371   :  { %v5337_v48 = vadd.f32 %v5313_v27, %v12636_v56  ;;  %v12730_v26 = vpop.f32.mrf.mxu0 }
 0x372   :  { %v9800_v5 = vpop.f32.mrf.mxu1 }
 0x373   :  { %v12733_v14 = vadd.f32 %v5337_v48, %v12681_v42  ;;  %v9841_v15 = vpop.f32.mrf.mxu0 }
 0x374   :  { %v5318_v55 = vpop.f32.mrf.mxu1 }
 0x375   :  { %v5338_v18 = vadd.f32 %v5318_v55, %v12642_v25  ;;  %v12736_v6 = vpop.f32.mrf.mxu0 }
 0x376   :  { %v9803_v12 = vpop.f32.mrf.mxu1 }
 0x377   :  { %v12739_v38 = vadd.f32 %v5338_v18, %v12687_v43  ;;  %v9844_v47 = vpop.f32.mrf.mxu0 }
 0x378   :  { %v5323_v17 = vpop.f32.mrf.mxu1 }
 0x379   :  { %v5339_v56 = vadd.f32 %v5323_v17, %v12648_v2  ;;  %v12753_v2 = vld [vmem:[%s13356_s4] ss:$0 sm:$0xff] }
 0x37a   :  { %v9806_v45 = vpop.f32.mrf.mxu1 }
 0x37b   :  { %v12743_v34 = vadd.f32 %v5339_v56, %v12693_v1 }
 0x37c   :  { %v5328_v42 = vpop.f32.mrf.mxu1 }
 0x37d   :  { %v5340_v54 = vadd.f32 %v5328_v42, %v12654_v9 }
 0x37e   :  { %v9809_v37 = vpop.f32.mrf.mxu1 }
 0x37f   :  { %v12746_v8 = vadd.f32 %v5340_v54, %v5179_v32  ;;  %v7594_v37 = vld [vmem:[%s13355_s5 + $0x68] sm:$0xff] }
 0x380   :  { %v5610_v25 = vpop.f32.mrf.mxu1 }
 0x381   :  { %v5654_v43 = vadd.f32 %v5610_v25, %v12660_v11  ;;  %v5495_v11 = vadd.f32 %v12706_v19, %v12593_v62 }
 0x382   :  { %v9855_v20 = vpop.f32.mrf.mxu1 }
 0x383   :  { %v5672_v61 = vadd.f32 %v5654_v43, %v5493_v59 }
 0x384   :  { %v5615_v1 = vpop.f32.mrf.mxu1 }
 0x385   :  { %v5681_v35 = vadd.f32 %v5672_v61, %v5663_v36  ;;  %v5655_v9 = vadd.f32 %v5615_v1, %v12666_v41  ;;  %v5496_v41 = vadd.f32 %v12710_v60, %v12606_v28  ;;  %v7596_v28 = vld [vmem:[%s13355_s5 + $0x78] sm:$0xff] }
 0x386   :  { %v9858_v32 = vpop.f32.mrf.mxu1  ;;  %v7592_v1 = vld [vmem:[%s13355_s5 + $0x58] sm:$0xff] }
 0x387   :  { %v5697_v10 = vadd.f32 %v12753_v2, %v5681_v35  ;;  %v5673_v46 = vadd.f32 %v5655_v9, %v5494_v53 }
 0x388   :  { %v5620_v30 = vpop.f32.mrf.mxu1 }
 0x389   :  { %v5706_v51 = vmax.f32 %v5697_v10, 0.0  ;;  %v5682_v27 = vadd.f32 %v5673_v46, %v5664_v13  ;;  %v5656_v48 = vadd.f32 %v5620_v30, %v12672_v33  ;;  %v5497_v13 = vadd.f32 %v12714_v23, %v12620_v40  ;;  %v7595_v40 = vld [vmem:[%s13355_s5 + $0x70] sm:$0xff]  ;;  %v7622_v46 = vld [vmem:[%s13355_s5 + $0x138] sm:$0xff]  ;;  %v7590_v30 = vld [vmem:[%s13355_s5 + $0x48] sm:$0xff] }
 0x38a   :  { %v9861_v5 = vpop.f32.mrf.mxu1 }
 0x38b   :  { %5715 = vst.msk [vmem:[#allocation3] sm:$0xff] %vm450_vm0, %v5706_v51  ;;  %v5698_v44 = vadd.f32 %v12753_v2, %v5682_v27  ;;  %v5674_v49 = vadd.f32 %v5656_v48, %v5495_v11  ;;  %v5501_v48 = vadd.f32 %v12736_v6, %v12645_v21  ;;  %v7604_v21 = vld [vmem:[%s13355_s5 + $0xb8] sm:$0xff] }
 0x38c   :  { %v5625_v36 = vpop.f32.mrf.mxu1 }
 0x38d   :  { %v5707_v15 = vmax.f32 %v5698_v44, 0.0  ;;  %v5683_v55 = vadd.f32 %v5674_v49, %v5665_v50  ;;  %v5657_v18 = vadd.f32 %v5625_v36, %v12678_v52  ;;  %v7620_v36 = vld [vmem:[%s13355_s5 + $0x128] sm:$0xff] }
 0x38e   :  { %v9864_v12 = vpop.f32.mrf.mxu1 }
 0x38f   :  { %5716 = vst.msk [vmem:[#allocation3 + $0x8] sm:$0xff] %vm450_vm0, %v5707_v15  ;;  %v5699_v62 = vadd.f32 %v12753_v2, %v5683_v55  ;;  %v5675_v33 = vadd.f32 %v5657_v18, %v5496_v41  ;;  %v7603_v55 = vld [vmem:[%s13355_s5 + $0xb0] sm:$0xff] }
 0x390   :  { %v5630_v19 = vpop.f32.mrf.mxu1 }
 0x391   :  { %v5708_v47 = vmax.f32 %v5699_v62, 0.0  ;;  %v5684_v17 = vadd.f32 %v5675_v33, %v12721_v7  ;;  %v5658_v56 = vadd.f32 %v5630_v19, %v12684_v0  ;;  %v5498_v0 = vadd.f32 %v12718_v3, %v12627_v39  ;;  %v7593_v39 = vld [vmem:[%s13355_s5 + $0x60] sm:$0xff]  ;;  %v7618_v62 = vld [vmem:[%s13355_s5 + $0x118] sm:$0xff]  ;;  %v7602_v33 = vld [vmem:[%s13355_s5 + $0xa8] sm:$0xff] }
 0x392   :  { %v9867_v52 = vpop.f32.mrf.mxu1  ;;  %v5724_v60 = vld [vmem:[#allocation3] sm:$0xff]  ;;  %v5499_v3 = vadd.f32 %v12724_v24, %v12633_v63  ;;  %v7591_v63 = vld [vmem:[%s13355_s5 + $0x50] sm:$0xff]  ;;  %v5500_v24 = vadd.f32 %v12730_v26, %v12639_v31 }
 0x393   :  { %5717 = vst.msk [vmem:[#allocation3 + $0x10] sm:$0xff] %vm450_vm0, %v5708_v47  ;;  %v5700_v50 = vadd.f32 %v12753_v2, %v5684_v17  ;;  %v5676_v45 = vadd.f32 %v5658_v56, %v5497_v13  ;;  %9916 = vmatmul.mubr.msk.f32.vlgmr.msra.gmra.mxu1 %vm450_vm0, %v5724_v60  ;;  %v7601_v13 = vld [vmem:[%s13355_s5 + $0xa0] sm:$0xff]  ;;  %v7600_v17 = vld [vmem:[%s13355_s5 + $0x98] sm:$0xff] }
 0x394   :  { %9938 = vmatpush3.msra.mxu1 %v7596_v28  ;;  %v5635_v23 = vpop.f32.mrf.mxu1  ;;  %9953 = vmatprep.mubr.msk.f32.mxu1 %vm10063_vm1, %v13416_v22  ;;  %v7615_v56 = vld [vmem:[%s13355_s5 + $0x100] sm:$0xff]  ;;  %v7599_v28 = vld [vmem:[%s13355_s5 + $0x90] sm:$0xff]  ;;  %v7632_v52 = vld [vmem:[%s13355_s5 + $0x178] sm:$0xff] }
 0x395   :  { %v5709_v7 = vmax.f32 %v5700_v50, 0.0  ;;  %v5685_v42 = vadd.f32 %v5676_v45, %v12727_v4  ;;  %v5659_v54 = vadd.f32 %v5635_v23, %v12690_v58  ;;  %9939 = vmatprep.subr.mxu1 %v13416_v22  ;;  %v7598_v50 = vld [vmem:[%s13355_s5 + $0x88] sm:$0xff]  ;;  %v7631_v45 = vld [vmem:[%s13355_s5 + $0x170] sm:$0xff] }
 0x396   :  { %9940 = vmatpush3.msra.mxu1 %v7595_v40  ;;  %v9870_v25 = vpop.f32.mrf.mxu1  ;;  %v5734_v15 = vld [vmem:[#allocation3 + $0x8] sm:$0xff]  ;;  %v7597_v40 = vld [vmem:[%s13355_s5 + $0x80] sm:$0xff] }
 0x397   :  { %5718 = vst.msk [vmem:[#allocation3 + $0x18] sm:$0xff] %vm450_vm0, %v5709_v7  ;;  %v5701_v59 = vadd.f32 %v12753_v2, %v5685_v42  ;;  %v5677_v43 = vadd.f32 %v5659_v54, %v5498_v0  ;;  %9941 = vmatprep.subr.mxu1 %v13416_v22  ;;  %v7630_v23 = vld [vmem:[%s13355_s5 + $0x168] sm:$0xff]  ;;  %v7651_v7 = vld [vmem:[%s13355_s5 + $0x1f8] sm:$0xff]  ;;  %v7629_v42 = vld [vmem:[%s13355_s5 + $0x160] sm:$0xff] }
 0x398   :  { %9942 = vmatpush3.msra.mxu1 %v7594_v37  ;;  %v5640_v58 = vpop.f32.mrf.mxu1  ;;  %v7650_v54 = vld [vmem:[%s13355_s5 + $0x1f0] sm:$0xff]  ;;  %v7628_v37 = vld [vmem:[%s13355_s5 + $0x158] sm:$0xff]  ;;  %v7649_v25 = vld [vmem:[%s13355_s5 + $0x1e8] sm:$0xff] }
 0x399   :  { %v5710_v4 = vmax.f32 %v5701_v59, 0.0  ;;  %v5686_v20 = vadd.f32 %v5677_v43, %v12733_v14  ;;  %v5660_v61 = vadd.f32 %v5640_v58, %v12696_v57  ;;  %9943 = vmatprep.subr.mxu1 %v13416_v22  ;;  %v7627_v59 = vld [vmem:[%s13355_s5 + $0x150] sm:$0xff]  ;;  %v7648_v43 = vld [vmem:[%s13355_s5 + $0x1e0] sm:$0xff]  ;;  %v7647_v58 = vld [vmem:[%s13355_s5 + $0x1d8] sm:$0xff] }
 0x39a   :  { %9944 = vmatpush3.msra.mxu1 %v7593_v39  ;;  %v9873_v53 = vpop.f32.mrf.mxu1  ;;  %v5745_v0 = vld [vmem:[#allocation3 + $0x10] sm:$0xff]  ;;  %v7626_v39 = vld [vmem:[%s13355_s5 + $0x148] sm:$0xff] }
 0x39b   :  { %5719 = vst.msk [vmem:[#allocation3 + $0x20] sm:$0xff] %vm450_vm0, %v5710_v4  ;;  %v5702_v35 = vadd.f32 %v12753_v2, %v5686_v20  ;;  %v5678_v9 = vadd.f32 %v5660_v61, %v5499_v3  ;;  %9945 = vmatprep.subr.mxu1 %v13416_v22  ;;  %v7625_v3 = vld [vmem:[%s13355_s5 + $0x140] sm:$0xff]  ;;  %v7646_v4 = vld [vmem:[%s13355_s5 + $0x1d0] sm:$0xff]  ;;  %v7642_v20 = vld [vmem:[%s13355_s5 + $0x1b8] sm:$0xff] }
 0x39c   :  { %9946 = vmatpush3.msra.mxu1 %v7592_v1  ;;  %v5645_v57 = vpop.f32.mrf.mxu1  ;;  %v7645_v1 = vld [vmem:[%s13355_s5 + $0x1c8] sm:$0xff]  ;;  %v7641_v53 = vld [vmem:[%s13355_s5 + $0x1b0] sm:$0xff] }
 0x39d   :  { %v5711_v14 = vmax.f32 %v5702_v35, 0.0  ;;  %v5687_v32 = vadd.f32 %v5678_v9, %v12739_v38  ;;  %v5661_v10 = vadd.f32 %v5645_v57, %v12700_v16  ;;  %9947 = vmatprep.subr.mxu1 %v13416_v22  ;;  %v7621_v16 = vld [vmem:[%s13355_s5 + $0x130] sm:$0xff]  ;;  %v7589_v38 = vld [vmem:[%s13355_s5 + $0x40] sm:$0xff]  ;;  %v7640_v9 = vld [vmem:[%s13355_s5 + $0x1a8] sm:$0xff] }
 0x39e   :  { %9948 = vmatpush3.msra.mxu1 %v7591_v63  ;;  %v9876_v11 = vpop.f32.mrf.mxu1  ;;  %v5756_v51 = vld [vmem:[#allocation3 + $0x18] sm:$0xff]  ;;  %v7644_v35 = vld [vmem:[%s13355_s5 + $0x1c0] sm:$0xff] }
 0x39f   :  { %5720 = vst.msk [vmem:[#allocation3 + $0x28] sm:$0xff] %vm450_vm0, %v5711_v14  ;;  %v5703_v31 = vadd.f32 %v12753_v2, %v5687_v32  ;;  %v5679_v26 = vadd.f32 %v5661_v10, %v5500_v24  ;;  %9949 = vmatprep.subr.mxu1 %v13416_v22  ;;  %9897 = vmatmul.mubr.msk.f32.vlgmr.msra.gmra.mxu0 %vm450_vm0, %v5756_v51  ;;  %v7639_v57 = vld [vmem:[%s13355_s5 + $0x1a0] sm:$0xff]  ;;  %v7638_v24 = vld [vmem:[%s13355_s5 + $0x198] sm:$0xff]  ;;  %v7637_v14 = vld [vmem:[%s13355_s5 + $0x190] sm:$0xff] }
 0x3a0   :  { %9919 = vmatpush3.msra.mxu0 %v7622_v46  ;;  %9950 = vmatpush3.msra.mxu1 %v7590_v30  ;;  %v5650_v27 = vpop.f32.mrf.mxu1  ;;  %v7636_v32 = vld [vmem:[%s13355_s5 + $0x188] sm:$0xff]  ;;  %v7635_v10 = vld [vmem:[%s13355_s5 + $0x180] sm:$0xff]  ;;  %v7660_v46 = vld [vmem:[%s13355_s5 + $0x238] sm:$0xff] }
 0x3a1   :  { %v5712_v5 = vmax.f32 %v5703_v31, 0.0  ;;  %v5688_v44 = vadd.f32 %v5679_v26, %v12743_v34  ;;  %v5662_v49 = vadd.f32 %v5650_v27, %v12703_v29  ;;  %9920 = vmatprep.subr.mxu0 %v13416_v22  ;;  %9951 = vmatprep.subr.mxu1 %v13416_v22  ;;  %v7619_v34 = vld [vmem:[%s13355_s5 + $0x120] sm:$0xff]  ;;  %v7659_v11 = vld [vmem:[%s13355_s5 + $0x230] sm:$0xff]  ;;  %v7658_v51 = vld [vmem:[%s13355_s5 + $0x228] sm:$0xff] }
 0x3a2   :  { %9921 = vmatpush3.msra.mxu0 %v7621_v16  ;;  %9952 = vmatpush3.msra.mxu1 %v7589_v38  ;;  %v9879_v41 = vpop.f32.mrf.mxu1  ;;  %v5913_v60 = vld [vmem:[#allocation3 + $0x20] sm:$0xff]  ;;  %v7656_v26 = vld [vmem:[%s13355_s5 + $0x218] sm:$0xff]  ;;  %v7655_v16 = vld [vmem:[%s13355_s5 + $0x210] sm:$0xff] }
 0x3a3   :  { %5721 = vst.msk [vmem:[#allocation3 + $0x30] sm:$0xff] %vm450_vm0, %v5712_v5  ;;  %v5704_v29 = vadd.f32 %v12753_v2, %v5688_v44  ;;  %v5680_v6 = vadd.f32 %v5662_v49, %v5501_v48  ;;  %9922 = vmatprep.subr.mxu0 %v13416_v22  ;;  %9954 = vmatmul.mubr.msk.f32.vlgmr.msra.gmra.mxu1 %vm450_vm0, %v5734_v15  ;;  %v7657_v31 = vld [vmem:[%s13355_s5 + $0x220] sm:$0xff]  ;;  %v7654_v38 = vld [vmem:[%s13355_s5 + $0x208] sm:$0xff]  ;;  %v6523_v44 = vld [vmem:[%s13357_s7 + $0xf8] sm:$0xff] }
 0x3a4   :  { %9975 = vmatprep.subr.mxu1 %v13416_v22  ;;  %9923 = vmatpush3.msra.mxu0 %v7620_v36  ;;  %v7653_v27 = vld [vmem:[%s13355_s5 + $0x200] sm:$0xff]  ;;  %v6521_v5 = vld [vmem:[%s13357_s7 + $0xe8] sm:$0xff]  ;;  %v6522_v36 = vld [vmem:[%s13357_s7 + $0xf0] sm:$0xff] }
 0x3a5   :  { %v5713_v18 = vmax.f32 %v5704_v29, 0.0  ;;  %v5689_v12 = vadd.f32 %v5680_v6, %v12746_v8  ;;  %9976 = vmatpush3.msra.mxu1 %v7604_v21  ;;  %9924 = vmatprep.subr.mxu0 %v13416_v22  ;;  %v7617_v8 = vld [vmem:[%s13355_s5 + $0x110] sm:$0xff]  ;;  %v6520_v49 = vld [vmem:[%s13357_s7 + $0xe0] sm:$0xff]  ;;  %v6519_v41 = vld [vmem:[%s13357_s7 + $0xd8] sm:$0xff] }
 0x3a6   :  { %9977 = vmatprep.subr.mxu1 %v13416_v22  ;;  %9925 = vmatpush3.msra.mxu0 %v7619_v34  ;;  %v6070_v61 = vld [vmem:[#allocation3 + $0x28] sm:$0xff]  ;;  %v6516_v15 = vld [vmem:[%s13357_s7 + $0xc0] sm:$0xff]  ;;  %v6518_v21 = vld [vmem:[%s13357_s7 + $0xd0] sm:$0xff] }
 0x3a7   :  { %5722 = vst.msk [vmem:[#allocation3 + $0x38] sm:$0xff] %vm450_vm0, %v5713_v18  ;;  %v5705_v19 = vadd.f32 %v12753_v2, %v5689_v12  ;;  %9978 = vmatpush3.msra.mxu1 %v7603_v55  ;;  %9926 = vmatprep.subr.mxu0 %v13416_v22  ;;  %v7616_v2 = vld [vmem:[%s13355_s5 + $0x108] sm:$0xff]  ;;  %v6515_v6 = vld [vmem:[%s13357_s7 + $0xb8] sm:$0xff]  ;;  %v6512_v34 = vld [vmem:[%s13357_s7 + $0xa0] sm:$0xff] }
 0x3a8   :  { %9979 = vmatprep.subr.mxu1 %v13416_v22  ;;  %9927 = vmatpush3.msra.mxu0 %v7618_v62  ;;  %v6513_v29 = vld [vmem:[%s13357_s7 + $0xa8] sm:$0xff]  ;;  %v6514_v55 = vld [vmem:[%s13357_s7 + $0xb0] sm:$0xff]  ;;  %v6511_v12 = vld [vmem:[%s13357_s7 + $0x98] sm:$0xff] }
 0x3a9   :  { %v5714_v47 = vmax.f32 %v5705_v19, 0.0  ;;  %9980 = vmatpush3.msra.mxu1 %v7602_v33  ;;  %9928 = vmatprep.subr.mxu0 %v13416_v22  ;;  %v6509_v18 = vld [vmem:[%s13357_s7 + $0x88] sm:$0xff]  ;;  %v6508_v62 = vld [vmem:[%s13357_s7 + $0x80] sm:$0xff]  ;;  %v6510_v33 = vld [vmem:[%s13357_s7 + $0x90] sm:$0xff] }
 0x3aa   :  { %9981 = vmatprep.subr.mxu1 %v13416_v22  ;;  %9929 = vmatpush3.msra.mxu0 %v7617_v8  ;;  %v6227_v30 = vld [vmem:[#allocation3 + $0x30] sm:$0xff]  ;;  %v6505_v19 = vld [vmem:[%s13357_s7 + $0x68] sm:$0xff]  ;;  %v6507_v8 = vld [vmem:[%s13357_s7 + $0x78] sm:$0xff] }
 0x3ab   :  { %5723 = vst.msk [vmem:[#allocation3 + $0x40] sm:$0xff] %vm450_vm0, %v5714_v47  ;;  %9982 = vmatpush3.msra.mxu1 %v7601_v13  ;;  %9930 = vmatprep.subr.mxu0 %v13416_v22  ;;  %v6504_v13 = vld [vmem:[%s13357_s7 + $0x60] sm:$0xff]  ;;  %v6506_v47 = vld [vmem:[%s13357_s7 + $0x70] sm:$0xff] }
 0x3ac   :  { %9983 = vmatprep.subr.mxu1 %v13416_v22  ;;  %9931 = vmatpush3.msra.mxu0 %v7616_v2  ;;  %v6501_v2 = vld [vmem:[%s13357_s7 + $0x48] sm:$0xff] }
 0x3ad   :  { %9984 = vmatpush3.msra.mxu1 %v7600_v17  ;;  %9932 = vmatprep.subr.mxu0 %v13416_v22  ;;  %v6503_v17 = vld [vmem:[%s13357_s7 + $0x58] sm:$0xff] }
 0x3ae   :  { %9985 = vmatprep.subr.mxu1 %v13416_v22  ;;  %9933 = vmatpush3.msra.mxu0 %v7615_v56  ;;  %v6312_v63 = vld [vmem:[#allocation3 + $0x38] sm:$0xff]  ;;  %v6500_v56 = vld [vmem:[%s13357_s7 + $0x40] sm:$0xff] }
 0x3af   :  { %9934 = vmatprep.mubr.msk.f32.mxu0 %vm10063_vm1, %v13416_v22  ;;  %9986 = vmatpush3.msra.mxu1 %v7599_v28  ;;  %v6502_v28 = vld [vmem:[%s13357_s7 + $0x50] sm:$0xff] }
 0x3b0   :  { %9935 = vmatmul.mubr.msk.f32.vlgmr.msra.gmra.mxu0 %vm450_vm0, %v5913_v60  ;;  %9956 = vmatprep.subr.mxu0 %v13416_v22  ;;  %v6499_v60 = vld [vmem:[%s13357_s7 + $0x38] sm:$0xff] }
 0x3b1   :  { %9987 = vmatprep.subr.mxu1 %v13416_v22  ;;  %9957 = vmatpush3.msra.mxu0 %v7632_v52  ;;  %v6497_v52 = vld [vmem:[%s13357_s7 + $0x28] sm:$0xff] }
 0x3b2   :  { %9988 = vmatpush3.msra.mxu1 %v7598_v50  ;;  %9958 = vmatprep.subr.mxu0 %v13416_v22  ;;  %v6397_v48 = vld [vmem:[#allocation3 + $0x40] sm:$0xff] }
 0x3b3   :  { %9989 = vmatprep.subr.mxu1 %v13416_v22  ;;  %9959 = vmatpush3.msra.mxu0 %v7631_v45  ;;  %v6496_v50 = vld [vmem:[%s13357_s7 + $0x20] sm:$0xff]  ;;  %v6498_v45 = vld [vmem:[%s13357_s7 + $0x30] sm:$0xff] }
 0x3b4   :  { %9990 = vmatpush3.msra.mxu1 %v7597_v40  ;;  %9991 = vmatprep.mubr.msk.f32.mxu1 %vm10063_vm1, %v13416_v22  ;;  %v6493_v40 = vld [vmem:[%s13357_s7 + $0x8] sm:$0xff] }
 0x3b5   :  { %9960 = vmatprep.subr.mxu0 %v13416_v22  ;;  %9992 = vmatmul.mubr.msk.f32.vlgmr.msra.gmra.mxu1 %vm450_vm0, %v5745_v0  ;;  %v6492_v0 = vld [vmem:[%s13357_s7] sm:$0xff] }
 0x3b6   :  { %10013 = vmatprep.subr.mxu1 %v13416_v22  ;;  %9961 = vmatpush3.msra.mxu0 %v7630_v23  ;;  %v6495_v23 = vld [vmem:[%s13357_s7 + $0x18] sm:$0xff] }
 0x3b7   :  { %10014 = vmatpush3.msra.mxu1 %v7651_v7  ;;  %9962 = vmatprep.subr.mxu0 %v13416_v22  ;;  %v6494_v7 = vld [vmem:[%s13357_s7 + $0x10] sm:$0xff] }
 0x3b8   :  { %10015 = vmatprep.subr.mxu1 %v13416_v22  ;;  %9963 = vmatpush3.msra.mxu0 %v7629_v42  ;;  %v6726_v42 = vld [vmem:[%s13358_s9 + $0xf8] sm:$0xff] }
 0x3b9   :  { %10016 = vmatpush3.msra.mxu1 %v7650_v54  ;;  %9964 = vmatprep.subr.mxu0 %v13416_v22  ;;  %v6758_v54 = vld [vmem:[%s13358_s9 + $0x1f8] sm:$0xff] }
 0x3ba   :  { %10017 = vmatprep.subr.mxu1 %v13416_v22  ;;  %9965 = vmatpush3.msra.mxu0 %v7628_v37 }
 0x3bb   :  { %10018 = vmatpush3.msra.mxu1 %v7649_v25  ;;  %9966 = vmatprep.subr.mxu0 %v13416_v22 }
 0x3bc   :  { %10019 = vmatprep.subr.mxu1 %v13416_v22  ;;  %9967 = vmatpush3.msra.mxu0 %v7627_v59 }
 0x3bd   :  { %10020 = vmatpush3.msra.mxu1 %v7648_v43  ;;  %9968 = vmatprep.subr.mxu0 %v13416_v22 }
 0x3be   :  { %10021 = vmatprep.subr.mxu1 %v13416_v22  ;;  %9969 = vmatpush3.msra.mxu0 %v7626_v39 }
 0x3bf   :  { %10022 = vmatpush3.msra.mxu1 %v7647_v58  ;;  %9970 = vmatprep.subr.mxu0 %v13416_v22 }
 0x3c0   :  { %10023 = vmatprep.subr.mxu1 %v13416_v22  ;;  %9971 = vmatpush3.msra.mxu0 %v7625_v3 }
 0x3c1   :  { %9972 = vmatprep.mubr.msk.f32.mxu0 %vm10063_vm1, %v13416_v22  ;;  %10024 = vmatpush3.msra.mxu1 %v7646_v4 }
 0x3c2   :  { %9973 = vmatmul.mubr.msk.f32.vlgmr.msra.gmra.mxu0 %vm450_vm0, %v6070_v61  ;;  %9994 = vmatprep.subr.mxu0 %v13416_v22 }
 0x3c3   :  { %10025 = vmatprep.subr.mxu1 %v13416_v22  ;;  %9995 = vmatpush3.msra.mxu0 %v7642_v20 }
 0x3c4   :  { %10026 = vmatpush3.msra.mxu1 %v7645_v1  ;;  %9996 = vmatprep.subr.mxu0 %v13416_v22 }
 0x3c5   :  { %10027 = vmatprep.subr.mxu1 %v13416_v22  ;;  %9997 = vmatpush3.msra.mxu0 %v7641_v53 }
 0x3c6   :  { %10028 = vmatpush3.msra.mxu1 %v7644_v35  ;;  %10029 = vmatprep.mubr.msk.f32.mxu1 %vm10063_vm1, %v13416_v22 }
 0x3c7   :  { %9998 = vmatprep.subr.mxu0 %v13416_v22  ;;  %10030 = vmatmul.mubr.msk.f32.vlgmr.msra.gmra.mxu1 %vm450_vm0, %v6312_v63 }
 0x3c8   :  { %9999 = vmatpush3.msra.mxu0 %v7640_v9  ;;  %10010 = vmatprep.mubr.msk.f32.mxu0 %vm10063_vm1, %v13416_v22 }
 0x3c9   :  { %10000 = vmatprep.subr.mxu0 %v13416_v22  ;;  %6613 = vmatprep.mubr.f32.mxu1 %v13416_v22 }
 0x3ca   :  { %10001 = vmatpush3.msra.mxu0 %v7639_v57  ;;  %6565 = vmatprep.subr.mxu1 %v6521_v5  ;;  %v6742_v5 = vld [vmem:[%s13358_s9 + $0x178] sm:$0xff] }
 0x3cb   :  { %10002 = vmatprep.subr.mxu0 %v13416_v22  ;;  %6566 = vmatpush1.msra.mxu1 %v6520_v49  ;;  %v6757_v49 = vld [vmem:[%s13358_s9 + $0x1f0] sm:$0xff] }
 0x3cc   :  { %10003 = vmatpush3.msra.mxu0 %v7638_v24 }
 0x3cd   :  { %10004 = vmatprep.subr.mxu0 %v13416_v22 }
 0x3ce   :  { %10005 = vmatpush3.msra.mxu0 %v7637_v14 }
 0x3cf   :  { %10006 = vmatprep.subr.mxu0 %v13416_v22 }
 0x3d0   :  { %10007 = vmatpush3.msra.mxu0 %v7636_v32 }
 0x3d1   :  { %10008 = vmatprep.subr.mxu0 %v13416_v22 }
 0x3d2   :  { %10009 = vmatpush3.msra.mxu0 %v7635_v10 }
 0x3d3   :  { %10011 = vmatmul.mubr.msk.f32.vlgmr.msra.gmra.mxu0 %vm450_vm0, %v6227_v30  ;;  %10032 = vmatprep.subr.mxu0 %v13416_v22 }
 0x3d4   :  { %10033 = vmatpush3.msra.mxu0 %v7660_v46  ;;  %10048 = vmatprep.mubr.msk.f32.mxu0 %vm10063_vm1, %v13416_v22 }
 0x3d5   :  { %10034 = vmatprep.subr.mxu0 %v13416_v22 }
 0x3d6   :  { %10035 = vmatpush3.msra.mxu0 %v7659_v11 }
 0x3d7   :  { %10036 = vmatprep.subr.mxu0 %v13416_v22 }
 0x3d8   :  { %10037 = vmatpush3.msra.mxu0 %v7658_v51 }
 0x3d9   :  { %10038 = vmatprep.subr.mxu0 %v13416_v22 }
 0x3da   :  { %10039 = vmatpush3.msra.mxu0 %v7657_v31  ;;  %v7662_v31 = vld [vmem:[%s13359_s6] ss:$0 sm:$0xff] }
 0x3db   :  { %10040 = vmatprep.subr.mxu0 %v13416_v22 }
 0x3dc   :  { %10041 = vmatpush3.msra.mxu0 %v7656_v26 }
 0x3dd   :  { %10042 = vmatprep.subr.mxu0 %v13416_v22 }
 0x3de   :  { %10043 = vmatpush3.msra.mxu0 %v7655_v16 }
 0x3df   :  { %10044 = vmatprep.subr.mxu0 %v13416_v22 }
 0x3e0   :  { %10045 = vmatpush3.msra.mxu0 %v7654_v38 }
 0x3e1   :  { %10046 = vmatprep.subr.mxu0 %v13416_v22 }
 0x3e2   :  { %10047 = vmatpush3.msra.mxu0 %v7653_v27 }
 0x3e3   :  { %10049 = vmatmul.mubr.msk.f32.vlgmr.msra.gmra.mxu0 %vm450_vm0, %v6397_v48  ;;  %6636 = vmatprep.subr.mxu0 %v6523_v44  ;;  %v6710_v48 = vld [vmem:[%s13358_s9 + $0x78] sm:$0xff]  ;;  %v6725_v44 = vld [vmem:[%s13358_s9 + $0xf0] sm:$0xff] }
 0x3e4   :  { %6684 = vmatprep.mubr.f32.mxu0 %v13416_v22  ;;  %v6517_v22 = vld [vmem:[%s13357_s7 + $0xc8] sm:$0xff]  ;;  %6637 = vmatpush1.msra.mxu0 %v6522_v36  ;;  %v6709_v36 = vld [vmem:[%s13358_s9 + $0x70] sm:$0xff] }
 0x3e5   :  { %6567 = vmatprep.subr.mxu1 %v6517_v22  ;;  %6638 = vmatprep.subr.mxu0 %v6519_v41  ;;  %v6741_v22 = vld [vmem:[%s13358_s9 + $0x170] sm:$0xff]  ;;  %v6724_v41 = vld [vmem:[%s13358_s9 + $0xe8] sm:$0xff] }
 0x3e6   :  { %6568 = vmatpush1.msra.mxu1 %v6516_v15  ;;  %6639 = vmatpush1.msra.mxu0 %v6518_v21  ;;  %v6756_v15 = vld [vmem:[%s13358_s9 + $0x1e8] sm:$0xff] }
 0x3e7   :  { %6569 = vmatprep.subr.mxu1 %v6513_v29  ;;  %6640 = vmatprep.subr.mxu0 %v6515_v6  ;;  %v6708_v21 = vld [vmem:[%s13358_s9 + $0x68] sm:$0xff]  ;;  %v6723_v6 = vld [vmem:[%s13358_s9 + $0xe0] sm:$0xff] }
 0x3e8   :  { %6570 = vmatpush1.msra.mxu1 %v6512_v34  ;;  %6641 = vmatpush1.msra.mxu0 %v6514_v55  ;;  %v6740_v29 = vld [vmem:[%s13358_s9 + $0x168] sm:$0xff]  ;;  %v6755_v34 = vld [vmem:[%s13358_s9 + $0x1e0] sm:$0xff] }
 0x3e9   :  { %6571 = vmatprep.subr.mxu1 %v6509_v18  ;;  %6642 = vmatprep.subr.mxu0 %v6511_v12  ;;  %v6707_v55 = vld [vmem:[%s13358_s9 + $0x60] sm:$0xff]  ;;  %v6722_v12 = vld [vmem:[%s13358_s9 + $0xd8] sm:$0xff] }
 0x3ea   :  { %6572 = vmatpush1.msra.mxu1 %v6508_v62  ;;  %6643 = vmatpush1.msra.mxu0 %v6510_v33  ;;  %v6739_v18 = vld [vmem:[%s13358_s9 + $0x160] sm:$0xff]  ;;  %v6754_v62 = vld [vmem:[%s13358_s9 + $0x1d8] sm:$0xff] }
 0x3eb   :  { %6573 = vmatprep.subr.mxu1 %v6505_v19  ;;  %6644 = vmatprep.subr.mxu0 %v6507_v8  ;;  %v6706_v33 = vld [vmem:[%s13358_s9 + $0x58] sm:$0xff]  ;;  %v6721_v8 = vld [vmem:[%s13358_s9 + $0xd0] sm:$0xff] }
 0x3ec   :  { %6574 = vmatpush1.msra.mxu1 %v6504_v13  ;;  %6645 = vmatpush1.msra.mxu0 %v6506_v47  ;;  %v6738_v19 = vld [vmem:[%s13358_s9 + $0x158] sm:$0xff]  ;;  %v6753_v13 = vld [vmem:[%s13358_s9 + $0x1d0] sm:$0xff] }
 0x3ed   :  { %6575 = vmatprep.subr.mxu1 %v6501_v2  ;;  %6646 = vmatprep.subr.mxu0 %v6503_v17  ;;  %v6705_v47 = vld [vmem:[%s13358_s9 + $0x50] sm:$0xff]  ;;  %v6720_v17 = vld [vmem:[%s13358_s9 + $0xc8] sm:$0xff] }
 0x3ee   :  { %6576 = vmatpush1.msra.mxu1 %v6500_v56  ;;  %6647 = vmatpush1.msra.mxu0 %v6502_v28  ;;  %v6737_v2 = vld [vmem:[%s13358_s9 + $0x150] sm:$0xff]  ;;  %v6752_v56 = vld [vmem:[%s13358_s9 + $0x1c8] sm:$0xff] }
 0x3ef   :  { %6577 = vmatprep.subr.mxu1 %v6497_v52  ;;  %6648 = vmatprep.subr.mxu0 %v6499_v60  ;;  %v6704_v28 = vld [vmem:[%s13358_s9 + $0x48] sm:$0xff]  ;;  %v6719_v60 = vld [vmem:[%s13358_s9 + $0xc0] sm:$0xff] }
 0x3f0   :  { %6578 = vmatpush1.msra.mxu1 %v6496_v50  ;;  %6649 = vmatpush1.msra.mxu0 %v6498_v45  ;;  %v6736_v52 = vld [vmem:[%s13358_s9 + $0x148] sm:$0xff]  ;;  %v6751_v50 = vld [vmem:[%s13358_s9 + $0x1c0] sm:$0xff] }
 0x3f1   :  { %6579 = vmatprep.subr.mxu1 %v6493_v40  ;;  %6650 = vmatprep.subr.mxu0 %v6495_v23  ;;  %v6703_v45 = vld [vmem:[%s13358_s9 + $0x40] sm:$0xff]  ;;  %v6718_v23 = vld [vmem:[%s13358_s9 + $0xb8] sm:$0xff] }
 0x3f2   :  { %6580 = vmatpush1.msra.mxu1 %v6492_v0  ;;  %6651 = vmatpush1.msra.mxu0 %v6494_v7  ;;  %v6735_v40 = vld [vmem:[%s13358_s9 + $0x140] sm:$0xff]  ;;  %v6750_v0 = vld [vmem:[%s13358_s9 + $0x1b8] sm:$0xff] }
 0x3f3   :  { %8802 = vmatprep.subr.mxu1 %v6726_v42  ;;  %8837 = vmatprep.subr.mxu0 %v6758_v54  ;;  %v6702_v7 = vld [vmem:[%s13358_s9 + $0x38] sm:$0xff]  ;;  %v6717_v54 = vld [vmem:[%s13358_s9 + $0xb0] sm:$0xff] }
 0x3f4   :  { %v6734_v42 = vld [vmem:[%s13358_s9 + $0x138] sm:$0xff] }
 0x453   :  { %v5908_v37 = vpop.f32.mrf.mxu1 }
 0x455   :  { %v9917_v25 = vpop.f32.mrf.mxu1 }
 0x456   :  { %v6701_v25 = vld [vmem:[%s13358_s9 + $0x30] sm:$0xff] }
 0x45f   :  { %v5835_v59 = vpop.f32.mrf.mxu0 }
 0x460   :  { %v5909_v43 = vadd.f32 %v5908_v37, %v5835_v59  ;;  %v6749_v37 = vld [vmem:[%s13358_s9 + $0x1b0] sm:$0xff] }
 0x461   :  { %v9898_v39 = vpop.f32.mrf.mxu0  ;;  %v6733_v59 = vld [vmem:[%s13358_s9 + $0x130] sm:$0xff] }
 0x462   :  { %v6748_v39 = vld [vmem:[%s13358_s9 + $0x1a8] sm:$0xff] }
 0x463   :  { %v6065_v58 = vpop.f32.mrf.mxu1 }
 0x465   :  { %v9955_v3 = vpop.f32.mrf.mxu1 }
 0x466   :  { %v6732_v3 = vld [vmem:[%s13358_s9 + $0x128] sm:$0xff] }
 0x470   :  { %v5992_v4 = vpop.f32.mrf.mxu0 }
 0x471   :  { %v6066_v14 = vadd.f32 %v6065_v58, %v5992_v4  ;;  %v6700_v58 = vld [vmem:[%s13358_s9 + $0x28] sm:$0xff]  ;;  %v6715_v4 = vld [vmem:[%s13358_s9 + $0xa0] sm:$0xff] }
 0x472   :  { %v9936_v20 = vpop.f32.mrf.mxu0 }
 0x473   :  { %v6747_v20 = vld [vmem:[%s13358_s9 + $0x1a0] sm:$0xff] }
 0x475   :  { %v6222_v61 = vpop.f32.mrf.mxu1 }
 0x477   :  { %v9993_v1 = vpop.f32.mrf.mxu1 }
 0x478   :  { %v6731_v1 = vld [vmem:[%s13358_s9 + $0x120] sm:$0xff] }
 0x482   :  { %v6149_v53 = vpop.f32.mrf.mxu0 }
 0x483   :  { %v6223_v10 = vadd.f32 %v6222_v61, %v6149_v53  ;;  %v6699_v61 = vld [vmem:[%s13358_s9 + $0x20] sm:$0xff]  ;;  %v6714_v53 = vld [vmem:[%s13358_s9 + $0x98] sm:$0xff] }
 0x484   :  { %v9974_v35 = vpop.f32.mrf.mxu0 }
 0x485   :  { %v6746_v35 = vld [vmem:[%s13358_s9 + $0x198] sm:$0xff] }
 0x487   :  { %v6391_v9 = vpop.f32.mrf.mxu1 }
 0x488   :  { %v6395_v46 = vadd.f32 %v6391_v9, %v6066_v14  ;;  %v6698_v9 = vld [vmem:[%s13358_s9 + $0x18] sm:$0xff]  ;;  %v6697_v14 = vld [vmem:[%s13358_s9 + $0x10] sm:$0xff] }
 0x489   :  { %v10031_v63 = vpop.f32.mrf.mxu1 }
 0x48a   :  { %v6730_v63 = vld [vmem:[%s13358_s9 + $0x118] sm:$0xff] }
 0x493   :  { %v6306_v57 = vpop.f32.mrf.mxu0 }
 0x494   :  { %v6310_v32 = vadd.f32 %v6306_v57, %v5909_v43  ;;  %v6716_v43 = vld [vmem:[%s13358_s9 + $0xa8] sm:$0xff]  ;;  %v6713_v57 = vld [vmem:[%s13358_s9 + $0x90] sm:$0xff] }
 0x495   :  { %v10012_v24 = vpop.f32.mrf.mxu0 }
 0x496   :  { %v6481_v11 = vadd.f32 %v6395_v46, %v6310_v32  ;;  %v6745_v24 = vld [vmem:[%s13358_s9 + $0x190] sm:$0xff]  ;;  %v6744_v46 = vld [vmem:[%s13358_s9 + $0x188] sm:$0xff] }
 0x497   :  { %v6729_v32 = vld [vmem:[%s13358_s9 + $0x110] sm:$0xff] }
 0x4a3   :  { %v6476_v30 = vpop.f32.mrf.mxu0 }
 0x4a4   :  { %v6480_v51 = vadd.f32 %v6476_v30, %v6223_v10  ;;  %v6712_v10 = vld [vmem:[%s13358_s9 + $0x88] sm:$0xff] }
 0x4a5   :  { %v10050_v26 = vpop.f32.mrf.mxu0  ;;  %v6696_v30 = vld [vmem:[%s13358_s9 + $0x8] sm:$0xff] }
 0x4a6   :  { %v6482_v16 = vadd.f32 %v6481_v11, %v6480_v51  ;;  %v6728_v11 = vld [vmem:[%s13358_s9 + $0x108] sm:$0xff]  ;;  %v6711_v51 = vld [vmem:[%s13358_s9 + $0x80] sm:$0xff] }
 0x4a7   :  { %v6695_v26 = vld [vmem:[%s13358_s9] sm:$0xff] }
 0x4a8   :  { %v6490_v38 = vadd.f32 %v7662_v31, %v6482_v16  ;;  %v6743_v31 = vld [vmem:[%s13358_s9 + $0x180] sm:$0xff] }
 0x4a9   :  { %v6727_v16 = vld [vmem:[%s13358_s9 + $0x100] sm:$0xff] }
 0x4aa   :  { %v6491_v27 = vmax.f32 %v6490_v38, 0.0  ;;  %v6526_v38 = vlaneseq }
 0x4ac   :  { %7663 = vmatmul.mubr.msk.f32.vlgmr.msra.gmra.mxu1 %vm450_vm0, %v6491_v27  ;;  %7664 = vmatmul.mubr.msk.f32.vlgmr.msra.gmra.mxu0 %vm450_vm0, %v6491_v27  ;;  %v6527_v27 = vshrl.u32 %v6526_v38, 7 }
 0x4ad   :  { %8803 = vmatpush3.msra.mxu1 %v6710_v48  ;;  %8838 = vmatpush3.msra.mxu0 %v6742_v5 }
 0x4ae   :  { %8804 = vmatprep.subr.mxu1 %v6725_v44  ;;  %8839 = vmatprep.subr.mxu0 %v6757_v49  ;;  %v6528_v48 = vsub.s32 0, %v6527_v27  ;;  %v6536_v5 = vsub.s32 2, %v6527_v27  ;;  %v6524_v44 = vld [vmem:[%s13360_s8] sm:$0xf]  ;;  %v6532_v49 = vsub.s32 1, %v6527_v27 }
 0x4af   :  { %8805 = vmatpush3.msra.mxu1 %v6709_v36  ;;  %8840 = vmatpush3.msra.mxu0 %v6741_v22  ;;  %v6540_v36 = vsub.s32 3, %v6527_v27 }
 0x4b0   :  { %8806 = vmatprep.subr.mxu1 %v6724_v41  ;;  %8841 = vmatprep.subr.mxu0 %v6756_v15  ;;  %v6529_v22 = vrot.slane %v6524_v44, %v6528_v48  ;;  %v6537_v41 = vrot.slane %v6524_v44, %v6536_v5  ;;  %v6533_v15 = vrot.slane %v6524_v44, %v6532_v49 }
 0x4b1   :  { %8807 = vmatpush3.msra.mxu1 %v6708_v21  ;;  %8842 = vmatpush3.msra.mxu0 %v6740_v29  ;;  %v6541_v21 = vrot.slane %v6524_v44, %v6540_v36 }
 0x4b2   :  { %8808 = vmatprep.subr.mxu1 %v6723_v6  ;;  %8843 = vmatprep.subr.mxu0 %v6755_v34 }
 0x4b3   :  { %8809 = vmatpush3.msra.mxu1 %v6707_v55  ;;  %8844 = vmatpush3.msra.mxu0 %v6739_v18 }
 0x4b4   :  { %8810 = vmatprep.subr.mxu1 %v6722_v12  ;;  %8845 = vmatprep.subr.mxu0 %v6754_v62 }
 0x4b5   :  { %8811 = vmatpush3.msra.mxu1 %v6706_v33  ;;  %8846 = vmatpush3.msra.mxu0 %v6738_v19 }
 0x4b6   :  { %8812 = vmatprep.subr.mxu1 %v6721_v8  ;;  %8847 = vmatprep.subr.mxu0 %v6753_v13 }
 0x4b7   :  { %8813 = vmatpush3.msra.mxu1 %v6705_v47  ;;  %8848 = vmatpush3.msra.mxu0 %v6737_v2 }
 0x4b8   :  { %8814 = vmatprep.subr.mxu1 %v6720_v17  ;;  %8849 = vmatprep.subr.mxu0 %v6752_v56  ;;  %v7665_v56 = vld [vmem:[%s13361_s10] ss:$0 sm:$0xff] }
 0x4b9   :  { %8815 = vmatpush3.msra.mxu1 %v6704_v28  ;;  %8850 = vmatpush3.msra.mxu0 %v6736_v52 }
 0x4ba   :  { %8816 = vmatprep.subr.mxu1 %v6719_v60  ;;  %8851 = vmatprep.subr.mxu0 %v6751_v50 }
 0x4bb   :  { %8817 = vmatpush3.msra.mxu1 %v6703_v45  ;;  %8852 = vmatpush3.msra.mxu0 %v6735_v40 }
 0x4bc   :  { %8818 = vmatprep.subr.mxu1 %v6718_v23  ;;  %8853 = vmatprep.subr.mxu0 %v6750_v0 }
 0x4bd   :  { %8819 = vmatpush3.msra.mxu1 %v6702_v7  ;;  %8854 = vmatpush3.msra.mxu0 %v6734_v42 }
 0x4be   :  { %8820 = vmatprep.subr.mxu1 %v6717_v54  ;;  %8855 = vmatprep.subr.mxu0 %v6749_v37 }
 0x4bf   :  { %8821 = vmatpush3.msra.mxu1 %v6701_v25  ;;  %8856 = vmatpush3.msra.mxu0 %v6733_v59 }
 0x4c0   :  { %8822 = vmatprep.subr.mxu1 %v6716_v43  ;;  %8857 = vmatprep.subr.mxu0 %v6748_v39 }
 0x4c1   :  { %8823 = vmatpush3.msra.mxu1 %v6700_v58  ;;  %8858 = vmatpush3.msra.mxu0 %v6732_v3 }
 0x4c2   :  { %8824 = vmatprep.subr.mxu1 %v6715_v4  ;;  %8859 = vmatprep.subr.mxu0 %v6747_v20 }
 0x4c3   :  { %8825 = vmatpush3.msra.mxu1 %v6699_v61  ;;  %8860 = vmatpush3.msra.mxu0 %v6731_v1 }
 0x4c4   :  { %8826 = vmatprep.subr.mxu1 %v6714_v53  ;;  %8861 = vmatprep.subr.mxu0 %v6746_v35 }
 0x4c5   :  { %8827 = vmatpush3.msra.mxu1 %v6698_v9  ;;  %8862 = vmatpush3.msra.mxu0 %v6730_v63 }
 0x4c6   :  { %8828 = vmatprep.subr.mxu1 %v6713_v57  ;;  %8863 = vmatprep.subr.mxu0 %v6745_v24 }
 0x4c7   :  { %8829 = vmatpush3.msra.mxu1 %v6697_v14  ;;  %8864 = vmatpush3.msra.mxu0 %v6729_v32 }
 0x4c8   :  { %8830 = vmatprep.subr.mxu1 %v6712_v10  ;;  %8865 = vmatprep.subr.mxu0 %v6744_v46 }
 0x4c9   :  { %8831 = vmatpush3.msra.mxu1 %v6696_v30  ;;  %8866 = vmatpush3.msra.mxu0 %v6728_v11 }
 0x4ca   :  { %8832 = vmatprep.subr.mxu1 %v6711_v51  ;;  %8867 = vmatprep.subr.mxu0 %v6743_v31 }
 0x4cb   :  { %8833 = vmatpush3.msra.mxu1 %v6695_v26  ;;  %8868 = vmatpush3.msra.mxu0 %v6727_v16 }
 0x56c   :  { %v6615_v29 = vpop.f32.mrf.mxu1  ;;  %v6686_v6 = vpop.f32.mrf.mxu0 }
 0x56d   :  { %v6616_v34 = vadd.f32 %v6615_v29, %v6529_v22  ;;  %v6687_v55 = vadd.f32 %v6686_v6, %v6537_v41 }
 0x56e   :  { %v6617_v18 = vpop.f32.mrf.mxu1  ;;  %v6688_v12 = vpop.f32.mrf.mxu0 }
 0x56f   :  { %v6618_v62 = vadd.f32 %v6617_v18, %v6533_v15  ;;  %v6689_v33 = vadd.f32 %v6688_v12, %v6541_v21  ;;  %v6691_v13 = vmax.f32 %v6616_v34, 0.0  ;;  %v6693_v47 = vmax.f32 %v6687_v55, 0.0 }
 0x571   :  { %v6692_v19 = vmax.f32 %v6618_v62, 0.0  ;;  %v6694_v8 = vmax.f32 %v6689_v33, 0.0 }
 0x573   :  { %6830 = vmatprep.mubr.f32.mxu1 %v6692_v19  ;;  %6900 = vmatprep.mubr.f32.mxu0 %v6694_v8 }
 0x574   :  { %6831 = vmatmul.mubr.f32.vlgmr.msra.gmra.mxu1 %v6691_v13  ;;  %6901 = vmatmul.mubr.f32.vlgmr.msra.gmra.mxu0 %v6693_v47 }
 0x634   :  { %v8834_v2 = vpop.f32.mrf.mxu1  ;;  %v8869_v17 = vpop.f32.mrf.mxu0 }
 0x636   :  { %v8835_v28 = vpop.f32.mrf.mxu1  ;;  %v8870_v52 = vpop.f32.mrf.mxu0 }
 0x637   :  { %v8836_v60 = vadd.f32 %v8835_v28, %v8834_v2  ;;  %v8871_v45 = vadd.f32 %v8870_v52, %v8869_v17 }
 0x639   :  { %v6833_v50 = vadd.f32 %v8836_v60, %v7665_v56 }
 0x63b   :  { %v6903_v40 = vadd.f32 %v8871_v45, %v6833_v50 }
 0x63d   :  { %6906 = vst [vmem:[%s13362_s11] sm:$0xff] %v6903_v40 }

</bundles_post_ra>
